<compile_context>
chip_gen: v7x
topology: tpu7x:2x2x1
jax: 0.10.0
libtpu: 0.0.40
codegen_flags: <defaults>
</compile_context>

<pallas_src>
import jax
import jax.numpy as jnp
from jax.experimental import pallas as pl
from jax.experimental.pallas import tpu as pltpu

# ---- static dimensions (from the PyTorch module) ---------------------------
AGENT_STATE_LEN = 73
N_CHAR, D_CHAR = 100, 16
N_ROLE, D_ROLE = 8, 8
N_BUFF, D_BUFF = 50, 6
N_STATES = AGENT_STATE_LEN - 3                     # 70
AGENT_IN = D_CHAR + D_ROLE + D_BUFF + N_STATES     # 100
AGENT_OUT = 128
GLOBAL_LEN = 30
GLOBAL_OUT = 64
N_AGENTS = 6
SHARE_H = 256
SHARE_OUT = 128
N_ACTIONS = 52

LANE = 128
PACK_W = LANE * (1 + N_AGENTS)                     # 896: packed input / share-in width
SLAB_W = 256                                       # per-agent fused matmul K
HEAD_W = 128                                       # padded head width (52 logits + 1 value)

# per-agent slab lane offsets
CHAR_OFF = AGENT_STATE_LEN                         # 73  .. 172  char one-hot
ROLE_OFF = CHAR_OFF + N_CHAR                       # 173 .. 180  role one-hot
BUFF_OFF = ROLE_OFF + N_ROLE                       # 181 .. 230  buff one-hot
BIAS_LANE = SLAB_W - 1                             # 255         bias indicator


# ---- Pallas kernel ----------------------------------------------------------
def model_kernel(x_ref, e_ref, wg_ref, bg_ref, w1_ref, b1_ref,
                 w2_ref, b2_ref, wh_ref, bh_ref, out_ref, slab_ref):
    f32 = jnp.float32
    bf16 = jnp.bfloat16
    tb = out_ref.shape[0]

    # Global branch: ReLU([tb,128] @ [128,128]).  Weight cols 64..127 are zero
    # and bias lanes 64..127 are zero, so g lanes 64..127 are exactly 0 and the
    # store below also zero-fills the padding lanes of the share slab.
    g = jnp.maximum(
        jnp.dot(x_ref[:, 0:LANE], wg_ref[...], preferred_element_type=f32)
        + bg_ref[...], 0.0)                                     # [tb, 128]
    slab_ref[:, 0:LANE] = g.astype(bf16)

    # Hoisted out of the agent loop.
    iota = jax.lax.broadcasted_iota(jnp.int32, (tb, SLAB_W), 1)  # [tb, 256]
    bias_mask = iota == BIAS_LANE
    zeros_hi = jnp.zeros((tb, SLAB_W - LANE), bf16)

    for a in range(N_AGENTS):
        base = LANE * (a + 1)
        xa = x_ref[:, base:base + LANE]                          # [tb,128] bf16
        ids = xa[:, 0:3].astype(f32).astype(jnp.int32)           # [tb, 3]
        # Combined one-hot + bias indicator (one compare per vocab + const).
        oh = ((iota == ids[:, 0:1] + CHAR_OFF)
              | (iota == ids[:, 1:2] + ROLE_OFF)
              | (iota == ids[:, 2:3] + BUFF_OFF)
              | bias_mask)
        # Fused slab: raw features at lanes 0..72 (id lanes hit zero weight
        # rows), one-hots at 73..230, bias at 255.
        slab_a = jnp.concatenate([xa, zeros_hi], axis=1) + oh.astype(bf16)
        ag = jnp.maximum(
            jnp.dot(slab_a, e_ref[a], preferred_element_type=f32), 0.0)
        slab_ref[:, base:base + LANE] = ag.astype(bf16)

    # Share MLP + combined head on the lane-dense [tb, 896] slab.
    h1 = jnp.maximum(
        jnp.dot(slab_ref[...], w1_ref[...], preferred_element_type=f32)
        + b1_ref[...], 0.0)                                      # [tb, 256]
    h2 = jnp.maximum(
        jnp.dot(h1.astype(bf16), w2_ref[...], preferred_element_type=f32)
        + b2_ref[...], 0.0)                                      # [tb, 128]
    out_ref[...] = (jnp.dot(h2.astype(bf16), wh_ref[...],
                            preferred_element_type=f32) + bh_ref[...])


# ---- wrapper ----------------------------------------------------------------
def _round_up(x, m):
    return (x + m - 1) // m * m


def _choose_tile(B, tb_max):
    """Pick a batch tile so the last tile is not mostly padding."""
    tb_max = max(8, min(tb_max, _round_up(B, 8)))
    n_tiles = -(-B // tb_max)
    tb = _round_up(-(-B // n_tiles), 8)
    return tb, tb * n_tiles, n_tiles


def pack_inputs(global_x, agent_xs, b_pad):
    """Pack [global | agent0..agent5] into one lane-dense [b_pad, 896] bf16."""
    B = global_x.shape[0]
    parts = [jnp.zeros((B, LANE), jnp.float32)
             .at[:, :GLOBAL_LEN].set(global_x.astype(jnp.float32))]
    for x in agent_xs:
        parts.append(jnp.zeros((B, LANE), jnp.float32)
                     .at[:, :AGENT_STATE_LEN].set(x.astype(jnp.float32)))
    packed = jnp.concatenate(parts, axis=1).astype(jnp.bfloat16)
    if b_pad > B:
        packed = jnp.pad(packed, ((0, b_pad - B), (0, 0)))
    return packed


def model_forward_pallas(global_x, agent_xs, fp, *, tb_max=1024):
    """Runs the fused Model trunk. Returns (logits [B,52], value [B,1])."""
    B = global_x.shape[0]
    tb, b_pad, n_tiles = _choose_tile(B, tb_max)
    packed = pack_inputs(global_x, agent_xs, b_pad)

    def resident(shape):
        return pl.BlockSpec(shape, lambda i, _n=len(shape): (0,) * _n)

    out = pl.pallas_call(
        model_kernel,
        out_shape=jax.ShapeDtypeStruct((b_pad, HEAD_W), jnp.float32),
        grid=(n_tiles,),
        in_specs=[
            pl.BlockSpec((tb, PACK_W), lambda i: (i, 0)),        # packed inputs
            resident((N_AGENTS, SLAB_W, AGENT_OUT)),             # fused agent weights
            resident((LANE, LANE)),                              # wg (padded)
            resident((1, LANE)),                                 # bg (padded)
            resident((PACK_W, SHARE_H)),                         # w1 (padded rows)
            resident((1, SHARE_H)),                              # b1
            resident((SHARE_H, SHARE_OUT)),                      # w2
            resident((1, SHARE_OUT)),                            # b2
            resident((SHARE_OUT, HEAD_W)),                       # combined head W
            resident((1, HEAD_W)),                               # combined head b
        ],
        out_specs=pl.BlockSpec((tb, HEAD_W), lambda i: (i, 0)),
        scratch_shapes=[pltpu.VMEM((tb, PACK_W), jnp.bfloat16)],  # share-in slab
        # TODO(synk): on v7x, verify via xprof that the "parallel" batch axis is
        # actually sharded across both TensorCores; otherwise switch to an
        # explicit 2-core split (leading grid axis of size num_cores).
        compiler_params=pltpu.CompilerParams(
            dimension_semantics=("parallel",),
            vmem_limit_bytes=32 * 1024 * 1024),
    )(packed, fp["E"], fp["wg"], fp["bg"], fp["w1"], fp["b1"],
      fp["w2"], fp["b2"], fp["whead"], fp["bhead"])

    logits = out[:B, :N_ACTIONS]
    value = out[:B, N_ACTIONS:N_ACTIONS + 1]
    return logits, value


def model_apply(states, fp):
    """Mirrors Model.forward(states)."""
    logits, value = model_forward_pallas(states[0], list(states[1:7]), fp)
    if len(states) > 7:
        # TODO(synk): masked-softmax epilogue runs as a tiny plain-XLA op
        # (52 lanes), not inside the Pallas kernel.
        mask = states[7].astype(jnp.float32)
        masked = jnp.where(mask > 0, logits, jnp.finfo(jnp.float32).min)
        probs = jax.nn.softmax(masked, axis=1)
        return value, probs
    return logits


# ---- parameter construction & fusion ---------------------------------------
def init_raw_params(key):
    keys = iter(jax.random.split(key, 64))

    def linear(kin, kout):
        bound = 1.0 / (kin ** 0.5)
        w = jax.random.uniform(next(keys), (kin, kout), jnp.float32, -bound, bound)
        b = jax.random.uniform(next(keys), (kout,), jnp.float32, -bound, bound)
        return w, b

    agents = []
    for _ in range(N_AGENTS):
        ce = jax.random.normal(next(keys), (N_CHAR, D_CHAR), jnp.float32)
        re = jax.random.normal(next(keys), (N_ROLE, D_ROLE), jnp.float32)
        be = jax.random.normal(next(keys), (N_BUFF, D_BUFF), jnp.float32)
        w, b = linear(AGENT_IN, AGENT_OUT)
        agents.append((ce, re, be, w, b))
    wg, bg = linear(GLOBAL_LEN, GLOBAL_OUT)
    w1, b1 = linear(GLOBAL_OUT + N_AGENTS * AGENT_OUT, SHARE_H)
    w2, b2 = linear(SHARE_H, SHARE_OUT)
    wv, bv = linear(SHARE_OUT, 1)
    wa, ba = linear(SHARE_OUT, N_ACTIONS)
    return dict(agents=agents, wg=wg, bg=bg, w1=w1, b1=b1, w2=w2, b2=b2,
                wv=wv, bv=bv, wa=wa, ba=ba)


def fuse_params(rp):
    P = jax.lax.Precision.HIGHEST
    bf16 = jnp.bfloat16

    E = []
    for (ce, re, be, w, b) in rp["agents"]:
        e = jnp.zeros((SLAB_W, AGENT_OUT), jnp.float32)
        # state-feature rows at their raw positions (id rows 0..2 stay zero)
        e = e.at[3:AGENT_STATE_LEN].set(w[D_CHAR + D_ROLE + D_BUFF:])
        # embedding tables pre-multiplied into the linear weight
        e = e.at[CHAR_OFF:CHAR_OFF + N_CHAR].set(
            jnp.dot(ce, w[0:D_CHAR], precision=P))
        e = e.at[ROLE_OFF:ROLE_OFF + N_ROLE].set(
            jnp.dot(re, w[D_CHAR:D_CHAR + D_ROLE], precision=P))
        e = e.at[BUFF_OFF:BUFF_OFF + N_BUFF].set(
            jnp.dot(be, w[D_CHAR + D_ROLE:D_CHAR + D_ROLE + D_BUFF], precision=P))
        # bias folded into the bias lane
        e = e.at[BIAS_LANE].set(b)
        E.append(e)
    E = jnp.stack(E).astype(bf16)                                # [6, 256, 128]

    wg = (jnp.zeros((LANE, LANE), jnp.float32)
          .at[:GLOBAL_LEN, :GLOBAL_OUT].set(rp["wg"])).astype(bf16)
    bg = jnp.zeros((1, LANE), jnp.float32).at[0, :GLOBAL_OUT].set(rp["bg"])

    w1 = jnp.zeros((PACK_W, SHARE_H), jnp.float32)
    w1 = w1.at[:GLOBAL_OUT].set(rp["w1"][:GLOBAL_OUT])
    for a in range(N_AGENTS):
        w1 = w1.at[LANE * (a + 1):LANE * (a + 2)].set(
            rp["w1"][GLOBAL_OUT + AGENT_OUT * a:GLOBAL_OUT + AGENT_OUT * (a + 1)])
    w1 = w1.astype(bf16)                                          # [896, 256]
    b1 = rp["b1"].reshape(1, SHARE_H)

    w2 = rp["w2"].astype(bf16)
    b2 = rp["b2"].reshape(1, SHARE_OUT)

    whead = jnp.zeros((SHARE_OUT, HEAD_W), jnp.float32)
    whead = whead.at[:, :N_ACTIONS].set(rp["wa"])
    whead = whead.at[:, N_ACTIONS:N_ACTIONS + 1].set(rp["wv"])
    whead = whead.astype(bf16)
    bhead = jnp.zeros((1, HEAD_W), jnp.float32)
    bhead = bhead.at[0, :N_ACTIONS].set(rp["ba"])
    bhead = bhead.at[0, N_ACTIONS].set(rp["bv"][0])

    return dict(E=E, wg=wg, bg=bg, w1=w1, b1=b1, w2=w2, b2=b2,
                whead=whead, bhead=bhead)


# ---- references -------------------------------------------------------------
def reference_forward(states, rp):
    """Pure-f32 mirror of the PyTorch forward."""
    P = jax.lax.Precision.HIGHEST
    g = jnp.maximum(
        jnp.dot(states[0].astype(jnp.float32), rp["wg"], precision=P) + rp["bg"],
        0.0)
    feats = [g]
    for a in range(N_AGENTS):
        x = states[1 + a].astype(jnp.float32)
        ce, re, be, w, b = rp["agents"][a]
        ic = x[:, 0].astype(jnp.int32)
        ir = x[:, 1].astype(jnp.int32)
        ib = x[:, 2].astype(jnp.int32)
        f = jnp.concatenate([ce[ic], re[ir], be[ib], x[:, 3:]], axis=1)
        feats.append(jnp.maximum(jnp.dot(f, w, precision=P) + b, 0.0))
    h = jnp.concatenate(feats, axis=1)
    h = jnp.maximum(jnp.dot(h, rp["w1"], precision=P) + rp["b1"], 0.0)
    h = jnp.maximum(jnp.dot(h, rp["w2"], precision=P) + rp["b2"], 0.0)
    logits = jnp.dot(h, rp["wa"], precision=P) + rp["ba"]
    value = jnp.dot(h, rp["wv"], precision=P) + rp["bv"]
    return logits, value


def reference_forward_fused(states, fp):
    """Plain-JAX mirror of the kernel math (bf16 operands, f32 accumulation)."""
    f32, bf16 = jnp.float32, jnp.bfloat16
    B = states[0].shape[0]

    def pad128(x, n):
        return (jnp.zeros((B, LANE), f32).at[:, :n].set(x.astype(f32))).astype(bf16)

    g = jnp.maximum(
        jnp.dot(pad128(states[0], GLOBAL_LEN), fp["wg"],
                preferred_element_type=f32) + fp["bg"], 0.0)
    parts = [g.astype(bf16)]
    for a in range(N_AGENTS):
        x = states[1 + a].astype(f32)
        xa = pad128(x, AGENT_STATE_LEN)
        ic = x[:, 0].astype(jnp.int32)
        ir = x[:, 1].astype(jnp.int32)
        ib = x[:, 2].astype(jnp.int32)
        e = fp["E"][a]
        emb = (e[CHAR_OFF + ic].astype(f32) + e[ROLE_OFF + ir].astype(f32)
               + e[BUFF_OFF + ib].astype(f32) + e[BIAS_LANE].astype(f32))
        st = jnp.dot(xa, e[:LANE], preferred_element_type=f32)
        parts.append(jnp.maximum(st + emb, 0.0).astype(bf16))
    hin = jnp.concatenate(parts, axis=1)
    h1 = jnp.maximum(jnp.dot(hin, fp["w1"], preferred_element_type=f32)
                     + fp["b1"], 0.0)
    h2 = jnp.maximum(jnp.dot(h1.astype(bf16), fp["w2"],
                             preferred_element_type=f32) + fp["b2"], 0.0)
    out = jnp.dot(h2.astype(bf16), fp["whead"],
                  preferred_element_type=f32) + fp["bhead"]
    return out[:, :N_ACTIONS], out[:, N_ACTIONS:N_ACTIONS + 1]


# ---- demo / correctness check -----------------------------------------------
if __name__ == "__main__":
    key = jax.random.PRNGKey(0)
    k_params, k_data = jax.random.split(key)

    rp = init_raw_params(k_params)
    fp = fuse_params(rp)

    B = 32
    dkeys = iter(jax.random.split(k_data, 32))
    global_x = jax.random.normal(next(dkeys), (B, GLOBAL_LEN), jnp.float32)
    agent_xs = []
    for _ in range(N_AGENTS):
        ic = jax.random.randint(next(dkeys), (B, 1), 0, N_CHAR).astype(jnp.float32)
        ir = jax.random.randint(next(dkeys), (B, 1), 0, N_ROLE).astype(jnp.float32)
        ib = jax.random.randint(next(dkeys), (B, 1), 0, N_BUFF).astype(jnp.float32)
        st = jax.random.normal(next(dkeys), (B, N_STATES), jnp.float32)
        agent_xs.append(jnp.concatenate([ic, ir, ib, st], axis=1))   # [B, 73]
    states = [global_x] + agent_xs

    # Fused Pallas trunk.
    logits, value = model_forward_pallas(global_x, agent_xs, fp)
    logits, value = jax.block_until_ready((logits, value))

    # Module-level forward (no action mask -> returns logits, like PyTorch).
    logits_apply = jax.block_until_ready(model_apply(states, fp))

    fused_logits, fused_value = reference_forward_fused(states, fp)
    ref_logits, ref_value = reference_forward(states, rp)

    assert logits.shape == (B, N_ACTIONS)
    assert value.shape == (B, 1)
    # Tight check vs a plain-JAX mirror of the kernel's bf16 math.
    assert jnp.allclose(logits, fused_logits, atol=5e-3, rtol=5e-3), \
        "logits mismatch vs bf16-fused reference"
    assert jnp.allclose(value, fused_value, atol=5e-3, rtol=5e-3), \
        "value mismatch vs bf16-fused reference"
    # Looser check vs the full-f32 PyTorch-equivalent reference (bf16 rounding).
    assert jnp.allclose(logits, ref_logits, atol=0.15, rtol=0.1), \
        "logits mismatch vs f32 reference"
    assert jnp.allclose(value, ref_value, atol=0.15, rtol=0.1), \
        "value mismatch vs f32 reference"
    assert jnp.allclose(logits_apply, logits, atol=1e-5, rtol=1e-5), \
        "model_apply logits mismatch"

    print("KERNEL_OK")
</pallas_src>

<mosaic_0001>
module attributes {stable_mosaic.version = 11 : i64} {
  func.func @model_kernel(%arg0: i32, %arg1: memref<32x896xbf16, #tpu.memory_space<vmem>>, %arg2: memref<6x256x128xbf16, #tpu.memory_space<vmem>>, %arg3: memref<128x128xbf16, #tpu.memory_space<vmem>>, %arg4: memref<1x128xf32, #tpu.memory_space<vmem>>, %arg5: memref<896x256xbf16, #tpu.memory_space<vmem>>, %arg6: memref<1x256xf32, #tpu.memory_space<vmem>>, %arg7: memref<256x128xbf16, #tpu.memory_space<vmem>>, %arg8: memref<1x128xf32, #tpu.memory_space<vmem>>, %arg9: memref<128x128xbf16, #tpu.memory_space<vmem>>, %arg10: memref<1x128xf32, #tpu.memory_space<vmem>>, %arg11: memref<32x128xf32, #tpu.memory_space<vmem>>, %arg12: memref<32x896xbf16, #tpu.memory_space<vmem>>) attributes {dimension_semantics = [#tpu.dimension_semantics<parallel>], iteration_bounds = array<i64: 1>, scalar_prefetch = 0 : i64, scratch_operands = 1 : i64, tpu.core_type = #tpu.core_type<tc>, window_params = [{transform_indices = @transform_0, window_bounds = array<i64: 32, 896>}, {pipeline_mode = #tpu.pipeline_mode<synchronous>, transform_indices = @transform_1, window_bounds = array<i64: 6, 256, 128>}, {pipeline_mode = #tpu.pipeline_mode<synchronous>, transform_indices = @transform_2, window_bounds = array<i64: 128, 128>}, {pipeline_mode = #tpu.pipeline_mode<synchronous>, transform_indices = @transform_3, window_bounds = array<i64: 1, 128>}, {pipeline_mode = #tpu.pipeline_mode<synchronous>, transform_indices = @transform_4, window_bounds = array<i64: 896, 256>}, {pipeline_mode = #tpu.pipeline_mode<synchronous>, transform_indices = @transform_5, window_bounds = array<i64: 1, 256>}, {pipeline_mode = #tpu.pipeline_mode<synchronous>, transform_indices = @transform_6, window_bounds = array<i64: 256, 128>}, {pipeline_mode = #tpu.pipeline_mode<synchronous>, transform_indices = @transform_7, window_bounds = array<i64: 1, 128>}, {pipeline_mode = #tpu.pipeline_mode<synchronous>, transform_indices = @transform_8, window_bounds = array<i64: 128, 128>}, {pipeline_mode = #tpu.pipeline_mode<synchronous>, transform_indices = @transform_9, window_bounds = array<i64: 1, 128>}, {transform_indices = @transform_10, window_bounds = array<i64: 32, 128>}]} {
    %c0 = arith.constant 0 : index
    %c0_0 = arith.constant 0 : index
    %0 = vector.load %arg1[%c0, %c0_0] : memref<32x896xbf16, #tpu.memory_space<vmem>>, vector<32x128xbf16>
    %c0_1 = arith.constant 0 : index
    %c0_2 = arith.constant 0 : index
    %1 = vector.load %arg3[%c0_1, %c0_2] : memref<128x128xbf16, #tpu.memory_space<vmem>>, vector<128x128xbf16>
    %cst = arith.constant dense<0.000000e+00> : vector<32x128xf32>
    %2 = tpu.matmul %0, %1, %cst {dimension_numbers = #tpu.dot_dimension_numbers<[1], [0], [0], [1], [0, 0, 1, 1], [], []>} : vector<32x128xbf16>, vector<128x128xbf16>, vector<32x128xf32> -> vector<32x128xf32>
    %c0_3 = arith.constant 0 : index
    %c0_4 = arith.constant 0 : index
    %3 = vector.load %arg4[%c0_3, %c0_4] : memref<1x128xf32, #tpu.memory_space<vmem>>, vector<1x128xf32>
    %4 = vector.broadcast %3 : vector<1x128xf32> to vector<32x128xf32>
    %5 = arith.addf %2, %4 : vector<32x128xf32>
    %cst_5 = arith.constant 0.000000e+00 : f32
    %6 = vector.broadcast %cst_5 : f32 to vector<32x128xf32>
    %7 = arith.maximumf %5, %6 : vector<32x128xf32>
    %8 = arith.truncf %7 : vector<32x128xf32> to vector<32x128xbf16>
    %c0_6 = arith.constant 0 : index
    %c0_7 = arith.constant 0 : index
    %9 = vector.load %arg12[%c0_6, %c0_7] : memref<32x896xbf16, #tpu.memory_space<vmem>>, vector<32x128xbf16>
    tpu.vector_store %arg12[%c0_6, %c0_7], %8 {strides = array<i32>} : memref<32x896xbf16, #tpu.memory_space<vmem>>, vector<32x128xbf16>,
    %10 = tpu.iota {dimensions = array<i32: 1>} : vector<32x256xi32>
    %c255_i32 = arith.constant 255 : i32
    %11 = vector.broadcast %c255_i32 : i32 to vector<32x256xi32>
    %12 = arith.cmpi eq, %10, %11 : vector<32x256xi32>
    %cst_8 = arith.constant 0.000000e+00 : bf16
    %13 = vector.broadcast %cst_8 : bf16 to vector<32x128xbf16>
    %c0_9 = arith.constant 0 : index
    %c128 = arith.constant 128 : index
    %14 = vector.load %arg1[%c0_9, %c128] : memref<32x896xbf16, #tpu.memory_space<vmem>>, vector<32x128xbf16>
    %15 = vector.extract_strided_slice %14 {offsets = [0, 0], sizes = [32, 3], strides = [1, 1]} : vector<32x128xbf16> to vector<32x3xbf16>
    %16 = arith.extf %15 : vector<32x3xbf16> to vector<32x3xf32>
    %17 = arith.fptosi %16 : vector<32x3xf32> to vector<32x3xi32>
    %18 = vector.extract_strided_slice %17 {offsets = [0, 0], sizes = [32, 1], strides = [1, 1]} : vector<32x3xi32> to vector<32x1xi32>
    %c73_i32 = arith.constant 73 : i32
    %19 = vector.broadcast %c73_i32 : i32 to vector<32x1xi32>
    %20 = arith.addi %18, %19 : vector<32x1xi32>
    %21 = vector.broadcast %20 : vector<32x1xi32> to vector<32x256xi32>
    %22 = arith.cmpi eq, %10, %21 : vector<32x256xi32>
    %23 = vector.extract_strided_slice %17 {offsets = [0, 1], sizes = [32, 1], strides = [1, 1]} : vector<32x3xi32> to vector<32x1xi32>
    %c173_i32 = arith.constant 173 : i32
    %24 = vector.broadcast %c173_i32 : i32 to vector<32x1xi32>
    %25 = arith.addi %23, %24 : vector<32x1xi32>
    %26 = vector.broadcast %25 : vector<32x1xi32> to vector<32x256xi32>
    %27 = arith.cmpi eq, %10, %26 : vector<32x256xi32>
    %28 = arith.ori %22, %27 : vector<32x256xi1>
    %29 = vector.extract_strided_slice %17 {offsets = [0, 2], sizes = [32, 1], strides = [1, 1]} : vector<32x3xi32> to vector<32x1xi32>
    %c181_i32 = arith.constant 181 : i32
    %30 = vector.broadcast %c181_i32 : i32 to vector<32x1xi32>
    %31 = arith.addi %29, %30 : vector<32x1xi32>
    %32 = vector.broadcast %31 : vector<32x1xi32> to vector<32x256xi32>
    %33 = arith.cmpi eq, %10, %32 : vector<32x256xi32>
    %34 = arith.ori %28, %33 : vector<32x256xi1>
    %35 = arith.ori %34, %12 : vector<32x256xi1>
    %36 = tpu.concatenate %14, %13 in 1 : vector<32x128xbf16>, vector<32x128xbf16> -> vector<32x256xbf16>
    %37 = arith.extui %35 : vector<32x256xi1> to vector<32x256xi32>
    %38 = arith.sitofp %37 : vector<32x256xi32> to vector<32x256xf32>
    %39 = arith.truncf %38 : vector<32x256xf32> to vector<32x256xbf16>
    %40 = arith.addf %36, %39 : vector<32x256xbf16>
    %c0_10 = arith.constant 0 : index
    %c0_11 = arith.constant 0 : index
    %c0_12 = arith.constant 0 : index
    %41 = vector.load %arg2[%c0_10, %c0_11, %c0_12] : memref<6x256x128xbf16, #tpu.memory_space<vmem>>, vector<1x256x128xbf16>
    %42 = vector.shape_cast %41 : vector<1x256x128xbf16> to vector<256x128xbf16>
    %cst_13 = arith.constant dense<0.000000e+00> : vector<32x128xf32>
    %43 = tpu.matmul %40, %42, %cst_13 {dimension_numbers = #tpu.dot_dimension_numbers<[1], [0], [0], [1], [0, 0, 1, 1], [], []>} : vector<32x256xbf16>, vector<256x128xbf16>, vector<32x128xf32> -> vector<32x128xf32>
    %cst_14 = arith.constant 0.000000e+00 : f32
    %44 = vector.broadcast %cst_14 : f32 to vector<32x128xf32>
    %45 = arith.maximumf %43, %44 : vector<32x128xf32>
    %46 = arith.truncf %45 : vector<32x128xf32> to vector<32x128xbf16>
    %c0_15 = arith.constant 0 : index
    %c128_16 = arith.constant 128 : index
    %47 = vector.load %arg12[%c0_15, %c128_16] : memref<32x896xbf16, #tpu.memory_space<vmem>>, vector<32x128xbf16>
    tpu.vector_store %arg12[%c0_15, %c128_16], %46 {strides = array<i32>} : memref<32x896xbf16, #tpu.memory_space<vmem>>, vector<32x128xbf16>,
    %c0_17 = arith.constant 0 : index
    %c256 = arith.constant 256 : index
    %48 = vector.load %arg1[%c0_17, %c256] : memref<32x896xbf16, #tpu.memory_space<vmem>>, vector<32x128xbf16>
    %49 = vector.extract_strided_slice %48 {offsets = [0, 0], sizes = [32, 3], strides = [1, 1]} : vector<32x128xbf16> to vector<32x3xbf16>
    %50 = arith.extf %49 : vector<32x3xbf16> to vector<32x3xf32>
    %51 = arith.fptosi %50 : vector<32x3xf32> to vector<32x3xi32>
    %52 = vector.extract_strided_slice %51 {offsets = [0, 0], sizes = [32, 1], strides = [1, 1]} : vector<32x3xi32> to vector<32x1xi32>
    %c73_i32_18 = arith.constant 73 : i32
    %53 = vector.broadcast %c73_i32_18 : i32 to vector<32x1xi32>
    %54 = arith.addi %52, %53 : vector<32x1xi32>
    %55 = vector.broadcast %54 : vector<32x1xi32> to vector<32x256xi32>
    %56 = arith.cmpi eq, %10, %55 : vector<32x256xi32>
    %57 = vector.extract_strided_slice %51 {offsets = [0, 1], sizes = [32, 1], strides = [1, 1]} : vector<32x3xi32> to vector<32x1xi32>
    %c173_i32_19 = arith.constant 173 : i32
    %58 = vector.broadcast %c173_i32_19 : i32 to vector<32x1xi32>
    %59 = arith.addi %57, %58 : vector<32x1xi32>
    %60 = vector.broadcast %59 : vector<32x1xi32> to vector<32x256xi32>
    %61 = arith.cmpi eq, %10, %60 : vector<32x256xi32>
    %62 = arith.ori %56, %61 : vector<32x256xi1>
    %63 = vector.extract_strided_slice %51 {offsets = [0, 2], sizes = [32, 1], strides = [1, 1]} : vector<32x3xi32> to vector<32x1xi32>
    %c181_i32_20 = arith.constant 181 : i32
    %64 = vector.broadcast %c181_i32_20 : i32 to vector<32x1xi32>
    %65 = arith.addi %63, %64 : vector<32x1xi32>
    %66 = vector.broadcast %65 : vector<32x1xi32> to vector<32x256xi32>
    %67 = arith.cmpi eq, %10, %66 : vector<32x256xi32>
    %68 = arith.ori %62, %67 : vector<32x256xi1>
    %69 = arith.ori %68, %12 : vector<32x256xi1>
    %70 = tpu.concatenate %48, %13 in 1 : vector<32x128xbf16>, vector<32x128xbf16> -> vector<32x256xbf16>
    %71 = arith.extui %69 : vector<32x256xi1> to vector<32x256xi32>
    %72 = arith.sitofp %71 : vector<32x256xi32> to vector<32x256xf32>
    %73 = arith.truncf %72 : vector<32x256xf32> to vector<32x256xbf16>
    %74 = arith.addf %70, %73 : vector<32x256xbf16>
    %c1 = arith.constant 1 : index
    %c0_21 = arith.constant 0 : index
    %c0_22 = arith.constant 0 : index
    %75 = vector.load %arg2[%c1, %c0_21, %c0_22] : memref<6x256x128xbf16, #tpu.memory_space<vmem>>, vector<1x256x128xbf16>
    %76 = vector.shape_cast %75 : vector<1x256x128xbf16> to vector<256x128xbf16>
    %cst_23 = arith.constant dense<0.000000e+00> : vector<32x128xf32>
    %77 = tpu.matmul %74, %76, %cst_23 {dimension_numbers = #tpu.dot_dimension_numbers<[1], [0], [0], [1], [0, 0, 1, 1], [], []>} : vector<32x256xbf16>, vector<256x128xbf16>, vector<32x128xf32> -> vector<32x128xf32>
    %cst_24 = arith.constant 0.000000e+00 : f32
    %78 = vector.broadcast %cst_24 : f32 to vector<32x128xf32>
    %79 = arith.maximumf %77, %78 : vector<32x128xf32>
    %80 = arith.truncf %79 : vector<32x128xf32> to vector<32x128xbf16>
    %c0_25 = arith.constant 0 : index
    %c256_26 = arith.constant 256 : index
    %81 = vector.load %arg12[%c0_25, %c256_26] : memref<32x896xbf16, #tpu.memory_space<vmem>>, vector<32x128xbf16>
    tpu.vector_store %arg12[%c0_25, %c256_26], %80 {strides = array<i32>} : memref<32x896xbf16, #tpu.memory_space<vmem>>, vector<32x128xbf16>,
    %c0_27 = arith.constant 0 : index
    %c384 = arith.constant 384 : index
    %82 = vector.load %arg1[%c0_27, %c384] : memref<32x896xbf16, #tpu.memory_space<vmem>>, vector<32x128xbf16>
    %83 = vector.extract_strided_slice %82 {offsets = [0, 0], sizes = [32, 3], strides = [1, 1]} : vector<32x128xbf16> to vector<32x3xbf16>
    %84 = arith.extf %83 : vector<32x3xbf16> to vector<32x3xf32>
    %85 = arith.fptosi %84 : vector<32x3xf32> to vector<32x3xi32>
    %86 = vector.extract_strided_slice %85 {offsets = [0, 0], sizes = [32, 1], strides = [1, 1]} : vector<32x3xi32> to vector<32x1xi32>
    %c73_i32_28 = arith.constant 73 : i32
    %87 = vector.broadcast %c73_i32_28 : i32 to vector<32x1xi32>
    %88 = arith.addi %86, %87 : vector<32x1xi32>
    %89 = vector.broadcast %88 : vector<32x1xi32> to vector<32x256xi32>
    %90 = arith.cmpi eq, %10, %89 : vector<32x256xi32>
    %91 = vector.extract_strided_slice %85 {offsets = [0, 1], sizes = [32, 1], strides = [1, 1]} : vector<32x3xi32> to vector<32x1xi32>
    %c173_i32_29 = arith.constant 173 : i32
    %92 = vector.broadcast %c173_i32_29 : i32 to vector<32x1xi32>
    %93 = arith.addi %91, %92 : vector<32x1xi32>
    %94 = vector.broadcast %93 : vector<32x1xi32> to vector<32x256xi32>
    %95 = arith.cmpi eq, %10, %94 : vector<32x256xi32>
    %96 = arith.ori %90, %95 : vector<32x256xi1>
    %97 = vector.extract_strided_slice %85 {offsets = [0, 2], sizes = [32, 1], strides = [1, 1]} : vector<32x3xi32> to vector<32x1xi32>
    %c181_i32_30 = arith.constant 181 : i32
    %98 = vector.broadcast %c181_i32_30 : i32 to vector<32x1xi32>
    %99 = arith.addi %97, %98 : vector<32x1xi32>
    %100 = vector.broadcast %99 : vector<32x1xi32> to vector<32x256xi32>
    %101 = arith.cmpi eq, %10, %100 : vector<32x256xi32>
    %102 = arith.ori %96, %101 : vector<32x256xi1>
    %103 = arith.ori %102, %12 : vector<32x256xi1>
    %104 = tpu.concatenate %82, %13 in 1 : vector<32x128xbf16>, vector<32x128xbf16> -> vector<32x256xbf16>
    %105 = arith.extui %103 : vector<32x256xi1> to vector<32x256xi32>
    %106 = arith.sitofp %105 : vector<32x256xi32> to vector<32x256xf32>
    %107 = arith.truncf %106 : vector<32x256xf32> to vector<32x256xbf16>
    %108 = arith.addf %104, %107 : vector<32x256xbf16>
    %c2 = arith.constant 2 : index
    %c0_31 = arith.constant 0 : index
    %c0_32 = arith.constant 0 : index
    %109 = vector.load %arg2[%c2, %c0_31, %c0_32] : memref<6x256x128xbf16, #tpu.memory_space<vmem>>, vector<1x256x128xbf16>
    %110 = vector.shape_cast %109 : vector<1x256x128xbf16> to vector<256x128xbf16>
    %cst_33 = arith.constant dense<0.000000e+00> : vector<32x128xf32>
    %111 = tpu.matmul %108, %110, %cst_33 {dimension_numbers = #tpu.dot_dimension_numbers<[1], [0], [0], [1], [0, 0, 1, 1], [], []>} : vector<32x256xbf16>, vector<256x128xbf16>, vector<32x128xf32> -> vector<32x128xf32>
    %cst_34 = arith.constant 0.000000e+00 : f32
    %112 = vector.broadcast %cst_34 : f32 to vector<32x128xf32>
    %113 = arith.maximumf %111, %112 : vector<32x128xf32>
    %114 = arith.truncf %113 : vector<32x128xf32> to vector<32x128xbf16>
    %c0_35 = arith.constant 0 : index
    %c384_36 = arith.constant 384 : index
    %115 = vector.load %arg12[%c0_35, %c384_36] : memref<32x896xbf16, #tpu.memory_space<vmem>>, vector<32x128xbf16>
    tpu.vector_store %arg12[%c0_35, %c384_36], %114 {strides = array<i32>} : memref<32x896xbf16, #tpu.memory_space<vmem>>, vector<32x128xbf16>,
    %c0_37 = arith.constant 0 : index
    %c512 = arith.constant 512 : index
    %116 = vector.load %arg1[%c0_37, %c512] : memref<32x896xbf16, #tpu.memory_space<vmem>>, vector<32x128xbf16>
    %117 = vector.extract_strided_slice %116 {offsets = [0, 0], sizes = [32, 3], strides = [1, 1]} : vector<32x128xbf16> to vector<32x3xbf16>
    %118 = arith.extf %117 : vector<32x3xbf16> to vector<32x3xf32>
    %119 = arith.fptosi %118 : vector<32x3xf32> to vector<32x3xi32>
    %120 = vector.extract_strided_slice %119 {offsets = [0, 0], sizes = [32, 1], strides = [1, 1]} : vector<32x3xi32> to vector<32x1xi32>
    %c73_i32_38 = arith.constant 73 : i32
    %121 = vector.broadcast %c73_i32_38 : i32 to vector<32x1xi32>
    %122 = arith.addi %120, %121 : vector<32x1xi32>
    %123 = vector.broadcast %122 : vector<32x1xi32> to vector<32x256xi32>
    %124 = arith.cmpi eq, %10, %123 : vector<32x256xi32>
    %125 = vector.extract_strided_slice %119 {offsets = [0, 1], sizes = [32, 1], strides = [1, 1]} : vector<32x3xi32> to vector<32x1xi32>
    %c173_i32_39 = arith.constant 173 : i32
    %126 = vector.broadcast %c173_i32_39 : i32 to vector<32x1xi32>
    %127 = arith.addi %125, %126 : vector<32x1xi32>
    %128 = vector.broadcast %127 : vector<32x1xi32> to vector<32x256xi32>
    %129 = arith.cmpi eq, %10, %128 : vector<32x256xi32>
    %130 = arith.ori %124, %129 : vector<32x256xi1>
    %131 = vector.extract_strided_slice %119 {offsets = [0, 2], sizes = [32, 1], strides = [1, 1]} : vector<32x3xi32> to vector<32x1xi32>
    %c181_i32_40 = arith.constant 181 : i32
    %132 = vector.broadcast %c181_i32_40 : i32 to vector<32x1xi32>
    %133 = arith.addi %131, %132 : vector<32x1xi32>
    %134 = vector.broadcast %133 : vector<32x1xi32> to vector<32x256xi32>
    %135 = arith.cmpi eq, %10, %134 : vector<32x256xi32>
    %136 = arith.ori %130, %135 : vector<32x256xi1>
    %137 = arith.ori %136, %12 : vector<32x256xi1>
    %138 = tpu.concatenate %116, %13 in 1 : vector<32x128xbf16>, vector<32x128xbf16> -> vector<32x256xbf16>
    %139 = arith.extui %137 : vector<32x256xi1> to vector<32x256xi32>
    %140 = arith.sitofp %139 : vector<32x256xi32> to vector<32x256xf32>
    %141 = arith.truncf %140 : vector<32x256xf32> to vector<32x256xbf16>
    %142 = arith.addf %138, %141 : vector<32x256xbf16>
    %c3 = arith.constant 3 : index
    %c0_41 = arith.constant 0 : index
    %c0_42 = arith.constant 0 : index
    %143 = vector.load %arg2[%c3, %c0_41, %c0_42] : memref<6x256x128xbf16, #tpu.memory_space<vmem>>, vector<1x256x128xbf16>
    %144 = vector.shape_cast %143 : vector<1x256x128xbf16> to vector<256x128xbf16>
    %cst_43 = arith.constant dense<0.000000e+00> : vector<32x128xf32>
    %145 = tpu.matmul %142, %144, %cst_43 {dimension_numbers = #tpu.dot_dimension_numbers<[1], [0], [0], [1], [0, 0, 1, 1], [], []>} : vector<32x256xbf16>, vector<256x128xbf16>, vector<32x128xf32> -> vector<32x128xf32>
    %cst_44 = arith.constant 0.000000e+00 : f32
    %146 = vector.broadcast %cst_44 : f32 to vector<32x128xf32>
    %147 = arith.maximumf %145, %146 : vector<32x128xf32>
    %148 = arith.truncf %147 : vector<32x128xf32> to vector<32x128xbf16>
    %c0_45 = arith.constant 0 : index
    %c512_46 = arith.constant 512 : index
    %149 = vector.load %arg12[%c0_45, %c512_46] : memref<32x896xbf16, #tpu.memory_space<vmem>>, vector<32x128xbf16>
    tpu.vector_store %arg12[%c0_45, %c512_46], %148 {strides = array<i32>} : memref<32x896xbf16, #tpu.memory_space<vmem>>, vector<32x128xbf16>,
    %c0_47 = arith.constant 0 : index
    %c640 = arith.constant 640 : index
    %150 = vector.load %arg1[%c0_47, %c640] : memref<32x896xbf16, #tpu.memory_space<vmem>>, vector<32x128xbf16>
    %151 = vector.extract_strided_slice %150 {offsets = [0, 0], sizes = [32, 3], strides = [1, 1]} : vector<32x128xbf16> to vector<32x3xbf16>
    %152 = arith.extf %151 : vector<32x3xbf16> to vector<32x3xf32>
    %153 = arith.fptosi %152 : vector<32x3xf32> to vector<32x3xi32>
    %154 = vector.extract_strided_slice %153 {offsets = [0, 0], sizes = [32, 1], strides = [1, 1]} : vector<32x3xi32> to vector<32x1xi32>
    %c73_i32_48 = arith.constant 73 : i32
    %155 = vector.broadcast %c73_i32_48 : i32 to vector<32x1xi32>
    %156 = arith.addi %154, %155 : vector<32x1xi32>
    %157 = vector.broadcast %156 : vector<32x1xi32> to vector<32x256xi32>
    %158 = arith.cmpi eq, %10, %157 : vector<32x256xi32>
    %159 = vector.extract_strided_slice %153 {offsets = [0, 1], sizes = [32, 1], strides = [1, 1]} : vector<32x3xi32> to vector<32x1xi32>
    %c173_i32_49 = arith.constant 173 : i32
    %160 = vector.broadcast %c173_i32_49 : i32 to vector<32x1xi32>
    %161 = arith.addi %159, %160 : vector<32x1xi32>
    %162 = vector.broadcast %161 : vector<32x1xi32> to vector<32x256xi32>
    %163 = arith.cmpi eq, %10, %162 : vector<32x256xi32>
    %164 = arith.ori %158, %163 : vector<32x256xi1>
    %165 = vector.extract_strided_slice %153 {offsets = [0, 2], sizes = [32, 1], strides = [1, 1]} : vector<32x3xi32> to vector<32x1xi32>
    %c181_i32_50 = arith.constant 181 : i32
    %166 = vector.broadcast %c181_i32_50 : i32 to vector<32x1xi32>
    %167 = arith.addi %165, %166 : vector<32x1xi32>
    %168 = vector.broadcast %167 : vector<32x1xi32> to vector<32x256xi32>
    %169 = arith.cmpi eq, %10, %168 : vector<32x256xi32>
    %170 = arith.ori %164, %169 : vector<32x256xi1>
    %171 = arith.ori %170, %12 : vector<32x256xi1>
    %172 = tpu.concatenate %150, %13 in 1 : vector<32x128xbf16>, vector<32x128xbf16> -> vector<32x256xbf16>
    %173 = arith.extui %171 : vector<32x256xi1> to vector<32x256xi32>
    %174 = arith.sitofp %173 : vector<32x256xi32> to vector<32x256xf32>
    %175 = arith.truncf %174 : vector<32x256xf32> to vector<32x256xbf16>
    %176 = arith.addf %172, %175 : vector<32x256xbf16>
    %c4 = arith.constant 4 : index
    %c0_51 = arith.constant 0 : index
    %c0_52 = arith.constant 0 : index
    %177 = vector.load %arg2[%c4, %c0_51, %c0_52] : memref<6x256x128xbf16, #tpu.memory_space<vmem>>, vector<1x256x128xbf16>
    %178 = vector.shape_cast %177 : vector<1x256x128xbf16> to vector<256x128xbf16>
    %cst_53 = arith.constant dense<0.000000e+00> : vector<32x128xf32>
    %179 = tpu.matmul %176, %178, %cst_53 {dimension_numbers = #tpu.dot_dimension_numbers<[1], [0], [0], [1], [0, 0, 1, 1], [], []>} : vector<32x256xbf16>, vector<256x128xbf16>, vector<32x128xf32> -> vector<32x128xf32>
    %cst_54 = arith.constant 0.000000e+00 : f32
    %180 = vector.broadcast %cst_54 : f32 to vector<32x128xf32>
    %181 = arith.maximumf %179, %180 : vector<32x128xf32>
    %182 = arith.truncf %181 : vector<32x128xf32> to vector<32x128xbf16>
    %c0_55 = arith.constant 0 : index
    %c640_56 = arith.constant 640 : index
    %183 = vector.load %arg12[%c0_55, %c640_56] : memref<32x896xbf16, #tpu.memory_space<vmem>>, vector<32x128xbf16>
    tpu.vector_store %arg12[%c0_55, %c640_56], %182 {strides = array<i32>} : memref<32x896xbf16, #tpu.memory_space<vmem>>, vector<32x128xbf16>,
    %c0_57 = arith.constant 0 : index
    %c768 = arith.constant 768 : index
    %184 = vector.load %arg1[%c0_57, %c768] : memref<32x896xbf16, #tpu.memory_space<vmem>>, vector<32x128xbf16>
    %185 = vector.extract_strided_slice %184 {offsets = [0, 0], sizes = [32, 3], strides = [1, 1]} : vector<32x128xbf16> to vector<32x3xbf16>
    %186 = arith.extf %185 : vector<32x3xbf16> to vector<32x3xf32>
    %187 = arith.fptosi %186 : vector<32x3xf32> to vector<32x3xi32>
    %188 = vector.extract_strided_slice %187 {offsets = [0, 0], sizes = [32, 1], strides = [1, 1]} : vector<32x3xi32> to vector<32x1xi32>
    %c73_i32_58 = arith.constant 73 : i32
    %189 = vector.broadcast %c73_i32_58 : i32 to vector<32x1xi32>
    %190 = arith.addi %188, %189 : vector<32x1xi32>
    %191 = vector.broadcast %190 : vector<32x1xi32> to vector<32x256xi32>
    %192 = arith.cmpi eq, %10, %191 : vector<32x256xi32>
    %193 = vector.extract_strided_slice %187 {offsets = [0, 1], sizes = [32, 1], strides = [1, 1]} : vector<32x3xi32> to vector<32x1xi32>
    %c173_i32_59 = arith.constant 173 : i32
    %194 = vector.broadcast %c173_i32_59 : i32 to vector<32x1xi32>
    %195 = arith.addi %193, %194 : vector<32x1xi32>
    %196 = vector.broadcast %195 : vector<32x1xi32> to vector<32x256xi32>
    %197 = arith.cmpi eq, %10, %196 : vector<32x256xi32>
    %198 = arith.ori %192, %197 : vector<32x256xi1>
    %199 = vector.extract_strided_slice %187 {offsets = [0, 2], sizes = [32, 1], strides = [1, 1]} : vector<32x3xi32> to vector<32x1xi32>
    %c181_i32_60 = arith.constant 181 : i32
    %200 = vector.broadcast %c181_i32_60 : i32 to vector<32x1xi32>
    %201 = arith.addi %199, %200 : vector<32x1xi32>
    %202 = vector.broadcast %201 : vector<32x1xi32> to vector<32x256xi32>
    %203 = arith.cmpi eq, %10, %202 : vector<32x256xi32>
    %204 = arith.ori %198, %203 : vector<32x256xi1>
    %205 = arith.ori %204, %12 : vector<32x256xi1>
    %206 = tpu.concatenate %184, %13 in 1 : vector<32x128xbf16>, vector<32x128xbf16> -> vector<32x256xbf16>
    %207 = arith.extui %205 : vector<32x256xi1> to vector<32x256xi32>
    %208 = arith.sitofp %207 : vector<32x256xi32> to vector<32x256xf32>
    %209 = arith.truncf %208 : vector<32x256xf32> to vector<32x256xbf16>
    %210 = arith.addf %206, %209 : vector<32x256xbf16>
    %c5 = arith.constant 5 : index
    %c0_61 = arith.constant 0 : index
    %c0_62 = arith.constant 0 : index
    %211 = vector.load %arg2[%c5, %c0_61, %c0_62] : memref<6x256x128xbf16, #tpu.memory_space<vmem>>, vector<1x256x128xbf16>
    %212 = vector.shape_cast %211 : vector<1x256x128xbf16> to vector<256x128xbf16>
    %cst_63 = arith.constant dense<0.000000e+00> : vector<32x128xf32>
    %213 = tpu.matmul %210, %212, %cst_63 {dimension_numbers = #tpu.dot_dimension_numbers<[1], [0], [0], [1], [0, 0, 1, 1], [], []>} : vector<32x256xbf16>, vector<256x128xbf16>, vector<32x128xf32> -> vector<32x128xf32>
    %cst_64 = arith.constant 0.000000e+00 : f32
    %214 = vector.broadcast %cst_64 : f32 to vector<32x128xf32>
    %215 = arith.maximumf %213, %214 : vector<32x128xf32>
    %216 = arith.truncf %215 : vector<32x128xf32> to vector<32x128xbf16>
    %c0_65 = arith.constant 0 : index
    %c768_66 = arith.constant 768 : index
    %217 = vector.load %arg12[%c0_65, %c768_66] : memref<32x896xbf16, #tpu.memory_space<vmem>>, vector<32x128xbf16>
    tpu.vector_store %arg12[%c0_65, %c768_66], %216 {strides = array<i32>} : memref<32x896xbf16, #tpu.memory_space<vmem>>, vector<32x128xbf16>,
    %c0_67 = arith.constant 0 : index
    %c0_68 = arith.constant 0 : index
    %218 = vector.load %arg12[%c0_67, %c0_68] : memref<32x896xbf16, #tpu.memory_space<vmem>>, vector<32x896xbf16>
    %c0_69 = arith.constant 0 : index
    %c0_70 = arith.constant 0 : index
    %219 = vector.load %arg5[%c0_69, %c0_70] : memref<896x256xbf16, #tpu.memory_space<vmem>>, vector<896x256xbf16>
    %cst_71 = arith.constant dense<0.000000e+00> : vector<32x256xf32>
    %220 = tpu.matmul %218, %219, %cst_71 {dimension_numbers = #tpu.dot_dimension_numbers<[1], [0], [0], [1], [0, 0, 1, 1], [], []>} : vector<32x896xbf16>, vector<896x256xbf16>, vector<32x256xf32> -> vector<32x256xf32>
    %c0_72 = arith.constant 0 : index
    %c0_73 = arith.constant 0 : index
    %221 = vector.load %arg6[%c0_72, %c0_73] : memref<1x256xf32, #tpu.memory_space<vmem>>, vector<1x256xf32>
    %222 = vector.broadcast %221 : vector<1x256xf32> to vector<32x256xf32>
    %223 = arith.addf %220, %222 : vector<32x256xf32>
    %cst_74 = arith.constant 0.000000e+00 : f32
    %224 = vector.broadcast %cst_74 : f32 to vector<32x256xf32>
    %225 = arith.maximumf %223, %224 : vector<32x256xf32>
    %226 = arith.truncf %225 : vector<32x256xf32> to vector<32x256xbf16>
    %c0_75 = arith.constant 0 : index
    %c0_76 = arith.constant 0 : index
    %227 = vector.load %arg7[%c0_75, %c0_76] : memref<256x128xbf16, #tpu.memory_space<vmem>>, vector<256x128xbf16>
    %cst_77 = arith.constant dense<0.000000e+00> : vector<32x128xf32>
    %228 = tpu.matmul %226, %227, %cst_77 {dimension_numbers = #tpu.dot_dimension_numbers<[1], [0], [0], [1], [0, 0, 1, 1], [], []>} : vector<32x256xbf16>, vector<256x128xbf16>, vector<32x128xf32> -> vector<32x128xf32>
    %c0_78 = arith.constant 0 : index
    %c0_79 = arith.constant 0 : index
    %229 = vector.load %arg8[%c0_78, %c0_79] : memref<1x128xf32, #tpu.memory_space<vmem>>, vector<1x128xf32>
    %230 = vector.broadcast %229 : vector<1x128xf32> to vector<32x128xf32>
    %231 = arith.addf %228, %230 : vector<32x128xf32>
    %cst_80 = arith.constant 0.000000e+00 : f32
    %232 = vector.broadcast %cst_80 : f32 to vector<32x128xf32>
    %233 = arith.maximumf %231, %232 : vector<32x128xf32>
    %234 = arith.truncf %233 : vector<32x128xf32> to vector<32x128xbf16>
    %c0_81 = arith.constant 0 : index
    %c0_82 = arith.constant 0 : index
    %235 = vector.load %arg9[%c0_81, %c0_82] : memref<128x128xbf16, #tpu.memory_space<vmem>>, vector<128x128xbf16>
    %cst_83 = arith.constant dense<0.000000e+00> : vector<32x128xf32>
    %236 = tpu.matmul %234, %235, %cst_83 {dimension_numbers = #tpu.dot_dimension_numbers<[1], [0], [0], [1], [0, 0, 1, 1], [], []>} : vector<32x128xbf16>, vector<128x128xbf16>, vector<32x128xf32> -> vector<32x128xf32>
    %c0_84 = arith.constant 0 : index
    %c0_85 = arith.constant 0 : index
    %237 = vector.load %arg10[%c0_84, %c0_85] : memref<1x128xf32, #tpu.memory_space<vmem>>, vector<1x128xf32>
    %238 = vector.broadcast %237 : vector<1x128xf32> to vector<32x128xf32>
    %239 = arith.addf %236, %238 : vector<32x128xf32>
    %c0_86 = arith.constant 0 : index
    %c0_87 = arith.constant 0 : index
    %240 = vector.load %arg11[%c0_86, %c0_87] : memref<32x128xf32, #tpu.memory_space<vmem>>, vector<32x128xf32>
    tpu.vector_store %arg11[%c0_86, %c0_87], %239 {strides = array<i32>} : memref<32x128xf32, #tpu.memory_space<vmem>>, vector<32x128xf32>,
    return
  }
  func.func @transform_0(%arg0: i32) -> (i32, i32) {
    %c0_i32 = arith.constant 0 : i32
    %c0_i32_0 = arith.constant 0 : i32
    return %arg0, %c0_i32 : i32, i32
  }
  func.func @transform_1(%arg0: i32) -> (i32, i32, i32) {
    %c0_i32 = arith.constant 0 : i32
    %c0_i32_0 = arith.constant 0 : i32
    %c0_i32_1 = arith.constant 0 : i32
    %c0_i32_2 = arith.constant 0 : i32
    return %c0_i32, %c0_i32_0, %c0_i32_1 : i32, i32, i32
  }
  func.func @transform_2(%arg0: i32) -> (i32, i32) {
    %c0_i32 = arith.constant 0 : i32
    %c0_i32_0 = arith.constant 0 : i32
    %c0_i32_1 = arith.constant 0 : i32
    return %c0_i32, %c0_i32_0 : i32, i32
  }
  func.func @transform_3(%arg0: i32) -> (i32, i32) {
    %c0_i32 = arith.constant 0 : i32
    %c0_i32_0 = arith.constant 0 : i32
    %c0_i32_1 = arith.constant 0 : i32
    return %c0_i32, %c0_i32_0 : i32, i32
  }
  func.func @transform_4(%arg0: i32) -> (i32, i32) {
    %c0_i32 = arith.constant 0 : i32
    %c0_i32_0 = arith.constant 0 : i32
    %c0_i32_1 = arith.constant 0 : i32
    return %c0_i32, %c0_i32_0 : i32, i32
  }
  func.func @transform_5(%arg0: i32) -> (i32, i32) {
    %c0_i32 = arith.constant 0 : i32
    %c0_i32_0 = arith.constant 0 : i32
    %c0_i32_1 = arith.constant 0 : i32
    return %c0_i32, %c0_i32_0 : i32, i32
  }
  func.func @transform_6(%arg0: i32) -> (i32, i32) {
    %c0_i32 = arith.constant 0 : i32
    %c0_i32_0 = arith.constant 0 : i32
    %c0_i32_1 = arith.constant 0 : i32
    return %c0_i32, %c0_i32_0 : i32, i32
  }
  func.func @transform_7(%arg0: i32) -> (i32, i32) {
    %c0_i32 = arith.constant 0 : i32
    %c0_i32_0 = arith.constant 0 : i32
    %c0_i32_1 = arith.constant 0 : i32
    return %c0_i32, %c0_i32_0 : i32, i32
  }
  func.func @transform_8(%arg0: i32) -> (i32, i32) {
    %c0_i32 = arith.constant 0 : i32
    %c0_i32_0 = arith.constant 0 : i32
    %c0_i32_1 = arith.constant 0 : i32
    return %c0_i32, %c0_i32_0 : i32, i32
  }
  func.func @transform_9(%arg0: i32) -> (i32, i32) {
    %c0_i32 = arith.constant 0 : i32
    %c0_i32_0 = arith.constant 0 : i32
    %c0_i32_1 = arith.constant 0 : i32
    return %c0_i32, %c0_i32_0 : i32, i32
  }
  func.func @transform_10(%arg0: i32) -> (i32, i32) {
    %c0_i32 = arith.constant 0 : i32
    %c0_i32_0 = arith.constant 0 : i32
    return %arg0, %c0_i32 : i32, i32
  }
}

</mosaic_0001>

<bundles_post_ra>
// kernel: tpu_custom_call.1
= control target key start
LH: loop header
LB: loop body
LE: loop exit
PB: predicated region body
PF: predicated region fallthrough
CT: control target
= control target key end

     0   :  { %15 = vsyncpa [#allocation4], 0  ;;  %s5670_s0 = inlined_call_operand.hbm [shape: bf16[32,896], index: 0, kind: input, shape index: {}]   ;;  %s5671_s1 = inlined_call_operand.hbm [shape: bf16[6,256,128], index: 1, kind: input, shape index: {}]   ;;  %s5672_s2 = inlined_call_operand.hbm [shape: bf16[128,128], index: 2, kind: input, shape index: {}]   ;;  %s5673_s3 = inlined_call_operand.vmem [shape: f32[1,128], index: 3, kind: input, shape index: {}]   ;;  %s5674_s4 = inlined_call_operand.hbm [shape: bf16[896,256], index: 4, kind: input, shape index: {}]   ;;  %s5675_s5 = inlined_call_operand.vmem [shape: f32[1,256], index: 5, kind: input, shape index: {}]   ;;  %s5676_s6 = inlined_call_operand.hbm [shape: bf16[256,128], index: 6, kind: input, shape index: {}]   ;;  %s5677_s7 = inlined_call_operand.vmem [shape: f32[1,128], index: 7, kind: input, shape index: {}]   ;;  %s5678_s8 = inlined_call_operand.hbm [shape: bf16[128,128], index: 8, kind: input, shape index: {}]   ;;  %s5679_s9 = inlined_call_operand.vmem [shape: f32[1,128], index: 9, kind: input, shape index: {}]   ;;  %s5680_s10 = inlined_call_operand.hbm [shape: f32[32,128], index: 10, kind: output, shape index: {}]  }
   0x1   :  { %16 = vsyncpa [#allocation7], 0 }
   0x2   :  { %17 = vsyncpa [#allocation10], 0 }
   0x3   :  { %18 = vsyncpa [#allocation13], 0 }
   0x4   :  { %19 = vsyncpa [#allocation5], 0  ;;  %s4694_s13 = smov [#allocation6]   ;;  %s4530_s17 = scalar_lea.hbm %s5671_s1, 12288 }
   0x5   :  { %s37_s14 = sshll.u32 %s4694_s13, 4  ;;  %p4531_p0 = scmp.ne.s32.totalorder %s5671_s1, %s4530_s17  ;;  %s38_s14 = int_to_ptr.vmem [resolvable:$true] %s37_s14 }
   0x6   :  { %p4534_p1 = scmp.lt.u32.totalorder %s4530_s17, %s5671_s1 }
   0x8   :  { %p4536_p2 = pnand %p4534_p1, %p4531_p0 }
   0xa   :  { %4539 = shalt.err (!%p4536_p2)
}
   0xb   :  { %s4540_s22 = scalar_lea.vmem %s38_s14, 12288  ;;  %p4545_p4 = scmp.lt.s32.totalorder %s38_s14, %s38_s14 }
   0xc   :  { %p4541_p3 = scmp.ne.s32.totalorder %s38_s14, %s4540_s22  ;;  %p4546_p5 = scmp.lt.s32.totalorder %s4540_s22, %s4540_s22 }
   0xe   :  { %p4547_p6 = por %p4546_p5, %p4545_p4 }
  0x10   :  { %p4548_p7 = pnand %p4547_p6, %p4541_p3 }
  0x12   :  { %4551 = shalt.err (!%p4548_p7)
}
  0x13   :  { %s4695_s23 = smov 64   ;;  %s4696_s24 = smov 4  }
  0x14   :  { %43 = dma.hbm_to_vmem [thread:$0]  %s5671_s1, 12288, %s38_s14, [#allocation7], %s4695_s23, %s4695_s23, %s4696_s24  }
  0x15   :  { %s4697_s27 = smov [#allocation9]   ;;  %s4552_s11 = scalar_lea.hbm %s5674_s4, 14336 }
  0x16   :  { %s63_s28 = sshll.u32 %s4697_s27, 4  ;;  %p4553_p8 = scmp.ne.s32.totalorder %s5674_s4, %s4552_s11  ;;  %s64_s28 = int_to_ptr.vmem [resolvable:$true] %s63_s28 }
  0x17   :  { %p4556_p9 = scmp.lt.u32.totalorder %s4552_s11, %s5674_s4 }
  0x19   :  { %p4558_p10 = pnand %p4556_p9, %p4553_p8 }
  0x1b   :  { %4561 = shalt.err (!%p4558_p10)
}
  0x1c   :  { %s4562_s17 = scalar_lea.vmem %s64_s28, 14336  ;;  %p4567_p12 = scmp.lt.s32.totalorder %s64_s28, %s64_s28 }
  0x1d   :  { %p4563_p11 = scmp.ne.s32.totalorder %s64_s28, %s4562_s17  ;;  %p4568_p13 = scmp.lt.s32.totalorder %s4562_s17, %s4562_s17 }
  0x1f   :  { %p4569_p0 = por %p4568_p13, %p4567_p12 }
  0x21   :  { %p4570_p1 = pnand %p4569_p0, %p4563_p11 }
  0x23   :  { %4573 = shalt.err (!%p4570_p1)
}
  0x24   :  { %s4698_s1 = smov 128   ;;  %s4699_s14 = smov 8  }
  0x25   :  { %69 = dma.hbm_to_vmem [thread:$0]  %s5674_s4, 14336, %s64_s28, [#allocation10], %s4698_s1, %s4698_s1, %s4699_s14  }
  0x26   :  { %s4700_s20 = smov [#allocation3]   ;;  %s4574_s26 = scalar_lea.hbm %s5670_s0, 1792 }
  0x27   :  { %s25_s21 = sshll.u32 %s4700_s20, 4  ;;  %p4575_p2 = scmp.ne.s32.totalorder %s5670_s0, %s4574_s26  ;;  %s26_s21 = int_to_ptr.vmem [resolvable:$true] %s25_s21 }
  0x28   :  { %p4578_p3 = scmp.lt.u32.totalorder %s4574_s26, %s5670_s0 }
  0x2a   :  { %p4580_p4 = pnand %p4578_p3, %p4575_p2 }
  0x2c   :  { %4583 = shalt.err (!%p4580_p4)
}
  0x2d   :  { %s4584_s12 = scalar_lea.vmem %s26_s21, 1792  ;;  %p4589_p6 = scmp.lt.s32.totalorder %s26_s21, %s26_s21 }
  0x2e   :  { %p4585_p5 = scmp.ne.s32.totalorder %s26_s21, %s4584_s12  ;;  %p4590_p7 = scmp.lt.s32.totalorder %s4584_s12, %s4584_s12 }
  0x30   :  { %p4591_p8 = por %p4590_p7, %p4589_p6 }
  0x32   :  { %p4592_p9 = pnand %p4591_p8, %p4585_p5 }
  0x34   :  { %4595 = shalt.err (!%p4592_p9)
}
  0x35   :  { %s4701_s4 = smov 448   ;;  %s4702_s28 = smov 28  }
  0x36   :  { %31 = dma.hbm_to_vmem [thread:$0]  %s5670_s0, 1792, %s26_s21, [#allocation4], %s4701_s4, %s4701_s4, %s4702_s28  }
  0x37   :  { %s4703_s16 = smov [#allocation8]   ;;  %s4704_s18 = smov [#allocation11]  }
  0x38   :  { %s49_s17 = sshll.u32 %s4703_s16, 4  ;;  %s77_s19 = sshll.u32 %s4704_s18, 4  ;;  %s50_s17 = int_to_ptr.vmem [resolvable:$true] %s49_s17  ;;  %s78_s19 = int_to_ptr.vmem [resolvable:$true] %s77_s19 }
  0x39   :  { %s4596_s25 = scalar_lea.hbm %s5672_s2, 1024 }
  0x3a   :  { %p4597_p10 = scmp.ne.s32.totalorder %s5672_s2, %s4596_s25  ;;  %p4600_p11 = scmp.lt.u32.totalorder %s4596_s25, %s5672_s2 }
  0x3c   :  { %p4602_p12 = pnand %p4600_p11, %p4597_p10 }
  0x3e   :  { %4605 = shalt.err (!%p4602_p12)
}
  0x3f   :  { %s4606_s0 = scalar_lea.vmem %s50_s17, 1024  ;;  %p4611_p0 = scmp.lt.s32.totalorder %s50_s17, %s50_s17 }
  0x40   :  { %p4607_p13 = scmp.ne.s32.totalorder %s50_s17, %s4606_s0  ;;  %p4612_p1 = scmp.lt.s32.totalorder %s4606_s0, %s4606_s0 }
  0x42   :  { %p4613_p2 = por %p4612_p1, %p4611_p0 }
  0x44   :  { %p4614_p3 = pnand %p4613_p2, %p4607_p13 }
  0x46   :  { %4617 = shalt.err (!%p4614_p3)
}
  0x47   :  { %55 = dma.hbm_to_vmem [thread:$0]  %s5672_s2, 1024, %s50_s17, [#allocation7], %s4695_s23, %s4695_s23, %s4696_s24  }
  0x48   :  { %s4618_s28 = scalar_lea.hbm %s5676_s6, 2048 }
  0x49   :  { %p4619_p4 = scmp.ne.s32.totalorder %s5676_s6, %s4618_s28  ;;  %p4622_p5 = scmp.lt.u32.totalorder %s4618_s28, %s5676_s6 }
  0x4b   :  { %p4624_p6 = pnand %p4622_p5, %p4619_p4 }
  0x4d   :  { %4627 = shalt.err (!%p4624_p6)
}
  0x4e   :  { %s4628_s20 = scalar_lea.vmem %s78_s19, 2048  ;;  %p4633_p8 = scmp.lt.s32.totalorder %s78_s19, %s78_s19 }
  0x4f   :  { %p4629_p7 = scmp.ne.s32.totalorder %s78_s19, %s4628_s20  ;;  %p4634_p9 = scmp.lt.s32.totalorder %s4628_s20, %s4628_s20 }
  0x51   :  { %p4635_p10 = por %p4634_p9, %p4633_p8 }
  0x53   :  { %p4636_p11 = pnand %p4635_p10, %p4629_p7 }
  0x55   :  { %4639 = shalt.err (!%p4636_p11)
}
  0x56   :  { %83 = dma.hbm_to_vmem [thread:$0]  %s5676_s6, 2048, %s78_s19, [#allocation10], %s4695_s23, %s4695_s23, %s4696_s24  }
  0x57   :  { %s4705_s22 = smov [#allocation12]   ;;  %s4640_s29 = scalar_lea.hbm %s5678_s8, 1024 }
  0x58   :  { %s91_s25 = sshll.u32 %s4705_s22, 4  ;;  %p4641_p12 = scmp.ne.s32.totalorder %s5678_s8, %s4640_s29  ;;  %s92_s25 = int_to_ptr.vmem [resolvable:$true] %s91_s25 }
  0x59   :  { %p4644_p13 = scmp.lt.u32.totalorder %s4640_s29, %s5678_s8 }
  0x5b   :  { %p4646_p0 = pnand %p4644_p13, %p4641_p12 }
  0x5d   :  { %4649 = shalt.err (!%p4646_p0)
}
  0x5e   :  { %s4650_s12 = scalar_lea.vmem %s92_s25, 1024  ;;  %p4655_p2 = scmp.lt.s32.totalorder %s92_s25, %s92_s25 }
  0x5f   :  { %p4651_p1 = scmp.ne.s32.totalorder %s92_s25, %s4650_s12  ;;  %p4656_p3 = scmp.lt.s32.totalorder %s4650_s12, %s4650_s12 }
  0x61   :  { %p4657_p4 = por %p4656_p3, %p4655_p2 }
  0x63   :  { %p4658_p5 = pnand %p4657_p4, %p4651_p1 }
  0x65   :  { %4661 = shalt.err (!%p4658_p5)
}
  0x66   :  { %97 = dma.hbm_to_vmem [thread:$0]  %s5678_s8, 1024, %s92_s25, [#allocation13], %s4695_s23, %s4695_s23, %s4696_s24  }
  0x67   :  { %4684 = dma.done.wait [#allocation4], 1792  }
  0x68   :  { %4685 = vsyncadd [#allocation4], 4294965504 }
  0x69   :  { %4686 = dma.done.wait [#allocation7], 13312  }
  0x6a   :  { %4687 = vsyncadd [#allocation7], 4294953984 }
  0x6b   :  { %4688 = dma.done.wait [#allocation10], 16384  }
  0x6c   :  { %4689 = vsyncadd [#allocation10], 4294950912 }
  0x6d   :  { %4690 = dma.done.wait [#allocation13], 1024  }
  0x6e   :  { %4691 = vsyncadd [#allocation13], 4294966272  ;;  %v4706_v0 = vmov 1   ;;  %v4707_v1 = vmov 0   ;;  %v4855_v2 = vld [vmem:[#allocation3 + $0x4] sm:$0xf] }
  0x6f   :  { %4162 = vset.pattern.permute.xlu1 %v4706_v0  ;;  %4161 = vset.pattern.permute.xlu0 %v4707_v1  ;;  %v4857_v3 = vld [vmem:[#allocation3 + $0x20] sm:$0xf]  ;;  %v272_v4 = vunpack.c.l.bf16 %v4855_v2  ;;  %v4861_v8 = vld [vmem:[#allocation3 + $0x3c] sm:$0xf]  ;;  %v4202_v12 = vld [vmem:[#allocation6 + $0x40] sm:$0xff]   ;;  %v4708_v33 = vmov 2  }
  0x70   :  { %v273_v5 = vunpack.c.l.bf16 %v4857_v3  ;;  %v274_v11 = vunpack.c.l.bf16 %v4861_v8  ;;  %v4203_v15 = vld [vmem:[#allocation6] sm:$0xff]   ;;  %v4204_v16 = vld [vmem:[#allocation6 + $0x48] sm:$0xff]   ;;  %3818 = vmatprep.subr.bf16.mxu1 %v4202_v12  ;;  %v4867_v23 = vld [vmem:[#allocation3 + $0x28] sm:$0xf]  ;;  %v3514_v51 = vcombine.low %v4855_v2, %v4857_v3  ;;  %s4710_s13 = smov [#allocation14]  }
  0x71   :  { %v4096_v6 = vtrunc.f32 %v272_v4  ;;  %v4864_v17 = vld [vmem:[#allocation3 + $0x58] sm:$0xf]  ;;  %3819 = vmatpush3.bf16.msra.mxu1 %v4203_v15  ;;  %v4206_v24 = vld [vmem:[#allocation6 + $0x50] sm:$0xff]   ;;  %v597_v28 = vld [vmem:[#allocation3 + $0x8] sm:$0xf]  ;;  %v932_v30 = vunpack.c.l.bf16 %v4867_v23  ;;  %s3488_s15 = sshll.u32 %s4710_s13, 4  ;;  %s3489_s15 = int_to_ptr.vmem [resolvable:$true] %s3488_s15 }
  0x72   :  { %v4098_v7 = vtrunc.f32 %v273_v5  ;;  %v4100_v20 = vtrunc.f32 %v274_v11  ;;  %v4205_v21 = vld [vmem:[#allocation6 + $0x8] sm:$0xff]   ;;  %v275_v22 = vunpack.c.l.bf16 %v4864_v17  ;;  %3820 = vmatprep.subr.bf16.mxu1 %v4204_v16  ;;  %v4207_v31 = vld [vmem:[#allocation6 + $0x10] sm:$0xff]   ;;  %v4208_v32 = vld [vmem:[#allocation6 + $0x58] sm:$0xff]   ;;  %v601_v39 = vunpack.c.l.bf16 %v597_v28  ;;  %s4662_s16 = scalar_lea.vmem %s3489_s15, 512  ;;  %p4667_p7 = scmp.lt.s32.totalorder %s3489_s15, %s3489_s15 }
  0x73   :  { %v4097_v9 = vcvt.f32.s32 %v4096_v6  ;;  %v4209_v35 = vld [vmem:[#allocation6 + $0x18] sm:$0xff]   ;;  %v4114_v38 = vtrunc.f32 %v932_v30  ;;  %v4212_v40 = vld [vmem:[#allocation8] sm:$0xff]   ;;  %v4215_v49 = vld [vmem:[#allocation8 + $0x8] sm:$0xff]   ;;  %p4663_p6 = scmp.ne.s32.totalorder %s3489_s15, %s4662_s16  ;;  %p4668_p8 = scmp.lt.s32.totalorder %s4662_s16, %s4662_s16 }
  0x74   :  { %v4099_v10 = vcvt.f32.s32 %v4098_v7  ;;  %v4101_v27 = vcvt.f32.s32 %v4100_v20  ;;  %v4102_v29 = vtrunc.f32 %v275_v22  ;;  %v4210_v41 = vld [vmem:[#allocation6 + $0x60] sm:$0xff]   ;;  %v4872_v42 = vld [vmem:[#allocation3 + $0xc] sm:$0xf]  ;;  %4024 = vmatprep.subr.bf16.mxu0 %v4212_v40  ;;  %v4104_v45 = vtrunc.f32 %v601_v39  ;;  %v4213_v50 = vld [vmem:[#allocation6 + $0x68] sm:$0xff]  }
  0x75   :  { %v304_v13 = vadd.s32 173, %v4097_v9  ;;  %v280_v14 = vadd.s32 73, %v4097_v9  ;;  %v336_v26 = vadd.s32 181, %v4097_v9  ;;  %3821 = vmatpush3.bf16.msra.mxu1 %v4205_v21  ;;  %v4875_v44 = vcvt.f32.s32 %v4114_v38  ;;  %v4211_v48 = vld [vmem:[#allocation6 + $0x20] sm:$0xff]   ;;  %4025 = vmatpush3.bf16.msra.mxu0 %v4212_v40  ;;  %v4218_v54 = vld [vmem:[#allocation8 + $0x10] sm:$0xff]   ;;  %v4214_v57 = vld [vmem:[#allocation6 + $0x28] sm:$0xff]   ;;  %p4669_p9 = por %p4668_p8, %p4667_p7 }
  0x76   :  { %v305_v18 = vadd.s32 173, %v4099_v10  ;;  %v281_v19 = vadd.s32 73, %v4099_v10  ;;  %v337_v25 = vadd.s32 181, %v4099_v10  ;;  %3822 = vmatprep.subr.bf16.mxu1 %v4206_v24  ;;  %v338_v34 = vadd.s32 181, %v4101_v27  ;;  %4026 = vmatprep.subr.bf16.mxu0 %v4215_v49  ;;  %v929_v58 = vld [vmem:[#allocation3 + $0x44] sm:$0xf] }
  0x77   :  { %309 = vperm.xlu1 %4162, %v304_v13   ;;  %285 = vperm.xlu0 %4161, %v280_v14   ;;  %v282_v36 = vadd.s32 73, %v4101_v27  ;;  %v4103_v37 = vcvt.f32.s32 %v4102_v29  ;;  %v306_v46 = vadd.s32 173, %v4101_v27  ;;  %v931_v47 = vunpack.c.l.bf16 %v4872_v42  ;;  %v4216_v59 = vld [vmem:[#allocation6 + $0x70] sm:$0xff]   ;;  %v4221_v62 = vld [vmem:[#allocation8 + $0x18] sm:$0xff]   ;;  %v600_v5 = vld [vmem:[#allocation3 + $0x5c] sm:$0xf]  ;;  %p4670_p10 = pnand %p4669_p9, %p4663_p6 }
  0x78   :  { %v940_v52 = vadd.s32 73, %v4875_v44  ;;  %v4883_v53 = vcvt.f32.s32 %v4104_v45  ;;  %v4217_v61 = vld [vmem:[#allocation6 + $0x30] sm:$0xff]   ;;  %v933_v4 = vunpack.c.l.bf16 %v929_v58  ;;  %v4219_v7 = vld [vmem:[#allocation6 + $0x78] sm:$0xff]   ;;  %v4223_v11 = vld [vmem:[#allocation8 + $0x20] sm:$0xff]   ;;  %v604_v16 = vunpack.c.l.bf16 %v600_v5 }
  0x79   :  { %3823 = vmatpush3.bf16.msra.mxu1 %v4207_v31  ;;  %v283_v43 = vadd.s32 73, %v4103_v37  ;;  %v307_v55 = vadd.s32 173, %v4103_v37  ;;  %v4112_v56 = vtrunc.f32 %v931_v47  ;;  %4027 = vmatpush3.bf16.msra.mxu0 %v4215_v49  ;;  %v339_v6 = vadd.s32 181, %v4103_v37  ;;  %v598_v9 = vld [vmem:[#allocation3 + $0x24] sm:$0xf]  ;;  %v4220_v15 = vld [vmem:[#allocation6 + $0x38] sm:$0xff]  }
  0x7a   :  { %3824 = vmatprep.subr.bf16.mxu1 %v4208_v32  ;;  %4028 = vmatprep.subr.bf16.mxu0 %v4218_v54  ;;  %v609_v60 = vadd.s32 73, %v4883_v53  ;;  %v633_v10 = vadd.s32 173, %v4883_v53  ;;  %v4116_v13 = vtrunc.f32 %v933_v4  ;;  %v1588_v14 = vld [vmem:[#allocation3 + $0x30] sm:$0xf]  ;;  %v996_v21 = vadd.s32 181, %v4875_v44  ;;  %v4225_v27 = vld [vmem:[#allocation8 + $0x30] sm:$0xff]  }
  0x7b   :  { %312 = vperm.xlu1 %4162, %v305_v18   ;;  %288 = vperm.xlu0 %4161, %v281_v19   ;;  %v4886_v63 = vcvt.f32.s32 %v4112_v56  ;;  %v4224_v18 = vld [vmem:[#allocation8 + $0x28] sm:$0xff]   ;;  %v602_v19 = vunpack.c.l.bf16 %v598_v9  ;;  %v4110_v22 = vtrunc.f32 %v604_v16  ;;  %v1592_v24 = vunpack.c.l.bf16 %v1588_v14  ;;  %v4227_v28 = vld [vmem:[#allocation6 + $0x140] sm:$0xff]   ;;  %v1589_v47 = vld [vmem:[#allocation3 + $0x4c] sm:$0xf] }
  0x7c   :  { %v4892_v20 = vcvt.f32.s32 %v4116_v13  ;;  %v964_v30 = vadd.s32 173, %v4875_v44  ;;  %v3515_v31 = vcombine.low %v4861_v8, %v4864_v17  ;;  %v4230_v37 = vld [vmem:[#allocation3] ss:$28 sps:$4 sm:$0xff]   ;;  %v1257_v40 = vld [vmem:[#allocation3 + $0x10] sm:$0xf]  ;;  %v3566_v9 = vcombine.low %v4872_v42, %v4867_v23  ;;  %v4246_v13 = vld [vmem:[#allocation6 + $0xd8] sm:$0xff]  }
  0x7d   :  { %3825 = vmatpush3.bf16.msra.mxu1 %v4209_v35  ;;  %4029 = vmatpush3.bf16.msra.mxu0 %v4218_v54  ;;  %v939_v12 = vadd.s32 73, %v4886_v63  ;;  %v4902_v32 = vcvt.f32.s32 %v4110_v22  ;;  %v4226_v35 = vld [vmem:[#allocation8 + $0x38] sm:$0xff]   ;;  %v1261_v44 = vunpack.c.l.bf16 %v1257_v40  ;;  %v4231_v45 = vld [vmem:[#allocation3 + $0x38] ss:$28 sps:$4 sm:$0xff]   ;;  %v930_v56 = vld [vmem:[#allocation3 + $0x60] sm:$0xf] }
  0x7e   :  { %3826 = vmatprep.subr.bf16.mxu1 %v4210_v41  ;;  %4030 = vmatprep.subr.bf16.mxu0 %v4221_v62  ;;  %v997_v29 = vadd.s32 181, %v4892_v20  ;;  %v4238_v49 = vld [vmem:[#allocation6 + $0xc8] sm:$0xff]   ;;  %v941_v54 = vadd.s32 73, %v4892_v20  ;;  %v599_v58 = vld [vmem:[#allocation3 + $0x40] sm:$0xf]  ;;  %v4256_v17 = vld [vmem:[#allocation6 + $0x178] sm:$0xff]  }
  0x7f   :  { %4164 = vset.pattern.permute.xlu1 %v4708_v33  ;;  %4163 = vset.pattern.permute.xlu0 %v4708_v33  ;;  %v668_v38 = vadd.s32 181, %v4902_v32  ;;  %v4235_v3 = vld [vmem:[#allocation6 + $0x150] sm:$0xff]  }
  0x80   :  { %344 = vperm.xlu1 %4164, %v337_v25   ;;  %341 = vperm.xlu0 %4163, %v336_v26   ;;  %v963_v25 = vadd.s32 173, %v4886_v63  ;;  %v4106_v26 = vtrunc.f32 %v602_v19 }
  0x81   :  { %3827 = vmatpush3.bf16.msra.mxu1 %v4211_v48  ;;  %4031 = vmatpush3.bf16.msra.mxu0 %v4221_v62  ;;  %v4236_v48 = vld [vmem:[#allocation6 + $0x80] sm:$0xff]   ;;  %v995_v62 = vadd.s32 181, %v4886_v63 }
  0x82   :  { %3828 = vmatprep.subr.bf16.mxu1 %v4213_v50  ;;  %4032 = vmatprep.subr.bf16.mxu0 %v4223_v11 }
  0x83   :  { %4040 = vmatprep.mubr.bf16.mxu0 %v4230_v37 }
  0x84   :  { %4165 = vset.pattern.permute.xlu1 %v4707_v1  ;;  %347 = vperm.xlu0 %4163, %v338_v34   ;;  %v4130_v34 = vtrunc.f32 %v1592_v24 }
  0x85   :  { %291 = vperm.xlu1 %4165, %v282_v36   ;;  %3829 = vmatpush3.bf16.msra.mxu1 %v4214_v57  ;;  %v4905_v36 = vcvt.f32.s32 %v4106_v26  ;;  %v4240_v57 = vld [vmem:[#allocation6 + $0x88] sm:$0xff]  }
  0x86   :  { %3830 = vmatprep.subr.bf16.mxu1 %v4216_v59  ;;  %4033 = vmatpush3.bf16.msra.mxu0 %v4223_v11  ;;  %v4908_v39 = vcvt.f32.s32 %v4130_v34  ;;  %v4242_v59 = vld [vmem:[#allocation6 + $0xd0] sm:$0xff]   ;;  %v603_v11 = vunpack.c.l.bf16 %v599_v58 }
  0x87   :  { %4034 = vmatprep.subr.bf16.mxu0 %v4224_v18  ;;  %v610_v41 = vadd.s32 73, %v4905_v36  ;;  %v634_v50 = vadd.s32 173, %v4905_v36  ;;  %v666_v26 = vadd.s32 181, %v4905_v36  ;;  %v1917_v36 = vld [vmem:[#allocation3 + $0x18] sm:$0xf] }
  0x88   :  { %4167 = vset.pattern.permute.xlu0 %v4707_v1  ;;  %v1600_v4 = vadd.s32 73, %v4908_v39  ;;  %v4108_v19 = vtrunc.f32 %v603_v11  ;;  %v1918_v11 = vld [vmem:[#allocation3 + $0x34] sm:$0xf] }
  0x89   :  { %4166 = vset.pattern.permute.xlu1 %v4706_v0  ;;  %294 = vperm.xlu0 %4167, %v283_v43   ;;  %v1656_v43 = vadd.s32 181, %v4908_v39 }
  0x8a   :  { %315 = vperm.xlu1 %4166, %v306_v46   ;;  %3831 = vmatpush3.bf16.msra.mxu1 %v4217_v61  ;;  %v4234_v46 = vld [vmem:[#allocation6 + $0xc0] sm:$0xff]   ;;  %v934_v61 = vunpack.c.l.bf16 %v930_v56 }
  0x8b   :  { %3832 = vmatprep.subr.bf16.mxu1 %v4219_v7  ;;  %4035 = vmatpush3.bf16.msra.mxu0 %v4224_v18  ;;  %v4244_v7 = vld [vmem:[#allocation6 + $0x90] sm:$0xff]  }
  0x8c   :  { %4036 = vmatprep.subr.bf16.mxu0 %v4225_v27  ;;  %v4118_v63 = vtrunc.f32 %v934_v61 }
  0x8d   :  { %947 = vperm.xlu0 %4167, %v940_v52   ;;  %v4120_v52 = vtrunc.f32 %v1261_v44  ;;  %v4257_v44 = vld [vmem:[#allocation6 + $0xa8] sm:$0xff]  }
  0x8e   :  { %318 = vperm.xlu1 %4166, %v307_v55   ;;  %3833 = vmatpush3.bf16.msra.mxu1 %v4220_v15  ;;  %v1593_v55 = vunpack.c.l.bf16 %v1589_v47  ;;  %v4248_v15 = vld [vmem:[#allocation6 + $0x98] sm:$0xff]   ;;  %v4119_v22 = vcvt.f32.s32 %v4118_v63 }
  0x8f   :  { %3874 = vmatprep.subr.bf16.mxu1 %v4227_v28  ;;  %4037 = vmatpush3.bf16.msra.mxu0 %v4225_v27  ;;  %v612_v28 = vadd.s32 73, %v4902_v32 }
  0x90   :  { %4038 = vmatprep.subr.bf16.mxu0 %v4226_v35  ;;  %v4132_v5 = vtrunc.f32 %v1593_v55  ;;  %v942_v37 = vadd.s32 73, %v4119_v22 }
  0x91   :  { %614 = vperm.xlu0 %4167, %v609_v60   ;;  %v4917_v60 = vcvt.f32.s32 %v4120_v52  ;;  %v4260_v52 = vld [vmem:[#allocation6 + $0xf0] sm:$0xff]  }
  0x92   :  { %4168 = vset.pattern.permute.xlu1 %v4708_v33  ;;  %v4926_v16 = vcvt.f32.s32 %v4132_v5 }
  0x93   :  { %350 = vperm.xlu1 %4168, %v339_v6   ;;  %4039 = vmatpush3.bf16.msra.mxu0 %v4226_v35  ;;  %v1590_v6 = vld [vmem:[#allocation3 + $0x68] sm:$0xf]  ;;  %v1269_v14 = vadd.s32 73, %v4917_v60  ;;  %v4109_v35 = vcvt.f32.s32 %v4108_v19  ;;  %v1919_v19 = vld [vmem:[#allocation3 + $0x50] sm:$0xf] }
  0x94   :  { %3846 = vmatprep.subr.bf16.mxu0 %v4234_v46  ;;  %v1594_v18 = vunpack.c.l.bf16 %v1590_v6  ;;  %v1601_v27 = vadd.s32 73, %v4926_v16 }
  0x95   :  { %4172 = vset.pattern.permute.xlu0 %v4706_v0 }
  0x96   :  { %638 = vperm.xlu0 %4172, %v633_v10   ;;  %4041 = vmatmul.mubr.bf16.vlgmr.msra.gmra.mrb[0].mxu0 %v4231_v45  ;;  %v665_v10 = vadd.s32 181, %v4883_v53  ;;  %v965_v53 = vadd.s32 173, %v4892_v20  ;;  %v636_v20 = vadd.s32 173, %v4902_v32  ;;  %v1293_v45 = vadd.s32 173, %v4917_v60 }
  0x97   :  { %4169 = vset.pattern.permute.xlu1 %v4707_v1  ;;  %3847 = vmatpush3.bf16.msra.mxu0 %v4236_v48  ;;  %v611_v48 = vadd.s32 73, %v4109_v35  ;;  %v667_v32 = vadd.s32 181, %v4109_v35 }
  0x98   :  { %944 = vperm.xlu1 %4169, %v939_v12   ;;  %3848 = vmatprep.subr.bf16.mxu0 %v4238_v49  ;;  %v1259_v12 = vld [vmem:[#allocation3 + $0x48] sm:$0xf]  ;;  %v635_v49 = vadd.s32 173, %v4109_v35 }
  0x99   :  { %v1263_v24 = vunpack.c.l.bf16 %v1259_v12 }
  0x9a   :  { %4175 = vset.pattern.permute.xlu0 %v4708_v33 }
  0x9b   :  { %1003 = vperm.xlu0 %4175, %v996_v21   ;;  %3849 = vmatpush3.bf16.msra.mxu0 %v4240_v57  ;;  %v1260_v21 = vld [vmem:[#allocation3 + $0x64] sm:$0xf]  ;;  %v4124_v40 = vtrunc.f32 %v1263_v24  ;;  %v1921_v57 = vunpack.c.l.bf16 %v1917_v36  ;;  %v4270_v36 = vld [vmem:[#allocation6 + $0x1c0] sm:$0xff]  }
  0x9c   :  { %4170 = vset.pattern.permute.xlu1 %v4706_v0  ;;  %3850 = vmatprep.subr.bf16.mxu0 %v4242_v59  ;;  %v1264_v34 = vunpack.c.l.bf16 %v1260_v21  ;;  %v1657_v59 = vadd.s32 181, %v4926_v16 }
  0x9d   :  { %968 = vperm.xlu1 %4170, %v963_v25   ;;  %v4251_v25 = vld [vmem:[#allocation6 + $0xe0] sm:$0xff]   ;;  %v4136_v5 = vtrunc.f32 %v1921_v57 }
  0x9e   :  { %v4126_v47 = vtrunc.f32 %v1264_v34 }
  0x9f   :  { %1006 = vperm.xlu0 %4175, %v997_v29   ;;  %3851 = vmatpush3.bf16.msra.mxu0 %v4244_v7  ;;  %v4253_v29 = vld [vmem:[#allocation6 + $0xa0] sm:$0xff]   ;;  %v4947_v6 = vcvt.f32.s32 %v4136_v5  ;;  %v4709_v5 = vmov 0.0  }
  0xa0   :  { %3852 = vmatprep.subr.bf16.mxu0 %v4246_v13  ;;  %v4941_v56 = vcvt.f32.s32 %v4126_v47  ;;  %v1920_v13 = vld [vmem:[#allocation3 + $0x6c] sm:$0xf] }
  0xa1   :  { %971 = vperm.xlu1 %4170, %v964_v30   ;;  %v4134_v30 = vtrunc.f32 %v1594_v18  ;;  %v1985_v7 = vadd.s32 181, %v4947_v6  ;;  %v1924_v18 = vunpack.c.l.bf16 %v1920_v13 }
  0xa2   :  { %v1328_v61 = vadd.s32 181, %v4941_v56  ;;  %v1272_v2 = vadd.s32 73, %v4941_v56 }
  0xa3   :  { %679 = vperm.xlu0 %4175, %v668_v38   ;;  %3853 = vmatpush3.bf16.msra.mxu0 %v4248_v15  ;;  %v966_v38 = vadd.s32 173, %v4119_v22  ;;  %v4934_v46 = vcvt.f32.s32 %v4134_v30  ;;  %v4142_v24 = vtrunc.f32 %v1924_v18 }
  0xa4   :  { %3854 = vmatprep.subr.bf16.mxu0 %v4251_v25 }
  0xa5   :  { %4171 = vset.pattern.permute.xlu1 %v4707_v1  ;;  %v1626_v55 = vadd.s32 173, %v4934_v46 }
  0xa6   :  { %617 = vperm.xlu1 %4171, %v610_v41   ;;  %v4255_v41 = vld [vmem:[#allocation6 + $0xe8] sm:$0xff]  }
  0xa7   :  { %1663 = vperm.xlu0 %4175, %v1656_v43   ;;  %v998_v43 = vadd.s32 181, %v4119_v22  ;;  %3855 = vmatpush3.bf16.msra.mxu0 %v4253_v29  ;;  %v1258_v22 = vld [vmem:[#allocation3 + $0x2c] sm:$0xf] }
  0xa8   :  { %3856 = vmatprep.subr.bf16.mxu0 %v4255_v41  ;;  %v1262_v29 = vunpack.c.l.bf16 %v1258_v22  ;;  %v4232_v22 = vld [vmem:[#allocation6 + $0x148] sm:$0xff]  }
  0xaa   :  { %4173 = vset.pattern.permute.xlu1 %v4706_v0 }
  0xab   :  { %641 = vperm.xlu1 %4173, %v634_v50   ;;  %4186 = vset.pattern.permute.xlu0 %v4707_v1  ;;  %v4936_v50 = vcvt.f32.s32 %v4124_v40 }
  0xac   :  { %950 = vperm.xlu0 %4186, %v941_v54   ;;  %v4261_v54 = vld [vmem:[#allocation6 + $0xb0] sm:$0xff]   ;;  %3857 = vmatpush3.bf16.msra.mxu0 %v4257_v44 }
  0xad   :  { %v1295_v58 = vadd.s32 173, %v4936_v50  ;;  %3858 = vmatprep.subr.bf16.mxu0 %v4260_v52 }
  0xaf   :  { %4174 = vset.pattern.permute.xlu1 %v4708_v33 }
  0xb0   :  { %1000 = vperm.xlu1 %4174, %v995_v62   ;;  %1607 = vperm.xlu0 %4186, %v1600_v4   ;;  %v4262_v62 = vld [vmem:[#allocation6 + $0xf8] sm:$0xff]  }
  0xb1   :  { %v4263_v4 = vld [vmem:[#allocation6 + $0xb8] sm:$0xff]   ;;  %3859 = vmatpush3.bf16.msra.mxu0 %v4261_v54 }
  0xb2   :  { %3860 = vmatprep.subr.bf16.mxu0 %v4262_v62  ;;  %v1602_v62 = vadd.s32 73, %v4934_v46 }
  0xb4   :  { %670 = vperm.xlu1 %4174, %v665_v10   ;;  %1274 = vperm.xlu0 %4186, %v1269_v14   ;;  %v1587_v10 = vld [vmem:[#allocation3 + $0x14] sm:$0xf]  ;;  %v1922_v14 = vunpack.c.l.bf16 %v1918_v11 }
  0xb5   :  { %3861 = vmatpush3.bf16.msra.mxu0 %v4263_v4  ;;  %v1591_v12 = vunpack.c.l.bf16 %v1587_v10 }
  0xb6   :  { %v4138_v15 = vtrunc.f32 %v1922_v14  ;;  %3902 = vmatprep.subr.bf16.mxu0 %v4270_v36 }
  0xb7   :  { %v4128_v63 = vtrunc.f32 %v1591_v12  ;;  %v1625_v12 = vadd.s32 173, %v4926_v16 }
  0xb8   :  { %673 = vperm.xlu1 %4174, %v666_v26   ;;  %1610 = vperm.xlu0 %4186, %v1601_v27   ;;  %v1923_v26 = vunpack.c.l.bf16 %v1919_v19  ;;  %v4228_v19 = vld [vmem:[#allocation6 + $0x100] sm:$0xff]  }
  0xb9   :  { %v4129_v21 = vcvt.f32.s32 %v4128_v63 }
  0xba   :  { %v4140_v30 = vtrunc.f32 %v1923_v26 }
  0xbb   :  { %v1599_v25 = vadd.s32 73, %v4129_v21  ;;  %v1623_v34 = vadd.s32 173, %v4129_v21  ;;  %v1655_v47 = vadd.s32 181, %v4129_v21  ;;  %v1271_v21 = vadd.s32 73, %v4936_v50 }
  0xbc   :  { %4176 = vset.pattern.permute.xlu1 %v4707_v1  ;;  %4187 = vset.pattern.permute.xlu0 %v4706_v0 }
  0xbd   :  { %953 = vperm.xlu1 %4176, %v942_v37   ;;  %977 = vperm.xlu0 %4187, %v966_v38   ;;  %v4122_v37 = vtrunc.f32 %v1262_v29  ;;  %v4963_v38 = vcvt.f32.s32 %v4140_v30 }
  0xbf   :  { %v4123_v40 = vcvt.f32.s32 %v4122_v37  ;;  %v1987_v41 = vadd.s32 181, %v4963_v38  ;;  %v1296_v37 = vadd.s32 173, %v4941_v56 }
  0xc1   :  { %4177 = vset.pattern.permute.xlu1 %v4706_v0  ;;  %644 = vperm.xlu0 %4187, %v635_v49   ;;  %v1294_v44 = vadd.s32 173, %v4123_v40 }
  0xc2   :  { %974 = vperm.xlu1 %4177, %v965_v53   ;;  %v4954_v53 = vcvt.f32.s32 %v4138_v15 }
  0xc4   :  { %v1930_v27 = vadd.s32 73, %v4954_v53 }
  0xc5   :  { %1298 = vperm.xlu0 %4187, %v1293_v45   ;;  %v263_v45 = vlaneseq }
  0xc6   :  { %4178 = vset.pattern.permute.xlu1 %v4707_v1 }
  0xc7   :  { %620 = vperm.xlu1 %4178, %v611_v48  }
  0xc9   :  { %1637 = vperm.xlu0 %4187, %v1626_v55  }
  0xcb   :  { %623 = vperm.xlu1 %4178, %v612_v28   ;;  %v4957_v28 = vcvt.f32.s32 %v4142_v24 }
  0xcd   :  { %1304 = vperm.xlu0 %4187, %v1295_v58   ;;  %v1932_v35 = vadd.s32 73, %v4957_v28  ;;  %v1326_v58 = vadd.s32 181, %v4123_v40 }
  0xcf   :  { %4179 = vset.pattern.permute.xlu1 %v4706_v0 }
  0xd0   :  { %647 = vperm.xlu1 %4179, %v636_v20   ;;  %v1624_v20 = vadd.s32 173, %v4908_v39  ;;  %v4971_v39 = vand.u32 127, %v263_v45 }
  0xd1   :  { %4192 = vset.pattern.permute.xlu0 %v4708_v33 }
  0xd2   :  { %1666 = vperm.xlu0 %4192, %v1657_v59   ;;  %v4975_v48 = vadd.s32 128, %v4971_v39 }
  0xd4   :  { %4180 = vset.pattern.permute.xlu1 %v4708_v33 }
  0xd5   :  { %1009 = vperm.xlu1 %4180, %v998_v43   ;;  %v1270_v43 = vadd.s32 73, %v4123_v40 }
  0xd6   :  { %1339 = vperm.xlu0 %4192, %v1328_v61  }
  0xd9   :  { %676 = vperm.xlu1 %4180, %v667_v32   ;;  %v1325_v32 = vadd.s32 181, %v4917_v60 }
  0xda   :  { %1990 = vperm.xlu0 %4192, %v1985_v7  }
  0xdd   :  { %4181 = vset.pattern.permute.xlu1 %v4707_v1 }
  0xde   :  { %1604 = vperm.xlu1 %4181, %v1599_v25   ;;  %4196 = vset.pattern.permute.xlu0 %v4707_v1 }
  0xdf   :  { %1937 = vperm.xlu0 %4196, %v1930_v27   ;;  %v4233_v27 = vld [vmem:[#allocation6 + $0x108] sm:$0xff]  }
  0xe2   :  { %4182 = vset.pattern.permute.xlu1 %v4706_v0 }
  0xe3   :  { %1628 = vperm.xlu1 %4182, %v1623_v34   ;;  %1943 = vperm.xlu0 %4196, %v1932_v35   ;;  %v4237_v35 = vld [vmem:[#allocation6 + $0x110] sm:$0xff]  }
  0xe7   :  { %1631 = vperm.xlu1 %4182, %v1624_v20   ;;  %4200 = vset.pattern.permute.xlu0 %v4708_v33  ;;  %v4239_v20 = vld [vmem:[#allocation6 + $0x158] sm:$0xff]  }
  0xe8   :  { %1996 = vperm.xlu0 %4200, %v1987_v41   ;;  %v4241_v41 = vld [vmem:[#allocation6 + $0x118] sm:$0xff]  }
  0xeb   :  { %4183 = vset.pattern.permute.xlu1 %v4707_v1 }
  0xec   :  { %1277 = vperm.xlu1 %4183, %v1270_v43  }
  0xf0   :  { %4184 = vset.pattern.permute.xlu1 %v4706_v0 }
  0xf1   :  { %1301 = vperm.xlu1 %4184, %v1294_v44   ;;  %v4243_v44 = vld [vmem:[#allocation6 + $0x160] sm:$0xff]  }
  0xf5   :  { %4185 = vset.pattern.permute.xlu1 %v4708_v33 }
  0xf6   :  { %1660 = vperm.xlu1 %4185, %v1655_v47   ;;  %v310_v49 = vpop.permute.xlu1 %309  ;;  %v286_v52 = vpop.permute.xlu0 %285  ;;  %v1658_v47 = vadd.s32 181, %v4934_v46  ;;  %v4247_v46 = vld [vmem:[#allocation6 + $0x168] sm:$0xff]  }
  0xf7   :  { %vm320_vm0 = vcmp.eq.s32.totalorder %v4971_v39, %v310_v49  ;;  %vm296_vm1 = vcmp.eq.s32.totalorder %v4971_v39, %v286_v52  ;;  %vm321_vm2 = vcmp.eq.s32.totalorder %v4975_v48, %v310_v49  ;;  %vm297_vm3 = vcmp.eq.s32.totalorder %v4975_v48, %v286_v52 }
  0xf8   :  { %vm4982_vm4 = vmor %vm296_vm1, %vm320_vm0 }
  0xf9   :  { %vm4990_vm9 = vmor %vm297_vm3, %vm321_vm2  ;;  %vm5681_vm2 = vcmp.eq.s32.totalorder %v4975_v48, 255 }
  0xfa   :  { %1330 = vperm.xlu1 %4185, %v1325_v32   ;;  %v313_v55 = vpop.permute.xlu1 %312  ;;  %v289_v57 = vpop.permute.xlu0 %288 }
  0xfb   :  { %vm322_vm5 = vcmp.eq.s32.totalorder %v4971_v39, %v313_v55  ;;  %vm323_vm6 = vcmp.eq.s32.totalorder %v4975_v48, %v313_v55  ;;  %vm298_vm7 = vcmp.eq.s32.totalorder %v4971_v39, %v289_v57  ;;  %vm299_vm8 = vcmp.eq.s32.totalorder %v4975_v48, %v289_v57 }
  0xfc   :  { %vm330_vm10 = vmor %vm298_vm7, %vm322_vm5  ;;  %v1327_v57 = vadd.s32 181, %v4936_v50  ;;  %v4249_v50 = vld [vmem:[#allocation6 + $0x128] sm:$0xff]  }
  0xfd   :  { %vm331_vm11 = vmor %vm299_vm8, %vm323_vm6 }
  0xfe   :  { %1333 = vperm.xlu1 %4185, %v1326_v58   ;;  %v4245_v58 = vld [vmem:[#allocation6 + $0x120] sm:$0xff]  }
  0xff   :  { %v345_v59 = vpop.permute.xlu1 %344  ;;  %v342_v61 = vpop.permute.xlu0 %341 }
 0x100   :  { %vm354_vm12 = vcmp.eq.s32.totalorder %v4971_v39, %v345_v59  ;;  %vm355_vm13 = vcmp.eq.s32.totalorder %v4975_v48, %v345_v59  ;;  %vm352_vm14 = vcmp.eq.s32.totalorder %v4971_v39, %v342_v61  ;;  %vm353_vm0 = vcmp.eq.s32.totalorder %v4975_v48, %v342_v61 }
 0x101   :  { %vm362_vm15 = vmor %vm330_vm10, %vm354_vm12 }
 0x102   :  { %vm363_vm1 = vmor %vm331_vm11, %vm355_vm13  ;;  %4188 = vset.pattern.permute.xlu1 %v4707_v1  ;;  %v3518_v7 = vsel %vm362_vm15, 1.0, %v4709_v5 }
 0x103   :  { %vm360_vm3 = vmor %vm4982_vm4, %vm352_vm14  ;;  %1613 = vperm.xlu1 %4188, %v1602_v62   ;;  %v348_v4 = vpop.permute.xlu0 %347 }
 0x104   :  { %vm361_vm5 = vmor %vm4990_vm9, %vm353_vm0  ;;  %v3516_v10 = vsel %vm360_vm3, 1.0, %v4709_v5  ;;  %v292_v11 = vpop.permute.xlu1 %291  ;;  %vm356_vm4 = vcmp.eq.s32.totalorder %v4971_v39, %v348_v4  ;;  %vm357_vm12 = vcmp.eq.s32.totalorder %v4975_v48, %v348_v4 }
 0x105   :  { %vm369_vm6 = vmor %vm361_vm5, %vm5681_vm2  ;;  %v404_v14 = vpack.c.bf16 %v3518_v7, %v3516_v10  ;;  %vm300_vm8 = vcmp.eq.s32.totalorder %v4971_v39, %v292_v11  ;;  %vm301_vm11 = vcmp.eq.s32.totalorder %v4975_v48, %v292_v11  ;;  %v4252_v7 = vld [vmem:[#allocation6 + $0x170] sm:$0xff]   ;;  %v1929_v11 = vadd.s32 73, %v4947_v6 }
 0x106   :  { %vm371_vm7 = vmor %vm363_vm1, %vm5681_vm2  ;;  %v3517_v13 = vsel %vm369_vm6, 1.0, %v4709_v5 }
 0x107   :  { %4189 = vset.pattern.permute.xlu1 %v4706_v0  ;;  %v3519_v63 = vsel %vm371_vm7, 1.0, %v4709_v5  ;;  %v408_v25 = vadd.bf16 %v3514_v51, %v404_v14  ;;  %v4258_v14 = vld [vmem:[#allocation6 + $0x138] sm:$0xff]  }
 0x108   :  { %1634 = vperm.xlu1 %4189, %v1625_v12   ;;  %v405_v15 = vpack.c.bf16 %v3519_v63, %v3517_v13  ;;  %v295_v18 = vpop.permute.xlu0 %294  ;;  %v4254_v12 = vld [vmem:[#allocation6 + $0x130] sm:$0xff]   ;;  %v1953_v13 = vadd.s32 173, %v4947_v6  ;;  %v4265_v63 = vld [vmem:[#allocation6 + $0x240] sm:$0xff]   ;;  %v1954_v6 = vadd.s32 173, %v4954_v53 }
 0x109   :  { %v316_v16 = vpop.permute.xlu1 %315  ;;  %vm302_vm0 = vcmp.eq.s32.totalorder %v4971_v39, %v295_v18  ;;  %vm303_vm3 = vcmp.eq.s32.totalorder %v4975_v48, %v295_v18 }
 0x10a   :  { %v409_v24 = vadd.bf16 0, %v405_v15  ;;  %vm324_vm9 = vcmp.eq.s32.totalorder %v4971_v39, %v316_v16  ;;  %vm325_vm10 = vcmp.eq.s32.totalorder %v4975_v48, %v316_v16  ;;  %v4280_v16 = vld [vmem:[#allocation6 + $0x190] sm:$0xff]  }
 0x10b   :  { %vm332_vm13 = vmor %vm300_vm8, %vm324_vm9 }
 0x10c   :  { %572 = vmatprep.mubr.bf16.mxu1 %v409_v24  ;;  %vm333_vm14 = vmor %vm301_vm11, %vm325_vm10  ;;  %4190 = vset.pattern.permute.xlu1 %v4707_v1  ;;  %v5026_v26 = vpop.permute.xlu0 %947 }
 0x10d   :  { %vm5030_vm15 = vmor %vm332_vm13, %vm356_vm4  ;;  %573 = vmatmul.mubr.bf16.vlgmr.msra.gmra.mrb[0].mxu1 %v408_v25  ;;  %1280 = vperm.xlu1 %4190, %v1271_v21   ;;  %v319_v30 = vpop.permute.xlu1 %318  ;;  %v4282_v21 = vld [vmem:[#allocation6 + $0x1d8] sm:$0xff]  }
 0x10e   :  { %vm365_vm1 = vmor %vm333_vm14, %vm357_vm12  ;;  %vm326_vm5 = vcmp.eq.s32.totalorder %v4971_v39, %v319_v30  ;;  %vm327_vm6 = vcmp.eq.s32.totalorder %v4975_v48, %v319_v30  ;;  %3875 = vmatpush3.bf16.msra.mxu1 %v4228_v19  ;;  %v3520_v56 = vsel %vm5030_vm15, 1.0, %v4709_v5  ;;  %vm958_vm14 = vcmp.eq.s32.totalorder %v4975_v48, %v5026_v26  ;;  %v4281_v19 = vld [vmem:[#allocation6 + $0x220] sm:$0xff]  }
 0x10f   :  { %vm5043_vm7 = vmor %vm365_vm1, %vm5681_vm2  ;;  %3876 = vmatprep.subr.bf16.mxu1 %v4232_v22  ;;  %v1986_v22 = vadd.s32 181, %v4954_v53 }
 0x110   :  { %vm334_vm4 = vmor %vm302_vm0, %vm326_vm5  ;;  %v5047_v34 = vpop.permute.xlu0 %614  ;;  %v3521_v54 = vsel %vm5043_vm7, 1.0, %v4709_v5  ;;  %vm957_vm5 = vcmp.eq.s32.totalorder %v4971_v39, %v5026_v26  ;;  %v1931_v26 = vadd.s32 73, %v4963_v38 }
 0x111   :  { %vm335_vm8 = vmor %vm303_vm3, %vm327_vm6  ;;  %1283 = vperm.xlu1 %4190, %v1272_v2   ;;  %vm626_vm0 = vcmp.eq.s32.totalorder %v4975_v48, %v5047_v34  ;;  %vm625_vm6 = vcmp.eq.s32.totalorder %v4971_v39, %v5047_v34 }
 0x112   :  { %v351_v40 = vpop.permute.xlu1 %350  ;;  %3877 = vmatpush3.bf16.msra.mxu1 %v4233_v27  ;;  %v4285_v27 = vld [vmem:[#allocation6 + $0x228] sm:$0xff]  }
 0x113   :  { %vm358_vm9 = vcmp.eq.s32.totalorder %v4971_v39, %v351_v40  ;;  %vm359_vm10 = vcmp.eq.s32.totalorder %v4975_v48, %v351_v40  ;;  %3878 = vmatprep.subr.bf16.mxu1 %v4235_v3  ;;  %v4289_v3 = vld [vmem:[#allocation6 + $0x230] sm:$0xff]   ;;  %v4291_v40 = vld [vmem:[#allocation6 + $0x1e8] sm:$0xff]  }
 0x114   :  { %vm366_vm11 = vmor %vm334_vm4, %vm358_vm9 }
 0x115   :  { %vm367_vm12 = vmor %vm335_vm8, %vm359_vm10  ;;  %v3522_v43 = vsel %vm366_vm11, 1.0, %v4709_v5  ;;  %4191 = vset.pattern.permute.xlu1 %v4706_v0  ;;  %v5054_v36 = vpop.permute.xlu0 %638 }
 0x116   :  { %vm375_vm13 = vmor %vm367_vm12, %vm5681_vm2  ;;  %1307 = vperm.xlu1 %4191, %v1296_v37   ;;  %3879 = vmatpush3.bf16.msra.mxu1 %v4237_v35  ;;  %v406_v52 = vpack.c.bf16 %v3522_v43, %v3520_v56  ;;  %vm650_vm1 = vcmp.eq.s32.totalorder %v4975_v48, %v5054_v36  ;;  %vm649_vm7 = vcmp.eq.s32.totalorder %v4971_v39, %v5054_v36  ;;  %v4266_v36 = vld [vmem:[#allocation6 + $0x200] sm:$0xff]   ;;  %v4292_v35 = vld [vmem:[#allocation6 + $0x278] sm:$0xff]  }
 0x117   :  { %v3523_v49 = vsel %vm375_vm13, 1.0, %v4709_v5  ;;  %v5063_v32 = vpop.permute.xlu1 %944  ;;  %3880 = vmatprep.subr.bf16.mxu1 %v4239_v20  ;;  %vm5113_vm11 = vmor %vm626_vm0, %vm650_vm1  ;;  %v4293_v56 = vld [vmem:[#allocation6 + $0x1a8] sm:$0xff]  }
 0x118   :  { %v407_v55 = vpack.c.bf16 %v3523_v49, %v3521_v54  ;;  %v410_v61 = vadd.bf16 %v3515_v31, %v406_v52  ;;  %vm955_vm8 = vcmp.eq.s32.totalorder %v4971_v39, %v5063_v32  ;;  %vm956_vm1 = vcmp.eq.s32.totalorder %v4975_v48, %v5063_v32  ;;  %v4268_v49 = vld [vmem:[#allocation6 + $0x248] sm:$0xff]  }
 0x119   :  { %v1956_v54 = vadd.s32 173, %v4957_v28 }
 0x11a   :  { %4193 = vset.pattern.permute.xlu1 %v4708_v33  ;;  %v411_v60 = vadd.bf16 0, %v407_v55  ;;  %v1004_v59 = vpop.permute.xlu0 %1003  ;;  %3881 = vmatpush3.bf16.msra.mxu1 %v4241_v41  ;;  %v4271_v55 = vld [vmem:[#allocation6 + $0x250] sm:$0xff]  }
 0x11b   :  { %1669 = vperm.xlu1 %4193, %v1658_v47   ;;  %3882 = vmatprep.subr.bf16.mxu1 %v4243_v44  ;;  %vm1014_vm9 = vcmp.eq.s32.totalorder %v4975_v48, %v1004_v59  ;;  %v1955_v47 = vadd.s32 173, %v4963_v38 }
 0x11c   :  { %580 = vmatprep.mubr.bf16.mxu1 %v411_v60  ;;  %v969_v62 = vpop.permute.xlu1 %968 }
 0x11d   :  { %581 = vmatmul.mubr.bf16.gmra.mrb[4].mxu1 %v410_v61  ;;  %vm979_vm3 = vcmp.eq.s32.totalorder %v4971_v39, %v969_v62  ;;  %vm980_vm12 = vcmp.eq.s32.totalorder %v4975_v48, %v969_v62  ;;  %v4273_v61 = vld [vmem:[#allocation6 + $0x210] sm:$0xff]  }
 0x11e   :  { %v5073_v4 = vpop.permute.xlu0 %1006  ;;  %3883 = vmatpush3.bf16.msra.mxu1 %v4245_v58  ;;  %vm5120_vm13 = vmor %vm955_vm8, %vm979_vm3  ;;  %v4513_v58 = vld [vmem:[#allocation3 + $0x24] sm:$0xf] }
 0x11f   :  { %1336 = vperm.xlu1 %4193, %v1327_v57   ;;  %3884 = vmatprep.subr.bf16.mxu1 %v4247_v46  ;;  %vm988_vm3 = vmor %vm956_vm1, %vm980_vm12 }
 0x120   :  { %v972_v10 = vpop.permute.xlu1 %971 }
 0x121   :  { %vm982_vm15 = vcmp.eq.s32.totalorder %v4975_v48, %v972_v10  ;;  %vm981_vm4 = vcmp.eq.s32.totalorder %v4971_v39, %v972_v10 }
 0x122   :  { %3885 = vmatpush3.bf16.msra.mxu1 %v4249_v50  ;;  %v5077_v8 = vpop.permute.xlu0 %679  ;;  %vm990_vm10 = vmor %vm958_vm14, %vm982_vm15  ;;  %vm1013_vm15 = vcmp.eq.s32.totalorder %v4971_v39, %v1004_v59  ;;  %v4272_v50 = vld [vmem:[#allocation6 + $0x180] sm:$0xff]  }
 0x123   :  { %4194 = vset.pattern.permute.xlu1 %v4707_v1  ;;  %3886 = vmatprep.subr.bf16.mxu1 %v4252_v7  ;;  %vm5124_vm14 = vmor %vm625_vm6, %vm649_vm7  ;;  %vm5696_vm6 = vcmp.eq.s32.totalorder %v4975_v48, 255 }
 0x124   :  { %1934 = vperm.xlu1 %4194, %v1929_v11   ;;  %vm989_vm0 = vmor %vm957_vm5, %vm981_vm4 }
 0x125   :  { %v618_v31 = vpop.permute.xlu1 %617  ;;  %vm1022_vm2 = vmor %vm990_vm10, %vm1014_vm9 }
 0x126   :  { %3887 = vmatpush3.bf16.msra.mxu1 %v4254_v12  ;;  %v5097_v15 = vpop.permute.xlu0 %1663  ;;  %vm1021_vm8 = vmor %vm989_vm0, %vm1013_vm15  ;;  %vm628_vm0 = vcmp.eq.s32.totalorder %v4975_v48, %v618_v31  ;;  %v1988_v12 = vadd.s32 181, %v4957_v28 }
 0x127   :  { %3888 = vmatprep.subr.bf16.mxu1 %v4256_v17  ;;  %vm5139_vm7 = vmor %vm1022_vm2, %vm5696_vm6  ;;  %v3570_v29 = vsel %vm1021_vm8, 1.0, %v4709_v5  ;;  %vm627_vm2 = vcmp.eq.s32.totalorder %v4971_v39, %v618_v31  ;;  %v4274_v17 = vld [vmem:[#allocation6 + $0x1c8] sm:$0xff]   ;;  %v4275_v31 = vld [vmem:[#allocation6 + $0x258] sm:$0xff]  }
 0x128   :  { %4195 = vset.pattern.permute.xlu1 %v4706_v0  ;;  %vm5699_vm1 = vmmov %vm5696_vm6  ;;  %v3571_v2 = vsel %vm5139_vm7, 1.0, %v4709_v5 }
 0x129   :  { %1958 = vperm.xlu1 %4195, %v1953_v13   ;;  %v4277_v13 = vld [vmem:[#allocation6 + $0x218] sm:$0xff]  }
 0x12a   :  { %v642_v18 = vpop.permute.xlu1 %641  ;;  %3889 = vmatpush3.bf16.msra.mxu1 %v4258_v14  ;;  %v4276_v14 = vld [vmem:[#allocation6 + $0x188] sm:$0xff]  }
 0x12b   :  { %3930 = vmatprep.subr.bf16.mxu1 %v4265_v63  ;;  %v5135_v24 = vpop.permute.xlu0 %950  ;;  %vm651_vm9 = vcmp.eq.s32.totalorder %v4971_v39, %v642_v18  ;;  %vm652_vm12 = vcmp.eq.s32.totalorder %v4975_v48, %v642_v18  ;;  %v4279_v63 = vld [vmem:[#allocation6 + $0x260] sm:$0xff]  }
 0x12d   :  { %1961 = vperm.xlu1 %4195, %v1954_v6   ;;  %v4278_v6 = vld [vmem:[#allocation6 + $0x1d0] sm:$0xff]  }
 0x12f   :  { %v1001_v25 = vpop.permute.xlu1 %1000  ;;  %v5173_v37 = vpop.permute.xlu0 %1607 }
 0x130   :  { %vm1011_vm5 = vcmp.eq.s32.totalorder %v4971_v39, %v1001_v25  ;;  %vm1012_vm4 = vcmp.eq.s32.totalorder %v4975_v48, %v1001_v25 }
 0x131   :  { %vm1019_vm10 = vmor %vm5120_vm13, %vm1011_vm5  ;;  %4197 = vset.pattern.permute.xlu1 %v4708_v33 }
 0x132   :  { %vm1020_vm15 = vmor %vm988_vm3, %vm1012_vm4  ;;  %v3568_v53 = vsel %vm1019_vm10, 1.0, %v4709_v5  ;;  %1993 = vperm.xlu1 %4197, %v1986_v22  }
 0x133   :  { %vm1028_vm6 = vmor %vm1020_vm15, %vm5699_vm1  ;;  %v671_v30 = vpop.permute.xlu1 %670  ;;  %v1063_v34 = vpack.c.bf16 %v3570_v29, %v3568_v53  ;;  %v5201_v42 = vpop.permute.xlu0 %1274  ;;  %v4284_v53 = vld [vmem:[#allocation6 + $0x198] sm:$0xff]   ;;  %v4304_v29 = vld [vmem:[#allocation6 + $0x2d0] sm:$0xff]  }
 0x134   :  { %vm5160_vm13 = vmor %vm627_vm2, %vm651_vm9  ;;  %v3569_v51 = vsel %vm1028_vm6, 1.0, %v4709_v5  ;;  %vm681_vm3 = vcmp.eq.s32.totalorder %v4971_v39, %v671_v30  ;;  %vm682_vm8 = vcmp.eq.s32.totalorder %v4975_v48, %v671_v30  ;;  %v4287_v30 = vld [vmem:[#allocation6 + $0x1e0] sm:$0xff]  }
 0x135   :  { %vm5169_vm5 = vmor %vm628_vm0, %vm652_vm12  ;;  %v1064_v20 = vpack.c.bf16 %v3571_v2, %v3569_v51  ;;  %v1067_v44 = vadd.bf16 %v3566_v9, %v1063_v34  ;;  %v4269_v9 = vld [vmem:[#allocation6 + $0x208] sm:$0xff]   ;;  %v5714_v2 = vmov 0  ;;  %v5717_v51 = vmov 0  ;;  %v4290_v34 = vld [vmem:[#allocation6 + $0x1a0] sm:$0xff]  }
 0x136   :  { %vm690_vm7 = vmor %vm5113_vm11, %vm682_vm8  ;;  %4198 = vset.pattern.permute.xlu1 %v4707_v1  ;;  %vm1016_vm8 = vcmp.eq.s32.totalorder %v4975_v48, %v5073_v4 }
 0x137   :  { %vm5180_vm4 = vmor %vm5124_vm14, %vm681_vm3  ;;  %1940 = vperm.xlu1 %4198, %v1931_v26   ;;  %v674_v41 = vpop.permute.xlu1 %673  ;;  %v1068_v43 = vadd.bf16 0, %v1064_v20  ;;  %v5216_v10 = vpop.permute.xlu0 %1610  ;;  %v4288_v26 = vld [vmem:[#allocation6 + $0x270] sm:$0xff]  }
 0x138   :  { %vm5706_vm9 = vmmov %vm5699_vm1  ;;  %vm683_vm11 = vcmp.eq.s32.totalorder %v4971_v39, %v674_v41  ;;  %vm684_vm14 = vcmp.eq.s32.totalorder %v4975_v48, %v674_v41  ;;  %v3542_v38 = vsel %vm5180_vm4, 1.0, %v4709_v5 }
 0x139   :  { %vm5189_vm10 = vmor %vm690_vm7, %vm5706_vm9  ;;  %1232 = vmatprep.mubr.bf16.mxu1 %v1068_v43  ;;  %v4294_v43 = vld [vmem:[#allocation6 + $0x238] sm:$0xff]  }
 0x13a   :  { %vm691_vm12 = vmor %vm5160_vm13, %vm683_vm11  ;;  %1233 = vmatmul.mubr.bf16.vlgmr.msra.gmra.mrb[8].mxu1 %v1067_v44  ;;  %v3543_v57 = vsel %vm5189_vm10, 1.0, %v4709_v5  ;;  %vm959_vm13 = vcmp.eq.s32.totalorder %v4971_v39, %v5135_v24  ;;  %vm1015_vm11 = vcmp.eq.s32.totalorder %v4971_v39, %v5073_v4 }
 0x13b   :  { %vm692_vm15 = vmor %vm5169_vm5, %vm684_vm14  ;;  %v3544_v23 = vsel %vm691_vm12, 1.0, %v4709_v5  ;;  %4199 = vset.pattern.permute.xlu1 %v4706_v0  ;;  %3931 = vmatpush3.bf16.msra.mxu1 %v4266_v36  ;;  %v4512_v0 = vld [vmem:[#allocation3 + $0x8] sm:$0xf] }
 0x13c   :  { %vm5709_vm2 = vmmov %vm5699_vm1  ;;  %1964 = vperm.xlu1 %4199, %v1955_v47   ;;  %v5210_v32 = vpop.permute.xlu1 %953  ;;  %3932 = vmatprep.subr.bf16.mxu1 %v4268_v49  ;;  %v3540_v60 = vcombine.low %v4512_v0, %v4513_v58  ;;  %v733_v59 = vpack.c.bf16 %v3544_v23, %v3542_v38  ;;  %vm960_vm1 = vcmp.eq.s32.totalorder %v4975_v48, %v5135_v24  ;;  %v978_v28 = vpop.permute.xlu0 %977  ;;  %v4296_v47 = vld [vmem:[#allocation6 + $0x1f0] sm:$0xff]  }
 0x13d   :  { %vm700_vm0 = vmor %vm692_vm15, %vm5709_vm2  ;;  %vm961_vm5 = vcmp.eq.s32.totalorder %v4971_v39, %v5210_v32  ;;  %vm985_vm7 = vcmp.eq.s32.totalorder %v4971_v39, %v978_v28  ;;  %vm962_vm9 = vcmp.eq.s32.totalorder %v4975_v48, %v5210_v32  ;;  %vm986_vm10 = vcmp.eq.s32.totalorder %v4975_v48, %v978_v28  ;;  %v4515_v32 = vld [vmem:[#allocation3 + $0x60] sm:$0xf] }
 0x13e   :  { %v3545_v52 = vsel %vm700_vm0, 1.0, %v4709_v5  ;;  %v737_v7 = vadd.bf16 %v3540_v60, %v733_v59  ;;  %vm5245_vm12 = vmor %vm961_vm5, %vm985_vm7  ;;  %v4298_v60 = vld [vmem:[#allocation6 + $0x1f8] sm:$0xff]  }
 0x13f   :  { %v734_v46 = vpack.c.bf16 %v3545_v52, %v3543_v57  ;;  %3933 = vmatpush3.bf16.msra.mxu1 %v4269_v9  ;;  %vm5255_vm2 = vmor %vm962_vm9, %vm986_vm10  ;;  %vm687_vm10 = vcmp.eq.s32.totalorder %v4971_v39, %v5077_v8  ;;  %v4514_v52 = vld [vmem:[#allocation3 + $0x44] sm:$0xf]  ;;  %v4526_v57 = vld [vmem:[#allocation3 + $0x18] sm:$0xf] }
 0x140   :  { %1967 = vperm.xlu1 %4199, %v1956_v54   ;;  %3934 = vmatprep.subr.bf16.mxu1 %v4271_v55  ;;  %v645_v25 = vpop.permute.xlu0 %644  ;;  %v3567_v54 = vcombine.low %v4514_v52, %v4515_v32  ;;  %v4297_v55 = vld [vmem:[#allocation6 + $0x1b0] sm:$0xff]  }
 0x141   :  { %v738_v62 = vadd.bf16 0, %v734_v46  ;;  %v975_v11 = vpop.permute.xlu1 %974 }
 0x142   :  { %vm984_vm6 = vcmp.eq.s32.totalorder %v4975_v48, %v975_v11  ;;  %vm983_vm3 = vcmp.eq.s32.totalorder %v4971_v39, %v975_v11 }
 0x143   :  { %902 = vmatprep.mubr.bf16.mxu0 %v738_v62  ;;  %3935 = vmatpush3.bf16.msra.mxu1 %v4273_v61  ;;  %vm992_vm4 = vmor %vm960_vm1, %vm984_vm6  ;;  %vm653_vm1 = vcmp.eq.s32.totalorder %v4971_v39, %v645_v25 }
 0x144   :  { %903 = vmatmul.mubr.bf16.vlgmr.msra.gmra.mrb[4].mxu0 %v737_v7  ;;  %4201 = vset.pattern.permute.xlu1 %v4708_v33  ;;  %v4283_v33 = vld [vmem:[#allocation6 + $0x268] sm:$0xff]   ;;  %vm991_vm14 = vmor %vm959_vm13, %vm983_vm3  ;;  %vm654_vm3 = vcmp.eq.s32.totalorder %v4975_v48, %v645_v25  ;;  %v4517_v7 = vld [vmem:[#allocation3 + $0x40] sm:$0xf]  ;;  %v1299_v25 = vpop.permute.xlu0 %1298 }
 0x145   :  { %3903 = vmatpush3.bf16.msra.mxu0 %v4272_v50  ;;  %1999 = vperm.xlu1 %4201, %v1988_v12   ;;  %vm1024_vm15 = vmor %vm992_vm4, %vm1016_vm8  ;;  %vm5716_vm8 = vcmp.eq.s32.totalorder %v4975_v48, 255  ;;  %v4516_v50 = vld [vmem:[#allocation3 + $0x5c] sm:$0xf]  ;;  %v4299_v12 = vld [vmem:[#allocation6 + $0x1b8] sm:$0xff]  }
 0x146   :  { %3904 = vmatprep.subr.bf16.mxu0 %v4274_v17  ;;  %v621_v18 = vpop.permute.xlu1 %620  ;;  %3936 = vmatprep.subr.bf16.mxu1 %v4275_v31  ;;  %vm5261_vm6 = vmor %vm991_vm14, %vm1015_vm11  ;;  %v3541_v11 = vcombine.low %v4517_v7, %v4516_v50  ;;  %v4356_v50 = vld [vmem:[#allocation9 + $0x110] ss:$8 sps:$4 sm:$0xff]  }
 0x147   :  { %3937 = vmatpush3.bf16.msra.mxu1 %v4277_v13  ;;  %vm629_vm0 = vcmp.eq.s32.totalorder %v4971_v39, %v621_v18  ;;  %v5715_v2 = vsel %vm5261_vm6, 4294967295, %v5714_v2  ;;  %vm5269_vm5 = vmor %vm1024_vm15, %vm5716_vm8  ;;  %vm688_vm8 = vcmp.eq.s32.totalorder %v4975_v48, %v5077_v8 }
 0x148   :  { %3938 = vmatprep.subr.bf16.mxu1 %v4279_v63  ;;  %v5718_v51 = vsel %vm5269_vm5, 4294967295, %v5717_v51  ;;  %vm5282_vm11 = vmor %vm629_vm0, %vm653_vm1  ;;  %vm5721_vm5 = vcmp.eq.s32.totalorder %v4975_v48, %v621_v18 }
 0x149   :  { %3905 = vmatpush3.bf16.msra.mxu0 %v4276_v14  ;;  %vm5293_vm6 = vmor %vm5721_vm5, %vm654_vm3 }
 0x14a   :  { %3906 = vmatprep.subr.bf16.mxu0 %v4278_v6  ;;  %v624_v22 = vpop.permute.xlu1 %623  ;;  %v4300_v6 = vld [vmem:[#allocation6 + $0x2c0] sm:$0xff]  }
 0x14b   :  { %3939 = vmatpush3.bf16.msra.mxu1 %v4281_v19  ;;  %vm631_vm7 = vcmp.eq.s32.totalorder %v4971_v39, %v624_v22  ;;  %vm632_vm14 = vcmp.eq.s32.totalorder %v4975_v48, %v624_v22  ;;  %v4352_v19 = vld [vmem:[#allocation9 + $0x104] ss:$8 sps:$4 sm:$0xff]  }
 0x14c   :  { %3940 = vmatprep.subr.bf16.mxu1 %v4283_v33 }
 0x14d   :  { %3907 = vmatpush3.bf16.msra.mxu0 %v4280_v16 }
 0x14e   :  { %3908 = vmatprep.subr.bf16.mxu0 %v4282_v21 }
 0x14f   :  { %v648_v4 = vpop.permute.xlu1 %647  ;;  %3941 = vmatpush3.bf16.msra.mxu1 %v4285_v27 }
 0x150   :  { %vm655_vm4 = vcmp.eq.s32.totalorder %v4971_v39, %v648_v4  ;;  %vm656_vm9 = vcmp.eq.s32.totalorder %v4975_v48, %v648_v4  ;;  %3942 = vmatprep.subr.bf16.mxu1 %v4288_v26  ;;  %v5737_v26 = vmov 0 }
 0x151   :  { %3909 = vmatpush3.bf16.msra.mxu0 %v4284_v53  ;;  %vm663_vm15 = vmor %vm631_vm7, %vm655_vm4  ;;  %v5735_v53 = vmov 0 }
 0x152   :  { %3910 = vmatprep.subr.bf16.mxu0 %v4287_v30  ;;  %vm664_vm13 = vmor %vm632_vm14, %vm656_vm9  ;;  %vm5729_vm9 = vcmp.eq.s32.totalorder %v4975_v48, 255  ;;  %vm5730_vm14 = vnez %v5718_v51  ;;  %v4519_v30 = vld [vmem:[#allocation3 + $0x14] sm:$0xf] }
 0x153   :  { %3943 = vmatpush3.bf16.msra.mxu1 %v4289_v3  ;;  %vm5297_vm0 = vmor %vm663_vm15, %vm687_vm10  ;;  %v3573_v38 = vsel %vm5730_vm14, 1.0, %v4709_v5 }
 0x154   :  { %v1010_v44 = vpop.permute.xlu1 %1009  ;;  %3944 = vmatprep.subr.bf16.mxu1 %v4292_v35  ;;  %vm5301_vm1 = vmor %vm664_vm13, %vm688_vm8  ;;  %vm5728_vm13 = vnez %v5715_v2  ;;  %v3548_v61 = vsel %vm5297_vm0, 1.0, %v4709_v5  ;;  %vm1286_vm0 = vcmp.eq.s32.totalorder %v4975_v48, %v5201_v42 }
 0x155   :  { %3911 = vmatpush3.bf16.msra.mxu0 %v4290_v34  ;;  %vm1017_vm7 = vcmp.eq.s32.totalorder %v4971_v39, %v1010_v44  ;;  %vm1018_vm3 = vcmp.eq.s32.totalorder %v4975_v48, %v1010_v44  ;;  %v3572_v23 = vsel %vm5728_vm13, 1.0, %v4709_v5  ;;  %vm1310_vm13 = vcmp.eq.s32.totalorder %v4975_v48, %v1299_v25  ;;  %v3503_v34 = vld [vmem:[%s5673_s3] ss:$0 sm:$0xff] }
 0x156   :  { %3912 = vmatprep.subr.bf16.mxu0 %v4291_v40  ;;  %vm1025_vm5 = vmor %vm5245_vm12, %vm1017_vm7 }
 0x157   :  { %vm1026_vm4 = vmor %vm5255_vm2, %vm1018_vm3  ;;  %v3574_v49 = vsel %vm1025_vm5, 1.0, %v4709_v5  ;;  %3945 = vmatpush3.bf16.msra.mxu1 %v4294_v43  ;;  %v4388_v43 = vld [vmem:[#allocation9 + $0x164] ss:$8 sps:$4 sm:$0xff]  }
 0x158   :  { %vm1034_vm10 = vmor %vm1026_vm4, %vm5729_vm9  ;;  %v677_v9 = vpop.permute.xlu1 %676  ;;  %v1065_v58 = vpack.c.bf16 %v3574_v49, %v3572_v23  ;;  %2998 = vmatprep.subr.bf16.mxu1 %v4352_v19  ;;  %v4386_v49 = vld [vmem:[#allocation9 + $0x160] ss:$8 sps:$4 sm:$0xff]  }
 0x159   :  { %3913 = vmatpush3.bf16.msra.mxu0 %v4293_v56  ;;  %vm5731_vm12 = vmmov %vm5729_vm9  ;;  %v3575_v0 = vsel %vm1034_vm10, 1.0, %v4709_v5  ;;  %vm685_vm15 = vcmp.eq.s32.totalorder %v4971_v39, %v677_v9  ;;  %vm686_vm8 = vcmp.eq.s32.totalorder %v4975_v48, %v677_v9  ;;  %vm1285_vm10 = vcmp.eq.s32.totalorder %v4971_v39, %v5201_v42 }
 0x15a   :  { %vm5324_vm2 = vmor %vm5301_vm1, %vm5731_vm12  ;;  %3914 = vmatprep.subr.bf16.mxu0 %v4296_v47  ;;  %v1066_v59 = vpack.c.bf16 %v3575_v0, %v3573_v38  ;;  %v1069_v14 = vadd.bf16 %v3567_v54, %v1065_v58  ;;  %vm1309_vm12 = vcmp.eq.s32.totalorder %v4971_v39, %v1299_v25  ;;  %v4350_v38 = vld [vmem:[#allocation9 + $0x100] ss:$8 sps:$4 sm:$0xff]   ;;  %v4358_v0 = vld [vmem:[#allocation9 + $0x114] ss:$8 sps:$4 sm:$0xff]  }
 0x15b   :  { %vm693_vm7 = vmor %vm5282_vm11, %vm685_vm15  ;;  %v3549_v63 = vsel %vm5324_vm2, 1.0, %v4709_v5  ;;  %v4302_v25 = vld [vmem:[#allocation6 + $0x2c8] sm:$0xff]  }
 0x15c   :  { %vm694_vm3 = vmor %vm5293_vm6, %vm686_vm8  ;;  %v3546_v46 = vsel %vm693_vm7, 1.0, %v4709_v5  ;;  %v1070_v62 = vadd.bf16 0, %v1066_v59  ;;  %vm1618_vm6 = vcmp.eq.s32.totalorder %v4975_v48, %v5173_v37 }
 0x15d   :  { %vm5734_vm1 = vmmov %vm5729_vm9  ;;  %3915 = vmatpush3.bf16.msra.mxu0 %v4297_v55  ;;  %v735_v31 = vpack.c.bf16 %v3548_v61, %v3546_v46  ;;  %v1605_v13 = vpop.permute.xlu1 %1604  ;;  %vm1617_vm9 = vcmp.eq.s32.totalorder %v4971_v39, %v5173_v37  ;;  %v4303_v37 = vld [vmem:[#allocation6 + $0x288] sm:$0xff]  }
 0x15e   :  { %vm702_vm5 = vmor %vm694_vm3, %vm5734_vm1  ;;  %3916 = vmatprep.subr.bf16.mxu0 %v4298_v60  ;;  %1240 = vmatprep.mubr.bf16.mxu1 %v1070_v62  ;;  %vm1615_vm2 = vcmp.eq.s32.totalorder %v4971_v39, %v1605_v13  ;;  %vm1674_vm1 = vcmp.eq.s32.totalorder %v4975_v48, %v5097_v15  ;;  %v5442_v62 = vpop.permute.xlu0 %1637 }
 0x15f   :  { %v3547_v17 = vsel %vm702_vm5, 1.0, %v4709_v5  ;;  %1241 = vmatmul.mubr.bf16.gmra.mrb[12].mxu1 %v1069_v14  ;;  %v739_v16 = vadd.bf16 %v3541_v11, %v735_v31  ;;  %vm5364_vm3 = vmor %vm1286_vm0, %vm1310_vm13  ;;  %vm5741_vm13 = vcmp.eq.s32.totalorder %v4975_v48, 255  ;;  %v4521_v31 = vld [vmem:[#allocation3 + $0x2c] sm:$0xf] }
 0x160   :  { %v736_v18 = vpack.c.bf16 %v3549_v63, %v3547_v17  ;;  %v5738_v26 = vsel %vm5364_vm3, 4294967295, %v5737_v26  ;;  %v4520_v17 = vld [vmem:[#allocation3 + $0x10] sm:$0xf] }
 0x161   :  { %3917 = vmatpush3.bf16.msra.mxu0 %v4299_v12 }
 0x162   :  { %v740_v28 = vadd.bf16 0, %v736_v18  ;;  %3958 = vmatprep.subr.bf16.mxu0 %v4300_v6  ;;  %v1629_v33 = vpop.permute.xlu1 %1628  ;;  %v4364_v18 = vld [vmem:[#allocation9 + $0x124] ss:$8 sps:$4 sm:$0xff]  }
 0x163   :  { %vm1639_vm4 = vcmp.eq.s32.totalorder %v4971_v39, %v1629_v33  ;;  %vm1640_vm8 = vcmp.eq.s32.totalorder %v4975_v48, %v1629_v33  ;;  %v4301_v33 = vld [vmem:[#allocation6 + $0x280] sm:$0xff]  }
 0x164   :  { %910 = vmatprep.mubr.bf16.mxu0 %v740_v28  ;;  %vm5360_vm7 = vmor %vm1615_vm2, %vm1639_vm4  ;;  %vm1673_vm4 = vcmp.eq.s32.totalorder %v4971_v39, %v5097_v15  ;;  %v4518_v15 = vld [vmem:[#allocation3 + $0x30] sm:$0xf] }
 0x165   :  { %911 = vmatmul.mubr.bf16.gmra.mrb[8].mxu0 %v739_v16  ;;  %v5736_v53 = vsel %vm5360_vm7, 4294967295, %v5735_v53  ;;  %v3618_v24 = vcombine.low %v4519_v30, %v4518_v15  ;;  %v4376_v15 = vld [vmem:[#allocation9 + $0x144] ss:$8 sps:$4 sm:$0xff]  }
 0x166   :  { %v1632_v21 = vpop.permute.xlu1 %1631 }
 0x167   :  { %vm1642_vm11 = vcmp.eq.s32.totalorder %v4975_v48, %v1632_v21  ;;  %vm1641_vm14 = vcmp.eq.s32.totalorder %v4971_v39, %v1632_v21  ;;  %v4362_v21 = vld [vmem:[#allocation9 + $0x120] ss:$8 sps:$4 sm:$0xff]  }
 0x168   :  { %vm1650_vm15 = vmor %vm1618_vm6, %vm1642_vm11  ;;  %vm1616_vm11 = vcmp.eq.s32.totalorder %v4975_v48, %v1605_v13  ;;  %v3592_v13 = vcombine.low %v4520_v17, %v4521_v31  ;;  %v4522_v17 = vld [vmem:[#allocation3 + $0x4c] sm:$0xf]  ;;  %v4523_v31 = vld [vmem:[#allocation3 + $0x68] sm:$0xf] }
 0x169   :  { %vm1649_vm5 = vmor %vm1617_vm9, %vm1641_vm14  ;;  %v4042_v41 = vpop.f32.mrb[0].mxu0 }
 0x16a   :  { %vm5370_vm6 = vmor %vm1285_vm10, %vm1309_vm12  ;;  %vm5744_vm12 = vnez %v5736_v53  ;;  %v249_v44 = vadd.f32 %v4042_v41, %v3503_v34  ;;  %v240_v56 = vpop.f32.mrb[1].mxu0  ;;  %v5452_v53 = vpop.permute.xlu0 %1304  ;;  %v4310_v41 = vld [vmem:[#allocation6 + $0x2e0] sm:$0xff]  }
 0x16b   :  { %v1278_v22 = vpop.permute.xlu1 %1277  ;;  %vm1682_vm2 = vmor %vm1650_vm15, %vm1674_vm1  ;;  %v241_v8 = vadd.f32 %v3503_v34, %v240_v56  ;;  %v4043_v47 = vpop.f32.mrb[2].mxu0  ;;  %v5763_v56 = vmov 0 }
 0x16c   :  { %vm1648_vm7 = vmor %vm1616_vm11, %vm1640_vm8  ;;  %vm1288_vm11 = vcmp.eq.s32.totalorder %v4975_v48, %v1278_v22  ;;  %v257_v52 = vmax.f32 %v249_v44, 0.0  ;;  %v252_v32 = vadd.f32 %v4043_v47, %v3503_v34  ;;  %v243_v54 = vpop.f32.mrb[3].mxu0  ;;  %v4311_v47 = vld [vmem:[#allocation6 + $0x2a0] sm:$0xff]  }
 0x16d   :  { %vm1681_vm0 = vmor %vm1649_vm5, %vm1673_vm4  ;;  %vm1287_vm5 = vcmp.eq.s32.totalorder %v4971_v39, %v1278_v22  ;;  %v244_v60 = vadd.f32 %v3503_v34, %v243_v54  ;;  %v255_v46 = vmax.f32 %v241_v8, 0.0  ;;  %v4313_v54 = vld [vmem:[#allocation6 + $0x2a8] sm:$0xff]  }
 0x16e   :  { %vm5379_vm3 = vmor %vm1682_vm2, %vm5741_vm13  ;;  %v3622_v4 = vsel %vm1681_vm0, 1.0, %v4709_v5  ;;  %v258_v58 = vmax.f32 %v252_v32, 0.0 }
 0x16f   :  { %vm5745_vm2 = vmmov %vm5741_vm13  ;;  %v3623_v51 = vsel %vm5379_vm3, 1.0, %v4709_v5  ;;  %v256_v11 = vmax.f32 %v244_v60, 0.0  ;;  %v4394_v60 = vld [vmem:[#allocation9 + $0x184] ss:$8 sps:$4 sm:$0xff]  }
 0x170   :  { %v1302_v27 = vpop.permute.xlu1 %1301  ;;  %v5444_v7 = vpack.c.bf16 %v258_v58, %v257_v52  ;;  %v4315_v58 = vld [vmem:[#allocation6 + $0x2f0] sm:$0xff]  }
 0x171   :  { %vm1311_vm14 = vcmp.eq.s32.totalorder %v4971_v39, %v1302_v27  ;;  %vm1312_vm1 = vcmp.eq.s32.totalorder %v4975_v48, %v1302_v27  ;;  %v5450_v19 = vpack.c.bf16 %v256_v11, %v255_v46  ;;  %v4370_v27 = vld [vmem:[#allocation9 + $0x134] ss:$8 sps:$4 sm:$0xff]  }
 0x172   :  { %vm5412_vm3 = vmor %vm1288_vm11, %vm1312_vm1 }
 0x173   :  { %vm5756_vm11 = vmmov %vm5745_vm2 }
 0x175   :  { %v1661_v42 = vpop.permute.xlu1 %1660 }
 0x176   :  { %vm1671_vm9 = vcmp.eq.s32.totalorder %v4971_v39, %v1661_v42  ;;  %vm1672_vm10 = vcmp.eq.s32.totalorder %v4975_v48, %v1661_v42  ;;  %v4368_v42 = vld [vmem:[#allocation9 + $0x130] ss:$8 sps:$4 sm:$0xff]  }
 0x177   :  { %vm1679_vm15 = vmor %vm5744_vm12, %vm1671_vm9  ;;  %vm5750_vm9 = vnez %v5738_v26 }
 0x178   :  { %vm1680_vm8 = vmor %vm1648_vm7, %vm1672_vm10  ;;  %v3620_v2 = vsel %vm1679_vm15, 1.0, %v4709_v5 }
 0x179   :  { %vm1688_vm4 = vmor %vm1680_vm8, %vm5745_vm2  ;;  %v1331_v3 = vpop.permute.xlu1 %1330  ;;  %v1723_v40 = vpack.c.bf16 %v3622_v4, %v3620_v2  ;;  %v4305_v2 = vld [vmem:[#allocation6 + $0x290] sm:$0xff]   ;;  %v4374_v4 = vld [vmem:[#allocation9 + $0x140] ss:$8 sps:$4 sm:$0xff]  }
 0x17a   :  { %vm5403_vm7 = vmor %vm1287_vm5, %vm1311_vm14  ;;  %v3621_v20 = vsel %vm1688_vm4, 1.0, %v4709_v5  ;;  %vm1341_vm0 = vcmp.eq.s32.totalorder %v4971_v39, %v1331_v3  ;;  %vm1342_vm13 = vcmp.eq.s32.totalorder %v4975_v48, %v1331_v3  ;;  %v4307_v3 = vld [vmem:[#allocation6 + $0x2d8] sm:$0xff]  }
 0x17b   :  { %v1724_v36 = vpack.c.bf16 %v3623_v51, %v3621_v20  ;;  %vm1350_vm10 = vmor %vm5750_vm9, %vm1342_vm13  ;;  %v1727_v55 = vadd.bf16 %v3618_v24, %v1723_v40  ;;  %v1667_v24 = vpop.permute.xlu0 %1666  ;;  %v4382_v51 = vld [vmem:[#allocation9 + $0x154] ss:$8 sps:$4 sm:$0xff]   ;;  %vm1645_vm13 = vcmp.eq.s32.totalorder %v4971_v39, %v5442_v62  ;;  %v4380_v40 = vld [vmem:[#allocation9 + $0x150] ss:$8 sps:$4 sm:$0xff]  }
 0x17c   :  { %vm5420_vm14 = vmor %vm5370_vm6, %vm1341_vm0  ;;  %v4308_v20 = vld [vmem:[#allocation6 + $0x298] sm:$0xff]  }
 0x17d   :  { %v1334_v23 = vpop.permute.xlu1 %1333  ;;  %v1728_v9 = vadd.bf16 0, %v1724_v36  ;;  %vm5753_vm12 = vmmov %vm5745_vm2  ;;  %v3594_v61 = vsel %vm5420_vm14, 1.0, %v4709_v5  ;;  %vm1619_vm14 = vcmp.eq.s32.totalorder %v4971_v39, %v5216_v10  ;;  %v4406_v36 = vld [vmem:[#allocation9 + $0x1c4] ss:$8 sps:$4 sm:$0xff]  }
 0x17e   :  { %vm5426_vm15 = vmor %vm1350_vm10, %vm5753_vm12  ;;  %vm1343_vm1 = vcmp.eq.s32.totalorder %v4971_v39, %v1334_v23  ;;  %vm1344_vm6 = vcmp.eq.s32.totalorder %v4975_v48, %v1334_v23  ;;  %vm1676_vm10 = vcmp.eq.s32.totalorder %v4975_v48, %v1667_v24  ;;  %vm1646_vm12 = vcmp.eq.s32.totalorder %v4975_v48, %v5442_v62  ;;  %v4392_v62 = vld [vmem:[#allocation9 + $0x180] ss:$8 sps:$4 sm:$0xff]  }
 0x17f   :  { %vm1351_vm8 = vmor %vm5403_vm7, %vm1343_vm1  ;;  %1892 = vmatprep.mubr.bf16.mxu1 %v1728_v9  ;;  %v3595_v12 = vsel %vm5426_vm15, 1.0, %v4709_v5  ;;  %vm1620_vm7 = vcmp.eq.s32.totalorder %v4975_v48, %v5216_v10  ;;  %v1340_v44 = vpop.permute.xlu0 %1339  ;;  %v5766_v23 = vmov 0  ;;  %v4312_v9 = vld [vmem:[#allocation6 + $0x2e8] sm:$0xff]  }
 0x180   :  { %vm1352_vm5 = vmor %vm5412_vm3, %vm1344_vm6  ;;  %v3596_v59 = vsel %vm1351_vm8, 1.0, %v4709_v5  ;;  %1893 = vmatmul.mubr.bf16.vlgmr.msra.gmra.mrb[16].mxu1 %v1727_v55  ;;  %vm1675_vm6 = vcmp.eq.s32.totalorder %v4971_v39, %v1667_v24  ;;  %v4389_v55 = vld [vmem:[#allocation9 + $0x170] ss:$8 sps:$4 sm:$0xff]  }
 0x181   :  { %vm1360_vm2 = vmor %vm1352_vm5, %vm5756_vm11  ;;  %2999 = vmatpush1.bf16.msra.mxu1 %v4350_v38  ;;  %v1393_v63 = vpack.c.bf16 %v3596_v59, %v3594_v61  ;;  %v4391_v38 = vld [vmem:[#allocation9 + $0x174] ss:$8 sps:$4 sm:$0xff]  }
 0x182   :  { %v3597_v14 = vsel %vm1360_vm2, 1.0, %v4709_v5  ;;  %v1614_v6 = vpop.permute.xlu1 %1613  ;;  %3000 = vmatprep.subr.bf16.mxu1 %v4358_v0  ;;  %vm1313_vm2 = vcmp.eq.s32.totalorder %v4971_v39, %v5452_v53  ;;  %v4316_v61 = vld [vmem:[#allocation6 + $0x2b0] sm:$0xff]  }
 0x183   :  { %v1394_v28 = vpack.c.bf16 %v3597_v14, %v3595_v12  ;;  %v1397_v22 = vadd.bf16 %v3592_v13, %v1393_v63  ;;  %vm1621_vm3 = vcmp.eq.s32.totalorder %v4971_v39, %v1614_v6  ;;  %vm1622_vm15 = vcmp.eq.s32.totalorder %v4975_v48, %v1614_v6  ;;  %v4317_v14 = vld [vmem:[#allocation6 + $0x2f8] sm:$0xff]   ;;  %v4418_v6 = vld [vmem:[#allocation9 + $0x204] ss:$8 sps:$4 sm:$0xff]  }
 0x184   :  { %vm5477_vm8 = vmor %vm1621_vm3, %vm1645_vm13  ;;  %vm5765_vm3 = vcmp.eq.s32.totalorder %v4975_v48, 255  ;;  %vm1348_vm13 = vcmp.eq.s32.totalorder %v4975_v48, %v1340_v44  ;;  %v3619_v13 = vcombine.low %v4522_v17, %v4523_v31  ;;  %v4397_v63 = vld [vmem:[#allocation9 + $0x194] ss:$8 sps:$4 sm:$0xff]  }
 0x185   :  { %v1398_v16 = vadd.bf16 0, %v1394_v28  ;;  %3001 = vmatpush1.bf16.msra.mxu1 %v4356_v50  ;;  %vm5485_vm11 = vmor %vm1622_vm15, %vm1646_vm12 }
 0x186   :  { %3002 = vmatprep.subr.bf16.mxu1 %v4364_v18 }
 0x187   :  { %1562 = vmatprep.mubr.bf16.mxu0 %v1398_v16  ;;  %v1635_v26 = vpop.permute.xlu1 %1634 }
 0x188   :  { %1563 = vmatmul.mubr.bf16.vlgmr.msra.gmra.mrb[12].mxu0 %v1397_v22  ;;  %vm1644_vm4 = vcmp.eq.s32.totalorder %v4975_v48, %v1635_v26  ;;  %vm1643_vm0 = vcmp.eq.s32.totalorder %v4971_v39, %v1635_v26 }
 0x189   :  { %3959 = vmatpush3.bf16.msra.mxu0 %v4301_v33  ;;  %3003 = vmatpush1.bf16.msra.mxu1 %v4362_v21  ;;  %vm5461_vm9 = vmor %vm1620_vm7, %vm1644_vm4  ;;  %vm1314_vm7 = vcmp.eq.s32.totalorder %v4975_v48, %v5452_v53  ;;  %v4318_v21 = vld [vmem:[#allocation6 + $0x2b8] sm:$0xff]   ;;  %v4525_v53 = vld [vmem:[#allocation3 + $0x64] sm:$0xf] }
 0x18a   :  { %3960 = vmatprep.subr.bf16.mxu0 %v4302_v25  ;;  %3004 = vmatprep.subr.bf16.mxu1 %v4370_v27  ;;  %vm1651_vm1 = vmor %vm1619_vm14, %vm1643_vm0  ;;  %v4524_v27 = vld [vmem:[#allocation3 + $0x48] sm:$0xf] }
 0x18b   :  { %vm1684_vm5 = vmor %vm5461_vm9, %vm1676_vm10  ;;  %v3593_v26 = vcombine.low %v4524_v27, %v4525_v53  ;;  %v4328_v53 = vld [vmem:[#allocation9 + $0x30] ss:$8 sps:$4 sm:$0xff]  }
 0x18c   :  { %v1281_v30 = vpop.permute.xlu1 %1280  ;;  %vm5494_vm0 = vmor %vm1651_vm1, %vm1675_vm6 }
 0x18d   :  { %3961 = vmatpush3.bf16.msra.mxu0 %v4303_v37  ;;  %3005 = vmatpush1.bf16.msra.mxu1 %v4368_v42  ;;  %vm1289_vm4 = vcmp.eq.s32.totalorder %v4971_v39, %v1281_v30  ;;  %v5764_v56 = vsel %vm5494_vm0, 4294967295, %v5763_v56  ;;  %vm5501_vm9 = vmor %vm1684_vm5, %vm5765_vm3  ;;  %vm1347_vm5 = vcmp.eq.s32.totalorder %v4971_v39, %v1340_v44  ;;  %v4321_v37 = vld [vmem:[#allocation9 + $0x4] ss:$8 sps:$4 sm:$0xff]   ;;  %v4395_v42 = vld [vmem:[#allocation9 + $0x190] ss:$8 sps:$4 sm:$0xff]  }
 0x18e   :  { %3962 = vmatprep.subr.bf16.mxu0 %v4304_v29  ;;  %3006 = vmatprep.subr.bf16.mxu1 %v4376_v15  ;;  %v5767_v23 = vsel %vm5501_vm9, 4294967295, %v5766_v23  ;;  %vm5513_vm15 = vmor %vm1289_vm4, %vm1313_vm2  ;;  %vm5770_vm9 = vcmp.eq.s32.totalorder %v4975_v48, %v1281_v30 }
 0x18f   :  { %vm5525_vm0 = vmor %vm5770_vm9, %vm1314_vm7 }
 0x190   :  { %v1284_v35 = vpop.permute.xlu1 %1283 }
 0x191   :  { %3963 = vmatpush3.bf16.msra.mxu0 %v4305_v2  ;;  %3007 = vmatpush1.bf16.msra.mxu1 %v4374_v4  ;;  %vm1291_vm10 = vcmp.eq.s32.totalorder %v4971_v39, %v1284_v35  ;;  %vm1292_vm1 = vcmp.eq.s32.totalorder %v4975_v48, %v1284_v35  ;;  %v4400_v4 = vld [vmem:[#allocation9 + $0x1a4] ss:$8 sps:$4 sm:$0xff]   ;;  %v4398_v35 = vld [vmem:[#allocation9 + $0x1a0] ss:$8 sps:$4 sm:$0xff]  }
 0x192   :  { %3964 = vmatprep.subr.bf16.mxu0 %v4307_v3  ;;  %3008 = vmatprep.subr.bf16.mxu1 %v4382_v51  ;;  %v1991_v51 = vpop.permute.xlu0 %1990 }
 0x195   :  { %v1308_v8 = vpop.permute.xlu1 %1307  ;;  %3965 = vmatpush3.bf16.msra.mxu0 %v4308_v20  ;;  %3009 = vmatpush1.bf16.msra.mxu1 %v4380_v40  ;;  %v4403_v40 = vld [vmem:[#allocation9 + $0x1b4] ss:$8 sps:$4 sm:$0xff]  }
 0x196   :  { %vm1315_vm14 = vcmp.eq.s32.totalorder %v4971_v39, %v1308_v8  ;;  %vm1316_vm12 = vcmp.eq.s32.totalorder %v4975_v48, %v1308_v8  ;;  %3966 = vmatprep.subr.bf16.mxu0 %v4310_v41  ;;  %3010 = vmatprep.subr.bf16.mxu1 %v4388_v43  ;;  %v4401_v43 = vld [vmem:[#allocation9 + $0x1b0] ss:$8 sps:$4 sm:$0xff]   ;;  %v1938_v10 = vpop.permute.xlu0 %1937 }
 0x197   :  { %vm1323_vm6 = vmor %vm1291_vm10, %vm1315_vm14 }
 0x198   :  { %vm1324_vm3 = vmor %vm1292_vm1, %vm1316_vm12  ;;  %vm5778_vm12 = vnez %v5767_v23  ;;  %vm5779_vm1 = vcmp.eq.s32.totalorder %v4975_v48, 255 }
 0x199   :  { %3967 = vmatpush3.bf16.msra.mxu0 %v4311_v47  ;;  %3011 = vmatpush1.bf16.msra.mxu1 %v4386_v49  ;;  %vm5529_vm2 = vmor %vm1323_vm6, %vm1347_vm5  ;;  %v3625_v11 = vsel %vm5778_vm12, 1.0, %v4709_v5  ;;  %v4409_v47 = vld [vmem:[#allocation9 + $0x1d4] ss:$8 sps:$4 sm:$0xff]   ;;  %v4353_v49 = vld [vmem:[#allocation9 + $0xa0] ss:$8 sps:$4 sm:$0xff]  }
 0x19a   :  { %v1670_v0 = vpop.permute.xlu1 %1669  ;;  %3968 = vmatprep.subr.bf16.mxu0 %v4312_v9  ;;  %3012 = vmatprep.subr.bf16.mxu1 %v4391_v38  ;;  %vm5533_vm4 = vmor %vm1324_vm3, %vm1348_vm13  ;;  %vm5777_vm13 = vnez %v5764_v56  ;;  %v3600_v22 = vsel %vm5529_vm2, 1.0, %v4709_v5  ;;  %v4404_v56 = vld [vmem:[#allocation9 + $0x1c0] ss:$8 sps:$4 sm:$0xff]   ;;  %v4407_v9 = vld [vmem:[#allocation9 + $0x1d0] ss:$8 sps:$4 sm:$0xff]   ;;  %v1944_v32 = vpop.permute.xlu0 %1943 }
 0x19b   :  { %vm1677_vm7 = vcmp.eq.s32.totalorder %v4971_v39, %v1670_v0  ;;  %vm1678_vm9 = vcmp.eq.s32.totalorder %v4975_v48, %v1670_v0  ;;  %v3624_v50 = vsel %vm5777_vm13, 1.0, %v4709_v5  ;;  %v4412_v38 = vld [vmem:[#allocation9 + $0x1e4] ss:$8 sps:$4 sm:$0xff]  }
 0x19c   :  { %vm1685_vm10 = vmor %vm5477_vm8, %vm1677_vm7  ;;  %v4527_v0 = vld [vmem:[#allocation3 + $0x34] sm:$0xf] }
 0x19d   :  { %vm1686_vm14 = vmor %vm5485_vm11, %vm1678_vm9  ;;  %v3626_v46 = vsel %vm1685_vm10, 1.0, %v4709_v5  ;;  %3969 = vmatpush3.bf16.msra.mxu0 %v4313_v54  ;;  %3013 = vmatpush1.bf16.msra.mxu1 %v4389_v55 }
 0x19e   :  { %vm1694_vm8 = vmor %vm1686_vm14, %vm5779_vm1  ;;  %v1337_v12 = vpop.permute.xlu1 %1336  ;;  %3970 = vmatprep.subr.bf16.mxu0 %v4315_v58  ;;  %3014 = vmatprep.subr.bf16.mxu1 %v4394_v60  ;;  %v1725_v28 = vpack.c.bf16 %v3626_v46, %v3624_v50  ;;  %vm2002_vm14 = vcmp.eq.s32.totalorder %v4975_v48, %v1991_v51  ;;  %v3644_v58 = vcombine.low %v4526_v57, %v4527_v0  ;;  %v4415_v50 = vld [vmem:[#allocation9 + $0x1f4] ss:$8 sps:$4 sm:$0xff]   ;;  %v1997_v31 = vpop.permute.xlu0 %1996  ;;  %v4367_v0 = vld [vmem:[#allocation9 + $0xc4] ss:$8 sps:$4 sm:$0xff]  }
 0x19f   :  { %vm5780_vm11 = vmmov %vm5779_vm1  ;;  %v3627_v18 = vsel %vm1694_vm8, 1.0, %v4709_v5  ;;  %vm1345_vm5 = vcmp.eq.s32.totalorder %v4971_v39, %v1337_v12  ;;  %vm1346_vm3 = vcmp.eq.s32.totalorder %v4975_v48, %v1337_v12  ;;  %vm2001_vm8 = vcmp.eq.s32.totalorder %v4971_v39, %v1991_v51  ;;  %v4319_v12 = vld [vmem:[#allocation9] ss:$8 sps:$4 sm:$0xff]   ;;  %v4337_v51 = vld [vmem:[#allocation9 + $0x54] ss:$8 sps:$4 sm:$0xff]  }
 0x1a0   :  { %vm5556_vm6 = vmor %vm5533_vm4, %vm5780_vm11  ;;  %v1726_v16 = vpack.c.bf16 %v3627_v18, %v3625_v11  ;;  %v1729_v2 = vadd.bf16 %v3619_v13, %v1725_v28  ;;  %v4324_v13 = vld [vmem:[#allocation9 + $0x14] ss:$8 sps:$4 sm:$0xff]   ;;  %v4322_v18 = vld [vmem:[#allocation9 + $0x10] ss:$8 sps:$4 sm:$0xff]  }
 0x1a1   :  { %vm1353_vm7 = vmor %vm5513_vm15, %vm1345_vm5  ;;  %3971 = vmatpush3.bf16.msra.mxu0 %v4316_v61  ;;  %3015 = vmatpush1.bf16.msra.mxu1 %v4392_v62  ;;  %v3601_v29 = vsel %vm5556_vm6, 1.0, %v4709_v5  ;;  %vm1947_vm5 = vcmp.eq.s32.totalorder %v4971_v39, %v1938_v10  ;;  %v4410_v61 = vld [vmem:[#allocation9 + $0x1e0] ss:$8 sps:$4 sm:$0xff]   ;;  %v4327_v28 = vld [vmem:[#allocation9 + $0x24] ss:$8 sps:$4 sm:$0xff]  }
 0x1a2   :  { %vm1354_vm9 = vmor %vm5525_vm0, %vm1346_vm3  ;;  %v3598_v33 = vsel %vm1353_vm7, 1.0, %v4709_v5  ;;  %v1730_v25 = vadd.bf16 0, %v1726_v16  ;;  %3972 = vmatprep.subr.bf16.mxu0 %v4317_v14  ;;  %3016 = vmatprep.subr.bf16.mxu1 %v4397_v63  ;;  %v4413_v14 = vld [vmem:[#allocation9 + $0x1f0] ss:$8 sps:$4 sm:$0xff]  }
 0x1a3   :  { %vm5783_vm4 = vmmov %vm5779_vm1  ;;  %v1395_v30 = vpack.c.bf16 %v3600_v22, %v3598_v33  ;;  %v1935_v24 = vpop.permute.xlu1 %1934  ;;  %v4325_v33 = vld [vmem:[#allocation9 + $0x20] ss:$8 sps:$4 sm:$0xff]   ;;  %v4330_v22 = vld [vmem:[#allocation9 + $0x34] ss:$8 sps:$4 sm:$0xff]  }
 0x1a4   :  { %vm1362_vm10 = vmor %vm1354_vm9, %vm5783_vm4  ;;  %1900 = vmatprep.mubr.bf16.mxu1 %v1730_v25  ;;  %vm1946_vm2 = vcmp.eq.s32.totalorder %v4975_v48, %v1935_v24  ;;  %vm1945_vm13 = vcmp.eq.s32.totalorder %v4971_v39, %v1935_v24  ;;  %vm1948_vm9 = vcmp.eq.s32.totalorder %v4975_v48, %v1938_v10  ;;  %v4528_v24 = vld [vmem:[#allocation3 + $0x6c] sm:$0xf]  ;;  %v4344_v10 = vld [vmem:[#allocation9 + $0x80] ss:$8 sps:$4 sm:$0xff]  }
 0x1a5   :  { %v3599_v15 = vsel %vm1362_vm10, 1.0, %v4709_v5  ;;  %1901 = vmatmul.mubr.bf16.gmra.mrb[20].mxu1 %v1729_v2  ;;  %3973 = vmatpush3.bf16.msra.mxu0 %v4318_v21  ;;  %v1399_v20 = vadd.bf16 %v3593_v26, %v1395_v30  ;;  %v4333_v26 = vld [vmem:[#allocation9 + $0x44] ss:$8 sps:$4 sm:$0xff]   ;;  %v4331_v30 = vld [vmem:[#allocation9 + $0x40] ss:$8 sps:$4 sm:$0xff]  }
 0x1a6   :  { %v1396_v3 = vpack.c.bf16 %v3601_v29, %v3599_v15  ;;  %2945 = vmatprep.subr.bf16.mxu0 %v4321_v37  ;;  %3017 = vmatpush1.bf16.msra.mxu1 %v4395_v42  ;;  %v4529_v2 = vld [vmem:[#allocation3 + $0x50] sm:$0xf] }
 0x1a7   :  { %3018 = vmatprep.subr.bf16.mxu1 %v4400_v4  ;;  %v3645_v4 = vcombine.low %v4529_v2, %v4528_v24 }
 0x1a8   :  { %v1400_v34 = vadd.bf16 0, %v1396_v3  ;;  %v1959_v41 = vpop.permute.xlu1 %1958 }
 0x1a9   :  { %vm1969_vm0 = vcmp.eq.s32.totalorder %v4971_v39, %v1959_v41  ;;  %vm1970_vm15 = vcmp.eq.s32.totalorder %v4975_v48, %v1959_v41  ;;  %v4341_v41 = vld [vmem:[#allocation9 + $0x70] ss:$8 sps:$4 sm:$0xff]  }
 0x1aa   :  { %1570 = vmatprep.mubr.bf16.mxu0 %v1400_v34  ;;  %3019 = vmatpush1.bf16.msra.mxu1 %v4398_v35  ;;  %vm1978_vm12 = vmor %vm1946_vm2, %vm1970_vm15 }
 0x1ab   :  { %1571 = vmatmul.mubr.bf16.gmra.mrb[16].mxu0 %v1399_v20  ;;  %3020 = vmatprep.subr.bf16.mxu1 %v4403_v40  ;;  %vm1977_vm1 = vmor %vm1945_vm13, %vm1969_vm0  ;;  %v4340_v20 = vld [vmem:[#allocation9 + $0x64] ss:$8 sps:$4 sm:$0xff]   ;;  %v4338_v40 = vld [vmem:[#allocation9 + $0x60] ss:$8 sps:$4 sm:$0xff]  }
 0x1ac   :  { %v1962_v44 = vpop.permute.xlu1 %1961  ;;  %vm2010_vm11 = vmor %vm1978_vm12, %vm2002_vm14 }
 0x1ad   :  { %vm1971_vm6 = vcmp.eq.s32.totalorder %v4971_v39, %v1962_v44  ;;  %vm5585_vm3 = vmor %vm1977_vm1, %vm2001_vm8  ;;  %vm1972_vm7 = vcmp.eq.s32.totalorder %v4975_v48, %v1962_v44  ;;  %v4347_v44 = vld [vmem:[#allocation9 + $0x90] ss:$8 sps:$4 sm:$0xff]  }
 0x1ae   :  { %3021 = vmatpush1.bf16.msra.mxu1 %v4401_v43  ;;  %vm5593_vm10 = vmor %vm2010_vm11, %vm5783_vm4  ;;  %v3646_v54 = vsel %vm5585_vm3, 1.0, %v4709_v5  ;;  %vm2006_vm3 = vcmp.eq.s32.totalorder %v4975_v48, %v1997_v31  ;;  %v4346_v43 = vld [vmem:[#allocation9 + $0x84] ss:$8 sps:$4 sm:$0xff]  }
 0x1af   :  { %3022 = vmatprep.subr.bf16.mxu1 %v4406_v36  ;;  %vm1979_vm0 = vmor %vm1947_vm5, %vm1971_vm6  ;;  %v3647_v55 = vsel %vm5593_vm10, 1.0, %v4709_v5  ;;  %vm2005_vm10 = vcmp.eq.s32.totalorder %v4971_v39, %v1997_v31  ;;  %v4349_v36 = vld [vmem:[#allocation9 + $0x94] ss:$8 sps:$4 sm:$0xff]  }
 0x1b0   :  { %vm1980_vm15 = vmor %vm1948_vm9, %vm1972_vm7  ;;  %v4385_v31 = vld [vmem:[#allocation9 + $0xf4] ss:$8 sps:$4 sm:$0xff]  }
 0x1b1   :  { %v1994_v23 = vpop.permute.xlu1 %1993  ;;  %vm5788_vm1 = vmmov %vm5783_vm4 }
 0x1b2   :  { %vm2003_vm2 = vcmp.eq.s32.totalorder %v4971_v39, %v1994_v23  ;;  %vm2004_vm14 = vcmp.eq.s32.totalorder %v4975_v48, %v1994_v23  ;;  %3023 = vmatpush1.bf16.msra.mxu1 %v4404_v56  ;;  %v4355_v56 = vld [vmem:[#allocation9 + $0xa4] ss:$8 sps:$4 sm:$0xff]  }
 0x1b3   :  { %vm2011_vm13 = vmor %vm1979_vm0, %vm2003_vm2  ;;  %3024 = vmatprep.subr.bf16.mxu1 %v4409_v47 }
 0x1b4   :  { %vm2012_vm12 = vmor %vm1980_vm15, %vm2004_vm14  ;;  %v3648_v52 = vsel %vm2011_vm13, 1.0, %v4709_v5  ;;  %vm1951_vm13 = vcmp.eq.s32.totalorder %v4971_v39, %v1944_v32 }
 0x1b5   :  { %vm2020_vm8 = vmor %vm2012_vm12, %vm5788_vm1  ;;  %v2053_v59 = vpack.c.bf16 %v3648_v52, %v3646_v54  ;;  %v4359_v54 = vld [vmem:[#allocation9 + $0xb0] ss:$8 sps:$4 sm:$0xff]  }
 0x1b6   :  { %v3649_v60 = vsel %vm2020_vm8, 1.0, %v4709_v5  ;;  %v1941_v46 = vpop.permute.xlu1 %1940  ;;  %3025 = vmatpush1.bf16.msra.mxu1 %v4407_v9  ;;  %vm5791_vm12 = vmmov %vm5788_vm1  ;;  %vm1952_vm8 = vcmp.eq.s32.totalorder %v4975_v48, %v1944_v32 }
 0x1b7   :  { %v2054_v62 = vpack.c.bf16 %v3649_v60, %v3647_v55  ;;  %3026 = vmatprep.subr.bf16.mxu1 %v4412_v38  ;;  %v2057_v17 = vadd.bf16 %v3644_v58, %v2053_v59  ;;  %vm1950_vm5 = vcmp.eq.s32.totalorder %v4975_v48, %v1941_v46  ;;  %vm1949_vm7 = vcmp.eq.s32.totalorder %v4971_v39, %v1941_v46  ;;  %v4361_v38 = vld [vmem:[#allocation9 + $0xb4] ss:$8 sps:$4 sm:$0xff]   ;;  %v4365_v60 = vld [vmem:[#allocation9 + $0xc0] ss:$8 sps:$4 sm:$0xff]   ;;  %v4371_v46 = vld [vmem:[#allocation9 + $0xd0] ss:$8 sps:$4 sm:$0xff]  }
 0x1b8   :  { %v4373_v59 = vld [vmem:[#allocation9 + $0xd4] ss:$8 sps:$4 sm:$0xff]  }
 0x1b9   :  { %v2058_v11 = vadd.bf16 0, %v2054_v62 }
 0x1ba   :  { %3027 = vmatpush1.bf16.msra.mxu1 %v4410_v61  ;;  %v4379_v61 = vld [vmem:[#allocation9 + $0xe4] ss:$8 sps:$4 sm:$0xff]  }
 0x1bb   :  { %2222 = vmatprep.mubr.bf16.mxu0 %v2058_v11  ;;  %v1965_v63 = vpop.permute.xlu1 %1964  ;;  %3028 = vmatprep.subr.bf16.mxu1 %v4415_v50  ;;  %v4377_v11 = vld [vmem:[#allocation9 + $0xe0] ss:$8 sps:$4 sm:$0xff]  }
 0x1bc   :  { %vm1973_vm11 = vcmp.eq.s32.totalorder %v4971_v39, %v1965_v63  ;;  %vm1974_vm6 = vcmp.eq.s32.totalorder %v4975_v48, %v1965_v63  ;;  %2223 = vmatmul.mubr.bf16.vlgmr.msra.gmra.mrb[20].mxu0 %v2057_v17  ;;  %v4383_v63 = vld [vmem:[#allocation9 + $0xf0] ss:$8 sps:$4 sm:$0xff]  }
 0x1bd   :  { %2946 = vmatpush1.bf16.msra.mxu0 %v4319_v12  ;;  %vm1982_vm9 = vmor %vm1950_vm5, %vm1974_vm6 }
 0x1be   :  { %2947 = vmatprep.subr.bf16.mxu0 %v4324_v13  ;;  %3029 = vmatpush1.bf16.msra.mxu1 %v4413_v14  ;;  %vm1981_vm4 = vmor %vm1949_vm7, %vm1973_vm11 }
 0x1bf   :  { %v1968_v16 = vpop.permute.xlu1 %1967  ;;  %3051 = vmatprep.subr.bf16.mxu1 %v4418_v6  ;;  %vm2014_vm0 = vmor %vm1982_vm9, %vm2006_vm3 }
 0x1c0   :  { %vm1975_vm15 = vcmp.eq.s32.totalorder %v4971_v39, %v1968_v16  ;;  %vm5616_vm2 = vmor %vm1981_vm4, %vm2005_vm10  ;;  %vm1976_vm14 = vcmp.eq.s32.totalorder %v4975_v48, %v1968_v16 }
 0x1c1   :  { %2948 = vmatpush1.bf16.msra.mxu0 %v4322_v18  ;;  %vm5624_vm1 = vmor %vm2014_vm0, %vm5791_vm12  ;;  %v3650_v42 = vsel %vm5616_vm2, 1.0, %v4709_v5 }
 0x1c2   :  { %2949 = vmatprep.subr.bf16.mxu0 %v4327_v28  ;;  %vm1983_vm11 = vmor %vm1951_vm13, %vm1975_vm15 }
 0x1c3   :  { %vm1984_vm6 = vmor %vm1952_vm8, %vm1976_vm14 }
 0x1c4   :  { %v2000_v27 = vpop.permute.xlu1 %1999  ;;  %vm5794_vm4 = vmmov %vm5791_vm12 }
 0x1c5   :  { %2950 = vmatpush1.bf16.msra.mxu0 %v4325_v33  ;;  %vm2007_vm5 = vcmp.eq.s32.totalorder %v4971_v39, %v2000_v27  ;;  %vm2008_vm3 = vcmp.eq.s32.totalorder %v4975_v48, %v2000_v27  ;;  %v3651_v39 = vsel %vm5624_vm1, 1.0, %v4709_v5  ;;  %v4335_v48 = vld [vmem:[#allocation9 + $0x50] ss:$8 sps:$4 sm:$0xff]  }
 0x1c6   :  { %vm2015_vm7 = vmor %vm1983_vm11, %vm2007_vm5  ;;  %2951 = vmatprep.subr.bf16.mxu0 %v4330_v22 }
 0x1c7   :  { %vm2016_vm9 = vmor %vm1984_vm6, %vm2008_vm3  ;;  %v3652_v37 = vsel %vm2015_vm7, 1.0, %v4709_v5 }
 0x1c8   :  { %vm2024_vm10 = vmor %vm2016_vm9, %vm5794_vm4  ;;  %v2055_v15 = vpack.c.bf16 %v3652_v37, %v3650_v42 }
 0x1c9   :  { %v3653_v29 = vsel %vm2024_vm10, 1.0, %v4709_v5  ;;  %2952 = vmatpush1.bf16.msra.mxu0 %v4328_v53  ;;  %v4343_v5 = vld [vmem:[#allocation9 + $0x74] ss:$8 sps:$4 sm:$0xff]  }
 0x1ca   :  { %2953 = vmatprep.subr.bf16.mxu0 %v4333_v26  ;;  %v2056_v3 = vpack.c.bf16 %v3653_v29, %v3651_v39  ;;  %v2059_v35 = vadd.bf16 %v3645_v4, %v2055_v15  ;;  %v4416_v4 = vld [vmem:[#allocation9 + $0x200] ss:$8 sps:$4 sm:$0xff]  }
 0x1cc   :  { %v2060_v34 = vadd.bf16 0, %v2056_v3  ;;  %v4421_v3 = vld [vmem:[#allocation9 + $0x214] ss:$8 sps:$4 sm:$0xff]  }
 0x1cd   :  { %2954 = vmatpush1.bf16.msra.mxu0 %v4331_v30 }
 0x1ce   :  { %2230 = vmatprep.mubr.bf16.mxu0 %v2060_v34  ;;  %2955 = vmatprep.subr.bf16.mxu0 %v4337_v51  ;;  %v4419_v51 = vld [vmem:[#allocation9 + $0x210] ss:$8 sps:$4 sm:$0xff]   ;;  %v4424_v34 = vld [vmem:[#allocation9 + $0x224] ss:$8 sps:$4 sm:$0xff]  }
 0x1cf   :  { %2231 = vmatmul.mubr.bf16.gmra.mrb[24].mxu0 %v2059_v35  ;;  %v4422_v35 = vld [vmem:[#allocation9 + $0x220] ss:$8 sps:$4 sm:$0xff]  }
 0x1d1   :  { %2956 = vmatpush1.bf16.msra.mxu0 %v4335_v48  ;;  %v4427_v48 = vld [vmem:[#allocation9 + $0x234] ss:$8 sps:$4 sm:$0xff]  }
 0x1d2   :  { %2957 = vmatprep.subr.bf16.mxu0 %v4340_v20  ;;  %v4425_v20 = vld [vmem:[#allocation9 + $0x230] ss:$8 sps:$4 sm:$0xff]  }
 0x1d5   :  { %2958 = vmatpush1.bf16.msra.mxu0 %v4338_v40  ;;  %v4430_v40 = vld [vmem:[#allocation9 + $0x244] ss:$8 sps:$4 sm:$0xff]  }
 0x1d6   :  { %2959 = vmatprep.subr.bf16.mxu0 %v4343_v5  ;;  %v4428_v5 = vld [vmem:[#allocation9 + $0x240] ss:$8 sps:$4 sm:$0xff]  }
 0x1d9   :  { %2960 = vmatpush1.bf16.msra.mxu0 %v4341_v41  ;;  %v4433_v41 = vld [vmem:[#allocation9 + $0x254] ss:$8 sps:$4 sm:$0xff]  }
 0x1da   :  { %2961 = vmatprep.subr.bf16.mxu0 %v4346_v43  ;;  %v4431_v43 = vld [vmem:[#allocation9 + $0x250] ss:$8 sps:$4 sm:$0xff]  }
 0x1dd   :  { %2962 = vmatpush1.bf16.msra.mxu0 %v4344_v10 }
 0x1de   :  { %2963 = vmatprep.subr.bf16.mxu0 %v4349_v36  ;;  %v4436_v36 = vld [vmem:[#allocation9 + $0x264] ss:$8 sps:$4 sm:$0xff]  }
 0x1e0   :  { %v3834_v8 = vpop.f32.mrb[0].mxu1 }
 0x1e1   :  { %v3835_v47 = vpop.f32.mrb[1].mxu1  ;;  %2964 = vmatpush1.bf16.msra.mxu0 %v4347_v44 }
 0x1e2   :  { %v3836_v23 = vadd.f32 %v3835_v47, %v3834_v8  ;;  %v3837_v9 = vpop.f32.mrb[2].mxu1  ;;  %2965 = vmatprep.subr.bf16.mxu0 %v4355_v56 }
 0x1e3   :  { %v3838_v52 = vpop.f32.mrb[3].mxu1 }
 0x1e4   :  { %v3839_v32 = vadd.f32 %v3838_v52, %v3837_v9  ;;  %v589_v55 = vmax.f32 %v3836_v23, 0.0 }
 0x1e5   :  { %2966 = vmatpush1.bf16.msra.mxu0 %v4353_v49  ;;  %v4434_v49 = vld [vmem:[#allocation9 + $0x260] ss:$8 sps:$4 sm:$0xff]  }
 0x1e6   :  { %v590_v57 = vmax.f32 %v3839_v32, 0.0  ;;  %2967 = vmatprep.subr.bf16.mxu0 %v4361_v38  ;;  %v4439_v38 = vld [vmem:[#allocation9 + $0x274] ss:$8 sps:$4 sm:$0xff]  }
 0x1e8   :  { %v593_v58 = vpack.c.bf16 %v590_v57, %v589_v55 }
 0x1e9   :  { %2968 = vmatpush1.bf16.msra.mxu0 %v4359_v54 }
 0x1ea   :  { %2977 = vmatprep.mubr.bf16.mxu0 %v593_v58  ;;  %2969 = vmatprep.subr.bf16.mxu0 %v4367_v0  ;;  %v4437_v58 = vld [vmem:[#allocation9 + $0x270] ss:$8 sps:$4 sm:$0xff]  }
 0x1ed   :  { %2970 = vmatpush1.bf16.msra.mxu0 %v4365_v60 }
 0x1ee   :  { %2971 = vmatprep.subr.bf16.mxu0 %v4373_v59 }
 0x1f0   :  { %v3840_v62 = vpop.f32.mrb[4].mxu1 }
 0x1f1   :  { %2972 = vmatpush1.bf16.msra.mxu0 %v4371_v46  ;;  %v3841_v50 = vpop.f32.mrb[5].mxu1  ;;  %v4442_v46 = vld [vmem:[#allocation9 + $0x284] ss:$8 sps:$4 sm:$0xff]  }
 0x1f2   :  { %v3842_v12 = vadd.f32 %v3841_v50, %v3840_v62  ;;  %v3843_v17 = vpop.f32.mrb[6].mxu1  ;;  %2973 = vmatprep.subr.bf16.mxu0 %v4379_v61  ;;  %v4440_v50 = vld [vmem:[#allocation9 + $0x280] ss:$8 sps:$4 sm:$0xff]  }
 0x1f3   :  { %v3844_v13 = vpop.f32.mrb[7].mxu1 }
 0x1f4   :  { %v3845_v14 = vadd.f32 %v3844_v13, %v3843_v17  ;;  %v591_v6 = vmax.f32 %v3842_v12, 0.0  ;;  %v4445_v12 = vld [vmem:[#allocation9 + $0x294] ss:$8 sps:$4 sm:$0xff]   ;;  %v4443_v17 = vld [vmem:[#allocation9 + $0x290] ss:$8 sps:$4 sm:$0xff]  }
 0x1f5   :  { %2974 = vmatpush1.bf16.msra.mxu0 %v4377_v11  ;;  %v4446_v13 = vld [vmem:[#allocation9 + $0x2a0] ss:$8 sps:$4 sm:$0xff]  }
 0x1f6   :  { %v592_v18 = vmax.f32 %v3845_v14, 0.0  ;;  %2975 = vmatprep.subr.bf16.mxu0 %v4385_v31  ;;  %v4448_v31 = vld [vmem:[#allocation9 + $0x2a4] ss:$8 sps:$4 sm:$0xff]   ;;  %v4451_v14 = vld [vmem:[#allocation9 + $0x2b4] ss:$8 sps:$4 sm:$0xff]  }
 0x1f8   :  { %v594_v28 = vpack.c.bf16 %v592_v18, %v591_v6  ;;  %v4454_v6 = vld [vmem:[#allocation9 + $0x2c4] ss:$8 sps:$4 sm:$0xff]   ;;  %v4452_v18 = vld [vmem:[#allocation9 + $0x2c0] ss:$8 sps:$4 sm:$0xff]  }
 0x1f9   :  { %2976 = vmatpush1.bf16.msra.mxu0 %v4383_v63  ;;  %v4449_v63 = vld [vmem:[#allocation9 + $0x2b0] ss:$8 sps:$4 sm:$0xff]  }
 0x1fc   :  { %2978 = vmatmul.mubr.bf16.vlgmr.msra.gmra.mrb[28].mxu0 %v5450_v19 }
 0x1fd   :  { %2987 = vmatprep.mubr.bf16.mxu0 %v594_v28  ;;  %v4457_v28 = vld [vmem:[#allocation9 + $0x2d4] ss:$8 sps:$4 sm:$0xff]  }
 0x204   :  { %2988 = vmatmul.mubr.bf16.gmra.mrb[32].mxu0 %v5444_v7 }
 0x20d   :  { %v3890_v16 = vpop.f32.mrb[8].mxu1 }
 0x20e   :  { %v3891_v33 = vpop.f32.mrb[9].mxu1 }
 0x20f   :  { %v3892_v21 = vadd.f32 %v3891_v33, %v3890_v16  ;;  %v3893_v22 = vpop.f32.mrb[10].mxu1  ;;  %v4455_v16 = vld [vmem:[#allocation9 + $0x2d0] ss:$8 sps:$4 sm:$0xff]   ;;  %v4460_v33 = vld [vmem:[#allocation9 + $0x2e4] ss:$8 sps:$4 sm:$0xff]  }
 0x210   :  { %v3894_v25 = vpop.f32.mrb[11].mxu1 }
 0x211   :  { %v3895_v27 = vadd.f32 %v3894_v25, %v3893_v22  ;;  %v1249_v53 = vmax.f32 %v3892_v21, 0.0 }
 0x213   :  { %v1250_v26 = vmax.f32 %v3895_v27, 0.0 }
 0x215   :  { %v1253_v37 = vpack.c.bf16 %v1250_v26, %v1249_v53  ;;  %v4458_v53 = vld [vmem:[#allocation9 + $0x2e0] ss:$8 sps:$4 sm:$0xff]  }
 0x217   :  { %v3862_v42 = vpop.f32.mrb[4].mxu0  ;;  %3030 = vmatprep.mubr.bf16.mxu1 %v1253_v37  ;;  %v4463_v37 = vld [vmem:[#allocation9 + $0x2f4] ss:$8 sps:$4 sm:$0xff]  }
 0x218   :  { %v3863_v39 = vpop.f32.mrb[5].mxu0 }
 0x219   :  { %v3864_v29 = vadd.f32 %v3863_v39, %v3862_v42  ;;  %v3865_v15 = vpop.f32.mrb[6].mxu0 }
 0x21a   :  { %v3866_v30 = vpop.f32.mrb[7].mxu0 }
 0x21b   :  { %v3867_v24 = vadd.f32 %v3866_v30, %v3865_v15  ;;  %v919_v19 = vmax.f32 %v3864_v29, 0.0  ;;  %v4461_v15 = vld [vmem:[#allocation9 + $0x2f0] ss:$8 sps:$4 sm:$0xff]   ;;  %v4466_v30 = vld [vmem:[#allocation9 + $0x304] ss:$8 sps:$4 sm:$0xff]  }
 0x21d   :  { %v920_v2 = vmax.f32 %v3867_v24, 0.0 }
 0x21f   :  { %v923_v7 = vpack.c.bf16 %v920_v2, %v919_v19  ;;  %v4488_v2 = vld [vmem:[#allocation11 + $0x40] sm:$0xff]  }
 0x220   :  { %3986 = vmatprep.subr.bf16.mxu0 %v4488_v2 }
 0x221   :  { %3031 = vmatmul.mubr.bf16.vlgmr.msra.gmra.mrb[24].mxu1 %v923_v7 }
 0x222   :  { %3052 = vmatpush1.bf16.msra.mxu1 %v4416_v4  ;;  %v4489_v4 = vld [vmem:[#allocation11] sm:$0xff]  }
 0x223   :  { %3053 = vmatprep.subr.bf16.mxu1 %v4421_v3  ;;  %v4490_v3 = vld [vmem:[#allocation11 + $0x48] sm:$0xff]   ;;  %3987 = vmatpush3.bf16.msra.mxu0 %v4489_v4 }
 0x224   :  { %3988 = vmatprep.subr.bf16.mxu0 %v4490_v3 }
 0x226   :  { %3054 = vmatpush1.bf16.msra.mxu1 %v4419_v51 }
 0x227   :  { %3055 = vmatprep.subr.bf16.mxu1 %v4424_v34 }
 0x22a   :  { %3056 = vmatpush1.bf16.msra.mxu1 %v4422_v35 }
 0x22b   :  { %3057 = vmatprep.subr.bf16.mxu1 %v4427_v48 }
 0x22e   :  { %3058 = vmatpush1.bf16.msra.mxu1 %v4425_v20  ;;  %v4491_v20 = vld [vmem:[#allocation11 + $0x8] sm:$0xff]  }
 0x22f   :  { %3059 = vmatprep.subr.bf16.mxu1 %v4430_v40  ;;  %v4492_v40 = vld [vmem:[#allocation11 + $0x50] sm:$0xff]   ;;  %3989 = vmatpush3.bf16.msra.mxu0 %v4491_v20 }
 0x230   :  { %3990 = vmatprep.subr.bf16.mxu0 %v4492_v40 }
 0x232   :  { %3060 = vmatpush1.bf16.msra.mxu1 %v4428_v5  ;;  %v3896_v10 = vpop.f32.mrb[12].mxu1 }
 0x233   :  { %3061 = vmatprep.subr.bf16.mxu1 %v4433_v41  ;;  %v3897_v44 = vpop.f32.mrb[13].mxu1 }
 0x234   :  { %v3898_v56 = vadd.f32 %v3897_v44, %v3896_v10  ;;  %v3899_v8 = vpop.f32.mrb[14].mxu1  ;;  %v4493_v44 = vld [vmem:[#allocation11 + $0x10] sm:$0xff]  }
 0x235   :  { %v3900_v47 = vpop.f32.mrb[15].mxu1  ;;  %3991 = vmatpush3.bf16.msra.mxu0 %v4493_v44 }
 0x236   :  { %3062 = vmatpush1.bf16.msra.mxu1 %v4431_v43  ;;  %v3901_v23 = vadd.f32 %v3900_v47, %v3899_v8  ;;  %v1251_v32 = vmax.f32 %v3898_v56, 0.0  ;;  %v4464_v43 = vld [vmem:[#allocation9 + $0x300] ss:$8 sps:$4 sm:$0xff]   ;;  %v4494_v56 = vld [vmem:[#allocation11 + $0x58] sm:$0xff]   ;;  %v4472_v47 = vld [vmem:[#allocation9 + $0x324] ss:$8 sps:$4 sm:$0xff]  }
 0x237   :  { %3063 = vmatprep.subr.bf16.mxu1 %v4436_v36  ;;  %v4469_v36 = vld [vmem:[#allocation9 + $0x314] ss:$8 sps:$4 sm:$0xff]   ;;  %v4467_v8 = vld [vmem:[#allocation9 + $0x310] ss:$8 sps:$4 sm:$0xff]   ;;  %3992 = vmatprep.subr.bf16.mxu0 %v4494_v56  ;;  %v4499_v56 = vld [vmem:[#allocation11 + $0x28] sm:$0xff]  }
 0x238   :  { %v3868_v9 = vpop.f32.mrb[8].mxu0  ;;  %v1252_v54 = vmax.f32 %v3901_v23, 0.0  ;;  %v4496_v23 = vld [vmem:[#allocation11 + $0x60] sm:$0xff]  }
 0x239   :  { %v3869_v52 = vpop.f32.mrb[9].mxu0 }
 0x23a   :  { %v3870_v55 = vadd.f32 %v3869_v52, %v3868_v9  ;;  %v3871_v57 = vpop.f32.mrb[10].mxu0  ;;  %3064 = vmatpush1.bf16.msra.mxu1 %v4434_v49  ;;  %v1254_v60 = vpack.c.bf16 %v1252_v54, %v1251_v32  ;;  %v4495_v49 = vld [vmem:[#allocation11 + $0x18] sm:$0xff]   ;;  %v4470_v9 = vld [vmem:[#allocation9 + $0x320] ss:$8 sps:$4 sm:$0xff]  }
 0x23b   :  { %v3872_v0 = vpop.f32.mrb[11].mxu0  ;;  %3065 = vmatprep.subr.bf16.mxu1 %v4439_v38  ;;  %v4475_v38 = vld [vmem:[#allocation9 + $0x334] ss:$8 sps:$4 sm:$0xff]   ;;  %3993 = vmatpush3.bf16.msra.mxu0 %v4495_v49  ;;  %v4497_v52 = vld [vmem:[#allocation11 + $0x20] sm:$0xff]   ;;  %v4498_v32 = vld [vmem:[#allocation11 + $0x68] sm:$0xff]  }
 0x23c   :  { %v3873_v59 = vadd.f32 %v3872_v0, %v3871_v57  ;;  %v921_v61 = vmax.f32 %v3870_v55, 0.0  ;;  %3040 = vmatprep.mubr.bf16.mxu1 %v1254_v60  ;;  %3994 = vmatprep.subr.bf16.mxu0 %v4496_v23  ;;  %v4473_v54 = vld [vmem:[#allocation9 + $0x330] ss:$8 sps:$4 sm:$0xff]   ;;  %v4478_v55 = vld [vmem:[#allocation9 + $0x344] ss:$8 sps:$4 sm:$0xff]  }
 0x23d   :  { %v4476_v57 = vld [vmem:[#allocation9 + $0x340] ss:$8 sps:$4 sm:$0xff]   ;;  %v4481_v0 = vld [vmem:[#allocation9 + $0x354] ss:$8 sps:$4 sm:$0xff]   ;;  %v4484_v60 = vld [vmem:[#allocation9 + $0x364] ss:$8 sps:$4 sm:$0xff]  }
 0x23e   :  { %v922_v62 = vmax.f32 %v3873_v59, 0.0  ;;  %3066 = vmatpush1.bf16.msra.mxu1 %v4437_v58  ;;  %v4479_v58 = vld [vmem:[#allocation9 + $0x350] ss:$8 sps:$4 sm:$0xff]   ;;  %v4504_v23 = vld [vmem:[#allocation12] sm:$0xff]  }
 0x23f   :  { %3067 = vmatprep.subr.bf16.mxu1 %v4442_v46  ;;  %3995 = vmatpush3.bf16.msra.mxu0 %v4497_v52  ;;  %v4503_v49 = vld [vmem:[#allocation11 + $0x38] sm:$0xff]   ;;  %v2373_v52 = vld [vmem:[%s5675_s5] sm:$0x3] }
 0x240   :  { %v924_v11 = vpack.c.bf16 %v922_v62, %v921_v61  ;;  %3996 = vmatprep.subr.bf16.mxu0 %v4498_v32 }
 0x242   :  { %3041 = vmatmul.mubr.bf16.gmra.mrb[28].mxu1 %v924_v11 }
 0x243   :  { %3068 = vmatpush1.bf16.msra.mxu1 %v4440_v50  ;;  %v4482_v50 = vld [vmem:[#allocation9 + $0x360] ss:$8 sps:$4 sm:$0xff]   ;;  %3997 = vmatpush3.bf16.msra.mxu0 %v4499_v56 }
 0x244   :  { %3069 = vmatprep.subr.bf16.mxu1 %v4445_v12  ;;  %v4487_v12 = vld [vmem:[#allocation9 + $0x374] ss:$8 sps:$4 sm:$0xff]  }
 0x247   :  { %3070 = vmatpush1.bf16.msra.mxu1 %v4443_v17 }
 0x248   :  { %3071 = vmatprep.subr.bf16.mxu1 %v4448_v31 }
 0x24b   :  { %3072 = vmatpush1.bf16.msra.mxu1 %v4446_v13 }
 0x24c   :  { %3073 = vmatprep.subr.bf16.mxu1 %v4451_v14 }
 0x24f   :  { %3074 = vmatpush1.bf16.msra.mxu1 %v4449_v63 }
 0x250   :  { %3075 = vmatprep.subr.bf16.mxu1 %v4454_v6 }
 0x253   :  { %3076 = vmatpush1.bf16.msra.mxu1 %v4452_v18  ;;  %v3946_v21 = vpop.f32.mrb[16].mxu1 }
 0x254   :  { %3077 = vmatprep.subr.bf16.mxu1 %v4457_v28  ;;  %v3947_v22 = vpop.f32.mrb[17].mxu1  ;;  %v4485_v28 = vld [vmem:[#allocation9 + $0x370] ss:$8 sps:$4 sm:$0xff]  }
 0x255   :  { %v3948_v25 = vadd.f32 %v3947_v22, %v3946_v21  ;;  %v3949_v27 = vpop.f32.mrb[18].mxu1 }
 0x256   :  { %v3950_v26 = vpop.f32.mrb[19].mxu1 }
 0x257   :  { %3078 = vmatpush1.bf16.msra.mxu1 %v4455_v16  ;;  %v3951_v42 = vadd.f32 %v3950_v26, %v3949_v27  ;;  %v1909_v39 = vmax.f32 %v3948_v25, 0.0 }
 0x258   :  { %3079 = vmatprep.subr.bf16.mxu1 %v4460_v33 }
 0x259   :  { %v1910_v29 = vmax.f32 %v3951_v42, 0.0 }
 0x25b   :  { %3080 = vmatpush1.bf16.msra.mxu1 %v4458_v53  ;;  %v1913_v24 = vpack.c.bf16 %v1910_v29, %v1909_v39  ;;  %v3918_v19 = vpop.f32.mrb[12].mxu0 }
 0x25c   :  { %3081 = vmatprep.subr.bf16.mxu1 %v4463_v37  ;;  %v3919_v7 = vpop.f32.mrb[13].mxu0 }
 0x25d   :  { %v3920_v51 = vadd.f32 %v3919_v7, %v3918_v19  ;;  %v3921_v34 = vpop.f32.mrb[14].mxu0  ;;  %3083 = vmatprep.mubr.bf16.mxu1 %v1913_v24 }
 0x25e   :  { %v3922_v35 = vpop.f32.mrb[15].mxu0 }
 0x25f   :  { %3082 = vmatpush1.bf16.msra.mxu1 %v4461_v15  ;;  %v3923_v48 = vadd.f32 %v3922_v35, %v3921_v34  ;;  %v1579_v5 = vmax.f32 %v3920_v51, 0.0 }
 0x260   :  { %3104 = vmatprep.subr.bf16.mxu1 %v4466_v30 }
 0x261   :  { %v1580_v41 = vmax.f32 %v3923_v48, 0.0 }
 0x263   :  { %v1583_v10 = vpack.c.bf16 %v1580_v41, %v1579_v5 }
 0x265   :  { %3084 = vmatmul.mubr.bf16.vlgmr.msra.gmra.mrb[24].mxu1 %v1583_v10 }
 0x266   :  { %3105 = vmatpush1.bf16.msra.mxu1 %v4464_v43 }
 0x267   :  { %3106 = vmatprep.subr.bf16.mxu1 %v4469_v36 }
 0x26a   :  { %3107 = vmatpush1.bf16.msra.mxu1 %v4467_v8  ;;  %v4501_v8 = vld [vmem:[#allocation11 + $0x30] sm:$0xff]  }
 0x26b   :  { %3108 = vmatprep.subr.bf16.mxu1 %v4472_v47  ;;  %v4502_v47 = vld [vmem:[#allocation11 + $0x78] sm:$0xff]  }
 0x26e   :  { %3109 = vmatpush1.bf16.msra.mxu1 %v4470_v9  ;;  %v2376_v9 = vshrl.u32 %v263_v45, 7 }
 0x26f   :  { %3110 = vmatprep.subr.bf16.mxu1 %v4475_v38 }
 0x270   :  { %v2377_v38 = vsub.s32 0, %v2376_v9  ;;  %v2381_v32 = vsub.s32 1, %v2376_v9 }
 0x272   :  { %3111 = vmatpush1.bf16.msra.mxu1 %v4473_v54  ;;  %v2378_v54 = vrot.slane %v2373_v52, %v2377_v38 }
 0x273   :  { %3112 = vmatprep.subr.bf16.mxu1 %v4478_v55  ;;  %v2382_v55 = vrot.slane %v2373_v52, %v2381_v32 }
 0x276   :  { %3113 = vmatpush1.bf16.msra.mxu1 %v4476_v57 }
 0x277   :  { %3114 = vmatprep.subr.bf16.mxu1 %v4481_v0 }
 0x278   :  { %v3952_v59 = vpop.f32.mrb[20].mxu1 }
 0x279   :  { %v3953_v46 = vpop.f32.mrb[21].mxu1 }
 0x27a   :  { %v3954_v61 = vadd.f32 %v3953_v46, %v3952_v59  ;;  %v3955_v62 = vpop.f32.mrb[22].mxu1  ;;  %3115 = vmatpush1.bf16.msra.mxu1 %v4479_v58 }
 0x27b   :  { %v3956_v11 = vpop.f32.mrb[23].mxu1  ;;  %3116 = vmatprep.subr.bf16.mxu1 %v4484_v60 }
 0x27c   :  { %v3957_v17 = vadd.f32 %v3956_v11, %v3955_v62  ;;  %v1911_v14 = vmax.f32 %v3954_v61, 0.0 }
 0x27e   :  { %v3924_v31 = vpop.f32.mrb[16].mxu0  ;;  %v1912_v63 = vmax.f32 %v3957_v17, 0.0  ;;  %3117 = vmatpush1.bf16.msra.mxu1 %v4482_v50 }
 0x27f   :  { %v3925_v13 = vpop.f32.mrb[17].mxu0  ;;  %3118 = vmatprep.subr.bf16.mxu1 %v4487_v12 }
 0x280   :  { %v3926_v6 = vadd.f32 %v3925_v13, %v3924_v31  ;;  %v3927_v18 = vpop.f32.mrb[18].mxu0  ;;  %v1914_v33 = vpack.c.bf16 %v1912_v63, %v1911_v14 }
 0x281   :  { %v3928_v16 = vpop.f32.mrb[19].mxu0 }
 0x282   :  { %v3929_v21 = vadd.f32 %v3928_v16, %v3927_v18  ;;  %v1581_v22 = vmax.f32 %v3926_v6, 0.0  ;;  %3093 = vmatprep.mubr.bf16.mxu1 %v1914_v33  ;;  %3119 = vmatpush1.bf16.msra.mxu1 %v4485_v28 }
 0x284   :  { %v1582_v25 = vmax.f32 %v3929_v21, 0.0 }
 0x286   :  { %v1584_v27 = vpack.c.bf16 %v1582_v25, %v1581_v22 }
 0x288   :  { %3094 = vmatmul.mubr.bf16.gmra.mrb[28].mxu1 %v1584_v27 }
 0x289   :  { %3136 = vmatprep.mubr.bf16.mxu1 %v4707_v1 }
 0x28f   :  { %v3974_v53 = vpop.f32.mrb[20].mxu0 }
 0x290   :  { %v3975_v26 = vpop.f32.mrb[21].mxu0 }
 0x291   :  { %v3976_v37 = vadd.f32 %v3975_v26, %v3974_v53  ;;  %v3977_v42 = vpop.f32.mrb[22].mxu0 }
 0x292   :  { %v3978_v39 = vpop.f32.mrb[23].mxu0 }
 0x293   :  { %v3979_v29 = vadd.f32 %v3978_v39, %v3977_v42  ;;  %v2239_v15 = vmax.f32 %v3976_v37, 0.0 }
 0x295   :  { %v2240_v30 = vmax.f32 %v3979_v29, 0.0 }
 0x297   :  { %v2243_v24 = vpack.c.bf16 %v2240_v30, %v2239_v15 }
 0x299   :  { %3137 = vmatmul.mubr.bf16.vlgmr.msra.gmra.mrb[24].mxu1 %v2243_v24 }
 0x29a   :  { %3146 = vmatprep.mubr.bf16.mxu1 %v4707_v1  ;;  %v4500_v1 = vld [vmem:[#allocation11 + $0x70] sm:$0xff]  }
 0x29b   :  { %3998 = vmatprep.subr.bf16.mxu0 %v4500_v1 }
 0x29c   :  { %3999 = vmatpush3.bf16.msra.mxu0 %v4501_v8 }
 0x29d   :  { %4000 = vmatprep.subr.bf16.mxu0 %v4502_v47 }
 0x2a0   :  { %4001 = vmatpush3.bf16.msra.mxu0 %v4503_v49 }
 0x2a1   :  { %4044 = vmatprep.subr.bf16.mxu0 %v4504_v23 }
 0x2a2   :  { %v3980_v19 = vpop.f32.mrb[24].mxu0 }
 0x2a3   :  { %v3981_v2 = vpop.f32.mrb[25].mxu0 }
 0x2a4   :  { %v3982_v4 = vadd.f32 %v3981_v2, %v3980_v19  ;;  %v3983_v7 = vpop.f32.mrb[26].mxu0  ;;  %v4505_v2 = vld [vmem:[#allocation12 + $0x8] sm:$0xff]  }
 0x2a5   :  { %v3984_v3 = vpop.f32.mrb[27].mxu0 }
 0x2a6   :  { %v3985_v51 = vadd.f32 %v3984_v3, %v3983_v7  ;;  %v2241_v34 = vmax.f32 %v3982_v4, 0.0  ;;  %v4506_v4 = vld [vmem:[#allocation12 + $0x10] sm:$0xff]   ;;  %v4507_v7 = vld [vmem:[#allocation12 + $0x18] sm:$0xff]   ;;  %v4508_v3 = vld [vmem:[#allocation12 + $0x20] sm:$0xff]  }
 0x2a8   :  { %v2242_v35 = vmax.f32 %v3985_v51, 0.0  ;;  %v4509_v51 = vld [vmem:[#allocation12 + $0x28] sm:$0xff]  }
 0x2aa   :  { %v2244_v48 = vpack.c.bf16 %v2242_v35, %v2241_v34  ;;  %v4510_v34 = vld [vmem:[#allocation12 + $0x30] sm:$0xff]   ;;  %v4511_v35 = vld [vmem:[#allocation12 + $0x38] sm:$0xff]  }
 0x2ac   :  { %3147 = vmatmul.mubr.bf16.gmra.mrb[28].mxu1 %v2244_v48 }
 0x2cf   :  { %v2979_v20 = vpop.f32.mrb[28].mxu0 }
 0x2d0   :  { %v2981_v40 = vpop.f32.mrb[29].mxu0  ;;  %v2980_v57 = vadd.f32 %v2979_v20, %v2378_v54  ;;  %v3782_v20 = vld [vmem:[%s5677_s7] ss:$0 sm:$0xff] }
 0x2d1   :  { %v2983_v5 = vpop.f32.mrb[30].mxu0  ;;  %v2982_v0 = vadd.f32 %v2981_v40, %v2382_v55 }
 0x2d2   :  { %v2985_v41 = vpop.f32.mrb[31].mxu0  ;;  %v2984_v60 = vadd.f32 %v2983_v5, %v2378_v54 }
 0x2d3   :  { %v2986_v61 = vadd.f32 %v2985_v41, %v2382_v55 }
 0x2d7   :  { %v2989_v43 = vpop.f32.mrb[32].mxu0 }
 0x2d8   :  { %v2991_v10 = vpop.f32.mrb[33].mxu0  ;;  %v2990_v18 = vadd.f32 %v2989_v43, %v2378_v54 }
 0x2d9   :  { %v2993_v36 = vpop.f32.mrb[34].mxu0  ;;  %v2992_v28 = vadd.f32 %v2991_v10, %v2382_v55 }
 0x2da   :  { %v2995_v44 = vpop.f32.mrb[35].mxu0  ;;  %v2994_v33 = vadd.f32 %v2993_v36, %v2378_v54 }
 0x2db   :  { %v2996_v25 = vadd.f32 %v2995_v44, %v2382_v55 }
 0x36c   :  { %v3138_v58 = vpop.f32.mrb[24].mxu1 }
 0x36d   :  { %v4065_v59 = vadd.f32 %v3138_v58, %v2980_v57  ;;  %v3140_v46 = vpop.f32.mrb[25].mxu1  ;;  %v3799_v58 = vld [vmem:[%s5679_s9] ss:$0 sm:$0xff] }
 0x36e   :  { %v4067_v62 = vadd.f32 %v3140_v46, %v2982_v0  ;;  %v3142_v50 = vpop.f32.mrb[26].mxu1 }
 0x36f   :  { %v4069_v11 = vadd.f32 %v3142_v50, %v2984_v60  ;;  %v3144_v12 = vpop.f32.mrb[27].mxu1  ;;  %v3157_v17 = vmax.f32 %v4065_v59, 0.0 }
 0x370   :  { %v4071_v45 = vadd.f32 %v3144_v12, %v2986_v61  ;;  %v3158_v13 = vmax.f32 %v4067_v62, 0.0 }
 0x371   :  { %v3159_v31 = vmax.f32 %v4069_v11, 0.0 }
 0x372   :  { %v3160_v14 = vmax.f32 %v4071_v45, 0.0 }
 0x373   :  { %v3165_v63 = vpack.c.bf16 %v3159_v31, %v3157_v17 }
 0x374   :  { %v3166_v6 = vpack.c.bf16 %v3160_v14, %v3158_v13 }
 0x376   :  { %3336 = vmatprep.mubr.bf16.mxu0 %v3166_v6 }
 0x377   :  { %3337 = vmatmul.mubr.bf16.vlgmr.msra.gmra.mrb[36].mxu0 %v3165_v63 }
 0x378   :  { %4045 = vmatpush3.bf16.msra.mxu0 %v4504_v23 }
 0x379   :  { %4046 = vmatprep.subr.bf16.mxu0 %v4505_v2 }
 0x37c   :  { %4047 = vmatpush3.bf16.msra.mxu0 %v4505_v2 }
 0x37d   :  { %4048 = vmatprep.subr.bf16.mxu0 %v4506_v4 }
 0x37f   :  { %v3148_v16 = vpop.f32.mrb[28].mxu1 }
 0x380   :  { %v4073_v21 = vadd.f32 %v3148_v16, %v2990_v18  ;;  %v3150_v22 = vpop.f32.mrb[29].mxu1  ;;  %4049 = vmatpush3.bf16.msra.mxu0 %v4506_v4 }
 0x381   :  { %v4075_v27 = vadd.f32 %v3150_v22, %v2992_v28  ;;  %v3152_v53 = vpop.f32.mrb[30].mxu1  ;;  %4050 = vmatprep.subr.bf16.mxu0 %v4507_v7 }
 0x382   :  { %v4077_v26 = vadd.f32 %v3152_v53, %v2994_v33  ;;  %v3154_v37 = vpop.f32.mrb[31].mxu1  ;;  %v3161_v39 = vmax.f32 %v4073_v21, 0.0 }
 0x383   :  { %v4079_v42 = vadd.f32 %v3154_v37, %v2996_v25  ;;  %v3162_v15 = vmax.f32 %v4075_v27, 0.0 }
 0x384   :  { %v3163_v29 = vmax.f32 %v4077_v26, 0.0  ;;  %4051 = vmatpush3.bf16.msra.mxu0 %v4507_v7 }
 0x385   :  { %v3164_v30 = vmax.f32 %v4079_v42, 0.0  ;;  %4052 = vmatprep.subr.bf16.mxu0 %v4508_v3 }
 0x386   :  { %v3167_v24 = vpack.c.bf16 %v3163_v29, %v3161_v39 }
 0x387   :  { %v3168_v19 = vpack.c.bf16 %v3164_v30, %v3162_v15 }
 0x388   :  { %4053 = vmatpush3.bf16.msra.mxu0 %v4508_v3 }
 0x389   :  { %3344 = vmatprep.mubr.bf16.mxu0 %v3168_v19  ;;  %4054 = vmatprep.subr.bf16.mxu0 %v4509_v51 }
 0x38a   :  { %3345 = vmatmul.mubr.bf16.gmra.mrb[40].mxu0 %v3167_v24 }
 0x38c   :  { %4055 = vmatpush3.bf16.msra.mxu0 %v4509_v51 }
 0x38d   :  { %4056 = vmatprep.subr.bf16.mxu0 %v4510_v34 }
 0x390   :  { %4057 = vmatpush3.bf16.msra.mxu0 %v4510_v34 }
 0x391   :  { %4058 = vmatprep.subr.bf16.mxu0 %v4511_v35 }
 0x394   :  { %4059 = vmatpush3.bf16.msra.mxu0 %v4511_v35 }
 0x44a   :  { %v4002_v48 = vpop.f32.mrb[36].mxu0 }
 0x44b   :  { %v4003_v40 = vpop.f32.mrb[37].mxu0 }
 0x44c   :  { %v4004_v5 = vadd.f32 %v4003_v40, %v4002_v48  ;;  %v4005_v41 = vpop.f32.mrb[38].mxu0 }
 0x44d   :  { %v4006_v43 = vpop.f32.mrb[39].mxu0 }
 0x44e   :  { %v3339_v10 = vadd.f32 %v4004_v5, %v3782_v20  ;;  %v4007_v36 = vadd.f32 %v4006_v43, %v4005_v41 }
 0x450   :  { %v3342_v44 = vadd.f32 %v4007_v36, %v3782_v20  ;;  %v3353_v56 = vmax.f32 %v3339_v10, 0.0 }
 0x452   :  { %v3354_v1 = vmax.f32 %v3342_v44, 0.0 }
 0x454   :  { %v3357_v8 = vpack.c.bf16 %v3354_v1, %v3353_v56 }
 0x456   :  { %4060 = vmatprep.mubr.bf16.mxu0 %v3357_v8 }
 0x45d   :  { %v4008_v47 = vpop.f32.mrb[40].mxu0 }
 0x45e   :  { %v4009_v49 = vpop.f32.mrb[41].mxu0 }
 0x45f   :  { %v4010_v23 = vadd.f32 %v4009_v49, %v4008_v47  ;;  %v4011_v9 = vpop.f32.mrb[42].mxu0 }
 0x460   :  { %v4012_v38 = vpop.f32.mrb[43].mxu0 }
 0x461   :  { %v3347_v52 = vadd.f32 %v4010_v23, %v3782_v20  ;;  %v4013_v32 = vadd.f32 %v4012_v38, %v4011_v9 }
 0x463   :  { %v3350_v54 = vadd.f32 %v4013_v32, %v3782_v20  ;;  %v3355_v55 = vmax.f32 %v3347_v52, 0.0 }
 0x465   :  { %v3356_v57 = vmax.f32 %v3350_v54, 0.0 }
 0x467   :  { %v3358_v0 = vpack.c.bf16 %v3356_v57, %v3355_v55 }
 0x469   :  { %4061 = vmatmul.mubr.bf16.vlgmr.msra.gmra.mrb[44].mxu0 %v3358_v0 }
 0x53c   :  { %v4062_v60 = vpop.f32.mrb[44].mxu0 }
 0x53d   :  { %v3473_v59 = vadd.f32 %v4062_v60, %v3799_v58  ;;  %v3464_v46 = vpop.f32.mrb[45].mxu0 }
 0x53e   :  { %v3465_v61 = vadd.f32 %v3799_v58, %v3464_v46  ;;  %v4063_v62 = vpop.f32.mrb[46].mxu0 }
 0x53f   :  { %3481 = vst [vmem:[#allocation14 + $0x10] sm:$0xff] %v3473_v59  ;;  %v3476_v50 = vadd.f32 %v4063_v62, %v3799_v58  ;;  %v3467_v11 = vpop.f32.mrb[47].mxu0 }
 0x540   :  { %3479 = vst [vmem:[#allocation14] sm:$0xff] %v3465_v61  ;;  %v3468_v12 = vadd.f32 %v3799_v58, %v3467_v11 }
 0x541   :  { %3482 = vst [vmem:[#allocation14 + $0x18] sm:$0xff] %v3476_v50 }
 0x542   :  { %3480 = vst [vmem:[#allocation14 + $0x8] sm:$0xff] %v3468_v12 }
 0x543   :  { %4673 = shalt.err (!%p4670_p10)
}
 0x544   :  { %s4674_s20 = scalar_lea.hbm %s5680_s10, 512 }
 0x545   :  { %p4675_p11 = scmp.ne.s32.totalorder %s5680_s10, %s4674_s20  ;;  %p4678_p12 = scmp.lt.u32.totalorder %s4674_s20, %s5680_s10 }
 0x547   :  { %p4680_p13 = pnand %p4678_p12, %p4675_p11 }
 0x549   :  { %4683 = shalt.err (!%p4680_p13)
}
 0x54a   :  { %3494 = dma.vmem_to_hbm [thread:$0]  %s3489_s15, 512, %s5680_s10, [#allocation5], %s4698_s1, %s4698_s1, %s4699_s14  }
 0x54b   :  { %4692 = dma.done.wait [#allocation5], 512  }
 0x54c   :  { %4693 = vsyncadd [#allocation5], 4294966784 }
 0x54d   :  { %3498 = vsyncpa [#allocation4], 1 }
 0x54e   :  { %3499 = vsyncpa [#allocation7], 1 }
 0x54f   :  { %3500 = vsyncpa [#allocation10], 1 }
 0x550   :  { %3501 = vsyncpa [#allocation13], 1 }
 0x551   :  { %3502 = vsyncpa [#allocation5], 1 }

</bundles_post_ra>
